<compile_context>
chip_gen: v5e
topology: v5e:2x2
jax: 0.10.0
libtpu: 0.0.40
codegen_flags: <defaults>
</compile_context>

<pallas_src>
import jax
import jax.numpy as jnp
import numpy as np
from jax.experimental import pallas as pl
from jax.experimental.pallas import tpu as pltpu

# ----------------- model hyper-parameters (module defaults, small img_dim) -----------------
BATCH = 2
IN_CHANNELS = 1
NUM_CLASSES = 8
IMG_DIM = 16                       # small spatial size consistent with the module's formula
C1, C2, C3, C4 = 32, 32, 64, 64    # conv1..conv4 output channels (module defaults)
K, STRIDE, PAD = 2, 1, 1           # conv kernel / stride / padding (module defaults)
POOL_K, POOL_S = 2, 2              # MaxPool2d kernel / stride (module defaults)
FC1_OUT = 50                       # fc1_output (module default)
B_TILE = 1                         # batch tile per grid program ("parallel" -> 2 TCs on v7x)


def conv_dim(d):
    return (d + 2 * PAD - K) // STRIDE + 1


def pool_dim(d):
    return (d - POOL_K) // POOL_S + 1


def round_up(v, m):
    return ((v + m - 1) // m) * m


D0 = IMG_DIM                      # 16
D1 = pool_dim(conv_dim(D0))       # 8
D2 = pool_dim(conv_dim(D1))       # 4
D3 = pool_dim(conv_dim(D2))       # 2
D4 = pool_dim(conv_dim(D3))       # 1
FLAT_DIM = C4 * D4 * D4           # 64
assert D4 == 1                    # torch NCHW flatten == channel order, no regrouping needed

STAGES = ((D0, IN_CHANNELS, C1), (D1, C1, C2), (D2, C2, C3), (D3, C3, C4))


def stage_geom(d_in):
    """Static per-stage geometry."""
    hc = conv_dim(d_in)            # conv output height/width (odd: 17/9/5/3)
    hp = pool_dim(hc)              # pooled output height/width (8/4/2/1)
    hcw = round_up(hc, 8)          # 8-aligned conv width (junk cols beyond hc, never pooled)
    hpad = d_in + 2 * PAD          # padded height actually read by the taps
    wpad = hcw + 1                 # padded width (>= d_in+2, extra cols zeroed)
    return hc, hp, hcw, hpad, wpad


# ------------------------------ fused forward-pass kernel ----------------------------------
def _cnn42_kernel(x_ref,
                  w1_ref, b1_ref, w2_ref, b2_ref, w3_ref, b3_ref, w4_ref, b4_ref,
                  fw1_ref, fb1_ref, fw2_ref, fb2_ref,
                  o_ref,
                  pad1_ref, pad2_ref, pad3_ref, pad4_ref):
    pads = (pad1_ref, pad2_ref, pad3_ref, pad4_ref)

    # Zero only the padding border + alignment junk columns of each padded scratch
    # (interiors are fully overwritten by the input copy / pooled writes below).
    for (d_in, c_in, _), ref in zip(STAGES, pads):
        _, _, _, hpad, wpad = stage_geom(d_in)
        ref[:, 0:1, :, :] = jnp.zeros((B_TILE, 1, wpad, c_in), jnp.float32)
        ref[:, hpad - 1:hpad, :, :] = jnp.zeros((B_TILE, 1, wpad, c_in), jnp.float32)
        ref[:, :, 0:1, :] = jnp.zeros((B_TILE, hpad, 1, c_in), jnp.float32)
        ref[:, :, d_in + 1:wpad, :] = jnp.zeros(
            (B_TILE, hpad, wpad - (d_in + 1), c_in), jnp.float32)

    # Input image -> interior of the stage-1 padded scratch (one slice store).
    pad1_ref[:, PAD:PAD + D0, PAD:PAD + D0, :] = x_ref[...]

    def conv_relu_pool(in_ref, d_in, c_in, w_ref, b_ref, c_out):
        """Conv2d(2,1,1) + ReLU + MaxPool2d(2,2) on a zero-padded VMEM scratch.
        Returns the pooled activation as a (B_TILE, hp, hp, c_out) value."""
        hc, hp, hcw, _, _ = stage_geom(d_in)
        taps = [in_ref[:, ky:ky + hc, kx:kx + hcw, :]
                for ky in range(K) for kx in range(K)]          # 4 x (B, hc, hcw, c_in)

        if c_in == 1:
            # Stage 1: contraction depth would be 4 -- do it on the VPU (exact, no MXU).
            conv = None
            for t, tap in enumerate(taps):
                w_row = w_ref[t:t + 1, :].reshape(1, 1, 1, c_out)
                term = tap * w_row
                conv = term if conv is None else conv + term
            conv = jnp.maximum(conv + b_ref[...].reshape(1, 1, 1, c_out), 0.0)
        else:
            # im2col: channel-axis concat of the 4 taps -> single MXU matmul, K = 4*c_in.
            patch = jnp.concatenate(taps, axis=-1)              # (B, hc, hcw, 4*c_in)
            patch = patch.reshape(B_TILE * hc * hcw, K * K * c_in)   # free: hcw % 8 == 0
            conv = jnp.dot(patch, w_ref[...], preferred_element_type=jnp.float32)
            conv = jnp.maximum(conv + b_ref[...], 0.0)
            conv = conv.reshape(B_TILE, hc, hcw, c_out)         # free split back

        # MaxPool2d(2,2), floor mode: rows via a leading-axis reshape split,
        # columns via sublane pair-slices; one concat, one value out.
        v = conv[:, :POOL_S * hp].reshape(B_TILE * hp, POOL_S, hcw, c_out)
        rows = jnp.maximum(v[:, 0], v[:, 1])                    # (B*hp, hcw, c_out)
        cols = [jnp.maximum(rows[:, POOL_S * q:POOL_S * q + 1, :],
                            rows[:, POOL_S * q + 1:POOL_S * q + 2, :])
                for q in range(hp)]
        pooled = jnp.concatenate(cols, axis=1)                  # (B*hp, hp, c_out)
        return pooled.reshape(B_TILE, hp, hp, c_out)

    p1 = conv_relu_pool(pad1_ref, D0, IN_CHANNELS, w1_ref, b1_ref, C1)
    pad2_ref[:, PAD:PAD + D1, PAD:PAD + D1, :] = p1             # one wide interior store
    p2 = conv_relu_pool(pad2_ref, D1, C1, w2_ref, b2_ref, C2)
    pad3_ref[:, PAD:PAD + D2, PAD:PAD + D2, :] = p2
    p3 = conv_relu_pool(pad3_ref, D2, C2, w3_ref, b3_ref, C3)
    pad4_ref[:, PAD:PAD + D3, PAD:PAD + D3, :] = p3
    p4 = conv_relu_pool(pad4_ref, D3, C3, w4_ref, b4_ref, C4)   # (B, 1, 1, C4)

    # FC head: D4 == 1, so torch's NCHW flatten is just the channel axis -> two 2-D dots.
    flat = p4.reshape(B_TILE, C4)
    h1 = jnp.maximum(jnp.dot(flat, fw1_ref[...], preferred_element_type=jnp.float32)
                     + fb1_ref[...], 0.0)
    logits = jnp.dot(h1, fw2_ref[...], preferred_element_type=jnp.float32) + fb2_ref[...]
    o_ref[...] = logits.reshape(B_TILE, 1, NUM_CLASSES)


# ------------------------------------ wrapper / glue ---------------------------------------
@jax.jit
def cnn42_forward(x_nchw, params):
    n = x_nchw.shape[0]
    assert n % B_TILE == 0
    x = jnp.transpose(x_nchw, (0, 2, 3, 1))                     # NHWC: (N, 16, 16, 1)

    def conv_w_cols(w):   # torch (Cout, Cin, Kh, Kw) -> (Kh*Kw*Cin, Cout), tap order (ky,kx,ci)
        c_out, c_in = w.shape[0], w.shape[1]
        return jnp.transpose(w, (2, 3, 1, 0)).reshape(K * K * c_in, c_out)

    def row_bias(b):
        return b.reshape(1, -1)

    weights = (
        conv_w_cols(params["conv1_w"]), row_bias(params["conv1_b"]),
        conv_w_cols(params["conv2_w"]), row_bias(params["conv2_b"]),
        conv_w_cols(params["conv3_w"]), row_bias(params["conv3_b"]),
        conv_w_cols(params["conv4_w"]), row_bias(params["conv4_b"]),
        params["fc1_w"], row_bias(params["fc1_b"]),
        params["fc2_w"], row_bias(params["fc2_b"]),
    )

    x_spec = pl.BlockSpec((B_TILE, IMG_DIM, IMG_DIM, IN_CHANNELS),
                          lambda i: (i, 0, 0, 0))
    w_specs = [pl.BlockSpec(tuple(w.shape), lambda i, nd=w.ndim: (0,) * nd) for w in weights]
    out_spec = pl.BlockSpec((B_TILE, 1, NUM_CLASSES), lambda i: (i, 0, 0))

    def pad_scratch(d_in, c_in):
        _, _, _, hpad, wpad = stage_geom(d_in)
        return pltpu.VMEM((B_TILE, hpad, wpad, c_in), jnp.float32)

    scratch_shapes = [pad_scratch(d_in, c_in) for d_in, c_in, _ in STAGES]

    flops = 0
    for d_in, c_in, c_out in STAGES:
        hc = conv_dim(d_in)
        flops += 2 * n * hc * hc * (K * K * c_in) * c_out
    flops += 2 * n * (FLAT_DIM * FC1_OUT + FC1_OUT * NUM_CLASSES)
    bytes_accessed = 4 * (x.size + sum(int(np.prod(p.shape)) for p in params.values())
                          + n * NUM_CLASSES)

    out = pl.pallas_call(
        _cnn42_kernel,
        out_shape=jax.ShapeDtypeStruct((n, 1, NUM_CLASSES), jnp.float32),
        grid_spec=pltpu.PrefetchScalarGridSpec(
            num_scalar_prefetch=0,
            grid=(n // B_TILE,),
            in_specs=[x_spec] + w_specs,
            out_specs=out_spec,
            scratch_shapes=scratch_shapes),
        compiler_params=pltpu.CompilerParams(dimension_semantics=("parallel",)),
        cost_estimate=pl.CostEstimate(flops=int(flops), transcendentals=0,
                                      bytes_accessed=int(bytes_accessed)),
    )(x, *weights)
    return out.reshape(n, NUM_CLASSES)


# ------------------------------ deterministic parameter init -------------------------------
def init_params(key):
    ks = jax.random.split(key, 12)

    def conv_w(k, c_out, c_in):
        return jax.random.normal(k, (c_out, c_in, K, K), jnp.float32) / np.sqrt(c_in * K * K)

    def dense_w(k, fan_in, fan_out):
        return jax.random.normal(k, (fan_in, fan_out), jnp.float32) / np.sqrt(fan_in)

    return {
        "conv1_w": conv_w(ks[0], C1, IN_CHANNELS),
        "conv1_b": jax.random.normal(ks[1], (C1,), jnp.float32) * 0.01,
        "conv2_w": conv_w(ks[2], C2, C1),
        "conv2_b": jax.random.normal(ks[3], (C2,), jnp.float32) * 0.01,
        "conv3_w": conv_w(ks[4], C3, C2),
        "conv3_b": jax.random.normal(ks[5], (C3,), jnp.float32) * 0.01,
        "conv4_w": conv_w(ks[6], C4, C3),
        "conv4_b": jax.random.normal(ks[7], (C4,), jnp.float32) * 0.01,
        "fc1_w": dense_w(ks[8], FLAT_DIM, FC1_OUT),   # rows in torch NCHW flatten order (D4=1)
        "fc1_b": jax.random.normal(ks[9], (FC1_OUT,), jnp.float32) * 0.01,
        "fc2_w": dense_w(ks[10], FC1_OUT, NUM_CLASSES),
        "fc2_b": jax.random.normal(ks[11], (NUM_CLASSES,), jnp.float32) * 0.01,
    }


# ------------------------------ pure-JAX reference (checking) ------------------------------
def reference_forward(x_nchw, params):
    x = jnp.transpose(x_nchw, (0, 2, 3, 1))

    def stage(x, w, b):
        y = jax.lax.conv_general_dilated(
            x, jnp.transpose(w, (2, 3, 1, 0)), (STRIDE, STRIDE),
            ((PAD, PAD), (PAD, PAD)), dimension_numbers=("NHWC", "HWIO", "NHWC"))
        y = jnp.maximum(y + b[None, None, None, :], 0.0)
        y = jax.lax.reduce_window(y, -jnp.inf, jax.lax.max,
                                  (1, POOL_K, POOL_K, 1), (1, POOL_S, POOL_S, 1), "VALID")
        return y

    x = stage(x, params["conv1_w"], params["conv1_b"])
    x = stage(x, params["conv2_w"], params["conv2_b"])
    x = stage(x, params["conv3_w"], params["conv3_b"])
    x = stage(x, params["conv4_w"], params["conv4_b"])
    nb, hp, wp, c = x.shape
    x = jnp.transpose(x, (0, 3, 1, 2)).reshape(nb, c * hp * wp)   # torch .view (NCHW) flatten
    h1 = jnp.maximum(x @ params["fc1_w"] + params["fc1_b"][None, :], 0.0)
    return h1 @ params["fc2_w"] + params["fc2_b"][None, :]        # logits (no softmax in spec)


# -------------------------------------------- main -----------------------------------------
if __name__ == "__main__":
    key = jax.random.PRNGKey(0)
    k_x, k_p = jax.random.split(key)
    params = init_params(k_p)
    x = jax.random.normal(k_x, (BATCH, IN_CHANNELS, IMG_DIM, IMG_DIM), jnp.float32)

    out = jax.block_until_ready(cnn42_forward(x, params))
    ref = jax.block_until_ready(reference_forward(x, params))

    assert out.shape == (BATCH, NUM_CLASSES)
    np.testing.assert_allclose(np.asarray(out), np.asarray(ref), rtol=1e-4, atol=1e-4)
    print("KERNEL_OK")
</pallas_src>

<mosaic_0001>
module attributes {stable_mosaic.version = 11 : i64} {
  func.func @_cnn42_kernel(%arg0: i32, %arg1: memref<1x16x16x1xf32, #tpu.memory_space<vmem>>, %arg2: memref<4x32xf32, #tpu.memory_space<vmem>>, %arg3: memref<1x32xf32, #tpu.memory_space<vmem>>, %arg4: memref<128x32xf32, #tpu.memory_space<vmem>>, %arg5: memref<1x32xf32, #tpu.memory_space<vmem>>, %arg6: memref<128x64xf32, #tpu.memory_space<vmem>>, %arg7: memref<1x64xf32, #tpu.memory_space<vmem>>, %arg8: memref<256x64xf32, #tpu.memory_space<vmem>>, %arg9: memref<1x64xf32, #tpu.memory_space<vmem>>, %arg10: memref<64x50xf32, #tpu.memory_space<vmem>>, %arg11: memref<1x50xf32, #tpu.memory_space<vmem>>, %arg12: memref<50x8xf32, #tpu.memory_space<vmem>>, %arg13: memref<1x8xf32, #tpu.memory_space<vmem>>, %arg14: memref<1x1x8xf32, #tpu.memory_space<vmem>>, %arg15: memref<1x18x25x1xf32, #tpu.memory_space<vmem>>, %arg16: memref<1x10x17x32xf32, #tpu.memory_space<vmem>>, %arg17: memref<1x6x9x32xf32, #tpu.memory_space<vmem>>, %arg18: memref<1x4x9x64xf32, #tpu.memory_space<vmem>>) attributes {dimension_semantics = [#tpu.dimension_semantics<parallel>], iteration_bounds = array<i64: 2>, scalar_prefetch = 0 : i64, scratch_operands = 4 : i64, tpu.core_type = #tpu.core_type<tc>, window_params = [{transform_indices = @transform_0, window_bounds = array<i64: 1, 16, 16, 1>}, {pipeline_mode = #tpu.pipeline_mode<synchronous>, transform_indices = @transform_1, window_bounds = array<i64: 4, 32>}, {pipeline_mode = #tpu.pipeline_mode<synchronous>, transform_indices = @transform_2, window_bounds = array<i64: 1, 32>}, {pipeline_mode = #tpu.pipeline_mode<synchronous>, transform_indices = @transform_3, window_bounds = array<i64: 128, 32>}, {pipeline_mode = #tpu.pipeline_mode<synchronous>, transform_indices = @transform_4, window_bounds = array<i64: 1, 32>}, {pipeline_mode = #tpu.pipeline_mode<synchronous>, transform_indices = @transform_5, window_bounds = array<i64: 128, 64>}, {pipeline_mode = #tpu.pipeline_mode<synchronous>, transform_indices = @transform_6, window_bounds = array<i64: 1, 64>}, {pipeline_mode = #tpu.pipeline_mode<synchronous>, transform_indices = @transform_7, window_bounds = array<i64: 256, 64>}, {pipeline_mode = #tpu.pipeline_mode<synchronous>, transform_indices = @transform_8, window_bounds = array<i64: 1, 64>}, {pipeline_mode = #tpu.pipeline_mode<synchronous>, transform_indices = @transform_9, window_bounds = array<i64: 64, 50>}, {pipeline_mode = #tpu.pipeline_mode<synchronous>, transform_indices = @transform_10, window_bounds = array<i64: 1, 50>}, {pipeline_mode = #tpu.pipeline_mode<synchronous>, transform_indices = @transform_11, window_bounds = array<i64: 50, 8>}, {pipeline_mode = #tpu.pipeline_mode<synchronous>, transform_indices = @transform_12, window_bounds = array<i64: 1, 8>}, {transform_indices = @transform_13, window_bounds = array<i64: 1, 1, 8>}]} {
    %cst = arith.constant 0.000000e+00 : f32
    %0 = vector.broadcast %cst : f32 to vector<1x1x25x1xf32>
    %c0 = arith.constant 0 : index
    %c0_0 = arith.constant 0 : index
    %c0_1 = arith.constant 0 : index
    %c0_2 = arith.constant 0 : index
    %1 = vector.load %arg15[%c0, %c0_0, %c0_1, %c0_2] : memref<1x18x25x1xf32, #tpu.memory_space<vmem>>, vector<1x1x25x1xf32>
    tpu.vector_store %arg15[%c0, %c0_0, %c0_1, %c0_2], %0 {strides = array<i32>} : memref<1x18x25x1xf32, #tpu.memory_space<vmem>>, vector<1x1x25x1xf32>,
    %cst_3 = arith.constant 0.000000e+00 : f32
    %2 = vector.broadcast %cst_3 : f32 to vector<1x1x25x1xf32>
    %c0_4 = arith.constant 0 : index
    %c17 = arith.constant 17 : index
    %c0_5 = arith.constant 0 : index
    %c0_6 = arith.constant 0 : index
    %3 = vector.load %arg15[%c0_4, %c17, %c0_5, %c0_6] : memref<1x18x25x1xf32, #tpu.memory_space<vmem>>, vector<1x1x25x1xf32>
    tpu.vector_store %arg15[%c0_4, %c17, %c0_5, %c0_6], %2 {strides = array<i32>} : memref<1x18x25x1xf32, #tpu.memory_space<vmem>>, vector<1x1x25x1xf32>,
    %cst_7 = arith.constant 0.000000e+00 : f32
    %4 = vector.broadcast %cst_7 : f32 to vector<1x18x1x1xf32>
    %c0_8 = arith.constant 0 : index
    %c0_9 = arith.constant 0 : index
    %c0_10 = arith.constant 0 : index
    %c0_11 = arith.constant 0 : index
    %5 = vector.load %arg15[%c0_8, %c0_9, %c0_10, %c0_11] : memref<1x18x25x1xf32, #tpu.memory_space<vmem>>, vector<1x18x1x1xf32>
    tpu.vector_store %arg15[%c0_8, %c0_9, %c0_10, %c0_11], %4 {strides = array<i32>} : memref<1x18x25x1xf32, #tpu.memory_space<vmem>>, vector<1x18x1x1xf32>,
    %cst_12 = arith.constant 0.000000e+00 : f32
    %6 = vector.broadcast %cst_12 : f32 to vector<1x18x8x1xf32>
    %c0_13 = arith.constant 0 : index
    %c0_14 = arith.constant 0 : index
    %c17_15 = arith.constant 17 : index
    %c0_16 = arith.constant 0 : index
    %7 = vector.load %arg15[%c0_13, %c0_14, %c17_15, %c0_16] : memref<1x18x25x1xf32, #tpu.memory_space<vmem>>, vector<1x18x8x1xf32>
    tpu.vector_store %arg15[%c0_13, %c0_14, %c17_15, %c0_16], %6 {strides = array<i32>} : memref<1x18x25x1xf32, #tpu.memory_space<vmem>>, vector<1x18x8x1xf32>,
    %cst_17 = arith.constant 0.000000e+00 : f32
    %8 = vector.broadcast %cst_17 : f32 to vector<1x1x17x32xf32>
    %c0_18 = arith.constant 0 : index
    %c0_19 = arith.constant 0 : index
    %c0_20 = arith.constant 0 : index
    %c0_21 = arith.constant 0 : index
    %9 = vector.load %arg16[%c0_18, %c0_19, %c0_20, %c0_21] : memref<1x10x17x32xf32, #tpu.memory_space<vmem>>, vector<1x1x17x32xf32>
    tpu.vector_store %arg16[%c0_18, %c0_19, %c0_20, %c0_21], %8 {strides = array<i32>} : memref<1x10x17x32xf32, #tpu.memory_space<vmem>>, vector<1x1x17x32xf32>,
    %cst_22 = arith.constant 0.000000e+00 : f32
    %10 = vector.broadcast %cst_22 : f32 to vector<1x1x17x32xf32>
    %c0_23 = arith.constant 0 : index
    %c9 = arith.constant 9 : index
    %c0_24 = arith.constant 0 : index
    %c0_25 = arith.constant 0 : index
    %11 = vector.load %arg16[%c0_23, %c9, %c0_24, %c0_25] : memref<1x10x17x32xf32, #tpu.memory_space<vmem>>, vector<1x1x17x32xf32>
    tpu.vector_store %arg16[%c0_23, %c9, %c0_24, %c0_25], %10 {strides = array<i32>} : memref<1x10x17x32xf32, #tpu.memory_space<vmem>>, vector<1x1x17x32xf32>,
    %cst_26 = arith.constant 0.000000e+00 : f32
    %12 = vector.broadcast %cst_26 : f32 to vector<1x10x1x32xf32>
    %c0_27 = arith.constant 0 : index
    %c0_28 = arith.constant 0 : index
    %c0_29 = arith.constant 0 : index
    %c0_30 = arith.constant 0 : index
    %13 = vector.load %arg16[%c0_27, %c0_28, %c0_29, %c0_30] : memref<1x10x17x32xf32, #tpu.memory_space<vmem>>, vector<1x10x1x32xf32>
    tpu.vector_store %arg16[%c0_27, %c0_28, %c0_29, %c0_30], %12 {strides = array<i32>} : memref<1x10x17x32xf32, #tpu.memory_space<vmem>>, vector<1x10x1x32xf32>,
    %cst_31 = arith.constant 0.000000e+00 : f32
    %14 = vector.broadcast %cst_31 : f32 to vector<1x10x8x32xf32>
    %c0_32 = arith.constant 0 : index
    %c0_33 = arith.constant 0 : index
    %c9_34 = arith.constant 9 : index
    %c0_35 = arith.constant 0 : index
    %15 = vector.load %arg16[%c0_32, %c0_33, %c9_34, %c0_35] : memref<1x10x17x32xf32, #tpu.memory_space<vmem>>, vector<1x10x8x32xf32>
    tpu.vector_store %arg16[%c0_32, %c0_33, %c9_34, %c0_35], %14 {strides = array<i32>} : memref<1x10x17x32xf32, #tpu.memory_space<vmem>>, vector<1x10x8x32xf32>,
    %cst_36 = arith.constant 0.000000e+00 : f32
    %16 = vector.broadcast %cst_36 : f32 to vector<1x1x9x32xf32>
    %c0_37 = arith.constant 0 : index
    %c0_38 = arith.constant 0 : index
    %c0_39 = arith.constant 0 : index
    %c0_40 = arith.constant 0 : index
    %17 = vector.load %arg17[%c0_37, %c0_38, %c0_39, %c0_40] : memref<1x6x9x32xf32, #tpu.memory_space<vmem>>, vector<1x1x9x32xf32>
    tpu.vector_store %arg17[%c0_37, %c0_38, %c0_39, %c0_40], %16 {strides = array<i32>} : memref<1x6x9x32xf32, #tpu.memory_space<vmem>>, vector<1x1x9x32xf32>,
    %cst_41 = arith.constant 0.000000e+00 : f32
    %18 = vector.broadcast %cst_41 : f32 to vector<1x1x9x32xf32>
    %c0_42 = arith.constant 0 : index
    %c5 = arith.constant 5 : index
    %c0_43 = arith.constant 0 : index
    %c0_44 = arith.constant 0 : index
    %19 = vector.load %arg17[%c0_42, %c5, %c0_43, %c0_44] : memref<1x6x9x32xf32, #tpu.memory_space<vmem>>, vector<1x1x9x32xf32>
    tpu.vector_store %arg17[%c0_42, %c5, %c0_43, %c0_44], %18 {strides = array<i32>} : memref<1x6x9x32xf32, #tpu.memory_space<vmem>>, vector<1x1x9x32xf32>,
    %cst_45 = arith.constant 0.000000e+00 : f32
    %20 = vector.broadcast %cst_45 : f32 to vector<1x6x1x32xf32>
    %c0_46 = arith.constant 0 : index
    %c0_47 = arith.constant 0 : index
    %c0_48 = arith.constant 0 : index
    %c0_49 = arith.constant 0 : index
    %21 = vector.load %arg17[%c0_46, %c0_47, %c0_48, %c0_49] : memref<1x6x9x32xf32, #tpu.memory_space<vmem>>, vector<1x6x1x32xf32>
    tpu.vector_store %arg17[%c0_46, %c0_47, %c0_48, %c0_49], %20 {strides = array<i32>} : memref<1x6x9x32xf32, #tpu.memory_space<vmem>>, vector<1x6x1x32xf32>,
    %cst_50 = arith.constant 0.000000e+00 : f32
    %22 = vector.broadcast %cst_50 : f32 to vector<1x6x4x32xf32>
    %c0_51 = arith.constant 0 : index
    %c0_52 = arith.constant 0 : index
    %c5_53 = arith.constant 5 : index
    %c0_54 = arith.constant 0 : index
    %23 = vector.load %arg17[%c0_51, %c0_52, %c5_53, %c0_54] : memref<1x6x9x32xf32, #tpu.memory_space<vmem>>, vector<1x6x4x32xf32>
    tpu.vector_store %arg17[%c0_51, %c0_52, %c5_53, %c0_54], %22 {strides = array<i32>} : memref<1x6x9x32xf32, #tpu.memory_space<vmem>>, vector<1x6x4x32xf32>,
    %cst_55 = arith.constant 0.000000e+00 : f32
    %24 = vector.broadcast %cst_55 : f32 to vector<1x1x9x64xf32>
    %c0_56 = arith.constant 0 : index
    %c0_57 = arith.constant 0 : index
    %c0_58 = arith.constant 0 : index
    %c0_59 = arith.constant 0 : index
    %25 = vector.load %arg18[%c0_56, %c0_57, %c0_58, %c0_59] : memref<1x4x9x64xf32, #tpu.memory_space<vmem>>, vector<1x1x9x64xf32>
    tpu.vector_store %arg18[%c0_56, %c0_57, %c0_58, %c0_59], %24 {strides = array<i32>} : memref<1x4x9x64xf32, #tpu.memory_space<vmem>>, vector<1x1x9x64xf32>,
    %cst_60 = arith.constant 0.000000e+00 : f32
    %26 = vector.broadcast %cst_60 : f32 to vector<1x1x9x64xf32>
    %c0_61 = arith.constant 0 : index
    %c3 = arith.constant 3 : index
    %c0_62 = arith.constant 0 : index
    %c0_63 = arith.constant 0 : index
    %27 = vector.load %arg18[%c0_61, %c3, %c0_62, %c0_63] : memref<1x4x9x64xf32, #tpu.memory_space<vmem>>, vector<1x1x9x64xf32>
    tpu.vector_store %arg18[%c0_61, %c3, %c0_62, %c0_63], %26 {strides = array<i32>} : memref<1x4x9x64xf32, #tpu.memory_space<vmem>>, vector<1x1x9x64xf32>,
    %cst_64 = arith.constant 0.000000e+00 : f32
    %28 = vector.broadcast %cst_64 : f32 to vector<1x4x1x64xf32>
    %c0_65 = arith.constant 0 : index
    %c0_66 = arith.constant 0 : index
    %c0_67 = arith.constant 0 : index
    %c0_68 = arith.constant 0 : index
    %29 = vector.load %arg18[%c0_65, %c0_66, %c0_67, %c0_68] : memref<1x4x9x64xf32, #tpu.memory_space<vmem>>, vector<1x4x1x64xf32>
    tpu.vector_store %arg18[%c0_65, %c0_66, %c0_67, %c0_68], %28 {strides = array<i32>} : memref<1x4x9x64xf32, #tpu.memory_space<vmem>>, vector<1x4x1x64xf32>,
    %cst_69 = arith.constant 0.000000e+00 : f32
    %30 = vector.broadcast %cst_69 : f32 to vector<1x4x6x64xf32>
    %c0_70 = arith.constant 0 : index
    %c0_71 = arith.constant 0 : index
    %c3_72 = arith.constant 3 : index
    %c0_73 = arith.constant 0 : index
    %31 = vector.load %arg18[%c0_70, %c0_71, %c3_72, %c0_73] : memref<1x4x9x64xf32, #tpu.memory_space<vmem>>, vector<1x4x6x64xf32>
    tpu.vector_store %arg18[%c0_70, %c0_71, %c3_72, %c0_73], %30 {strides = array<i32>} : memref<1x4x9x64xf32, #tpu.memory_space<vmem>>, vector<1x4x6x64xf32>,
    %c0_74 = arith.constant 0 : index
    %c0_75 = arith.constant 0 : index
    %c0_76 = arith.constant 0 : index
    %c0_77 = arith.constant 0 : index
    %32 = vector.load %arg1[%c0_74, %c0_75, %c0_76, %c0_77] : memref<1x16x16x1xf32, #tpu.memory_space<vmem>>, vector<1x16x16x1xf32>
    %c0_78 = arith.constant 0 : index
    %c1 = arith.constant 1 : index
    %c1_79 = arith.constant 1 : index
    %c0_80 = arith.constant 0 : index
    %33 = vector.load %arg15[%c0_78, %c1, %c1_79, %c0_80] : memref<1x18x25x1xf32, #tpu.memory_space<vmem>>, vector<1x16x16x1xf32>
    tpu.vector_store %arg15[%c0_78, %c1, %c1_79, %c0_80], %32 {strides = array<i32>} : memref<1x18x25x1xf32, #tpu.memory_space<vmem>>, vector<1x16x16x1xf32>,
    %c0_81 = arith.constant 0 : index
    %c0_82 = arith.constant 0 : index
    %c0_83 = arith.constant 0 : index
    %c0_84 = arith.constant 0 : index
    %34 = vector.load %arg15[%c0_81, %c0_82, %c0_83, %c0_84] : memref<1x18x25x1xf32, #tpu.memory_space<vmem>>, vector<1x17x24x1xf32>
    %c0_85 = arith.constant 0 : index
    %c0_86 = arith.constant 0 : index
    %c1_87 = arith.constant 1 : index
    %c0_88 = arith.constant 0 : index
    %35 = vector.load %arg15[%c0_85, %c0_86, %c1_87, %c0_88] : memref<1x18x25x1xf32, #tpu.memory_space<vmem>>, vector<1x17x24x1xf32>
    %c0_89 = arith.constant 0 : index
    %c1_90 = arith.constant 1 : index
    %c0_91 = arith.constant 0 : index
    %c0_92 = arith.constant 0 : index
    %36 = vector.load %arg15[%c0_89, %c1_90, %c0_91, %c0_92] : memref<1x18x25x1xf32, #tpu.memory_space<vmem>>, vector<1x17x24x1xf32>
    %c0_93 = arith.constant 0 : index
    %c1_94 = arith.constant 1 : index
    %c1_95 = arith.constant 1 : index
    %c0_96 = arith.constant 0 : index
    %37 = vector.load %arg15[%c0_93, %c1_94, %c1_95, %c0_96] : memref<1x18x25x1xf32, #tpu.memory_space<vmem>>, vector<1x17x24x1xf32>
    %c0_97 = arith.constant 0 : index
    %c0_98 = arith.constant 0 : index
    %38 = vector.load %arg2[%c0_97, %c0_98] : memref<4x32xf32, #tpu.memory_space<vmem>>, vector<1x32xf32>
    %39 = vector.shape_cast %38 : vector<1x32xf32> to vector<1x1x1x32xf32>
    %40 = vector.broadcast %34 : vector<1x17x24x1xf32> to vector<1x17x24x32xf32>
    %41 = vector.broadcast %39 : vector<1x1x1x32xf32> to vector<1x17x24x32xf32>
    %42 = arith.mulf %40, %41 : vector<1x17x24x32xf32>
    %c1_99 = arith.constant 1 : index
    %c0_100 = arith.constant 0 : index
    %43 = vector.load %arg2[%c1_99, %c0_100] : memref<4x32xf32, #tpu.memory_space<vmem>>, vector<1x32xf32>
    %44 = vector.shape_cast %43 : vector<1x32xf32> to vector<1x1x1x32xf32>
    %45 = vector.broadcast %35 : vector<1x17x24x1xf32> to vector<1x17x24x32xf32>
    %46 = vector.broadcast %44 : vector<1x1x1x32xf32> to vector<1x17x24x32xf32>
    %47 = arith.mulf %45, %46 : vector<1x17x24x32xf32>
    %48 = arith.addf %42, %47 : vector<1x17x24x32xf32>
    %c2 = arith.constant 2 : index
    %c0_101 = arith.constant 0 : index
    %49 = vector.load %arg2[%c2, %c0_101] : memref<4x32xf32, #tpu.memory_space<vmem>>, vector<1x32xf32>
    %50 = vector.shape_cast %49 : vector<1x32xf32> to vector<1x1x1x32xf32>
    %51 = vector.broadcast %36 : vector<1x17x24x1xf32> to vector<1x17x24x32xf32>
    %52 = vector.broadcast %50 : vector<1x1x1x32xf32> to vector<1x17x24x32xf32>
    %53 = arith.mulf %51, %52 : vector<1x17x24x32xf32>
    %54 = arith.addf %48, %53 : vector<1x17x24x32xf32>
    %c3_102 = arith.constant 3 : index
    %c0_103 = arith.constant 0 : index
    %55 = vector.load %arg2[%c3_102, %c0_103] : memref<4x32xf32, #tpu.memory_space<vmem>>, vector<1x32xf32>
    %56 = vector.shape_cast %55 : vector<1x32xf32> to vector<1x1x1x32xf32>
    %57 = vector.broadcast %37 : vector<1x17x24x1xf32> to vector<1x17x24x32xf32>
    %58 = vector.broadcast %56 : vector<1x1x1x32xf32> to vector<1x17x24x32xf32>
    %59 = arith.mulf %57, %58 : vector<1x17x24x32xf32>
    %60 = arith.addf %54, %59 : vector<1x17x24x32xf32>
    %c0_104 = arith.constant 0 : index
    %c0_105 = arith.constant 0 : index
    %61 = vector.load %arg3[%c0_104, %c0_105] : memref<1x32xf32, #tpu.memory_space<vmem>>, vector<1x32xf32>
    %62 = vector.shape_cast %61 : vector<1x32xf32> to vector<1x1x1x32xf32>
    %63 = vector.broadcast %62 : vector<1x1x1x32xf32> to vector<1x17x24x32xf32>
    %64 = arith.addf %60, %63 : vector<1x17x24x32xf32>
    %cst_106 = arith.constant 0.000000e+00 : f32
    %65 = vector.broadcast %cst_106 : f32 to vector<1x17x24x32xf32>
    %66 = arith.maximumf %64, %65 : vector<1x17x24x32xf32>
    %67 = vector.extract_strided_slice %66 {offsets = [0, 0, 0, 0], sizes = [1, 16, 24, 32], strides = [1, 1, 1, 1]} : vector<1x17x24x32xf32> to vector<1x16x24x32xf32>
    %68 = vector.shape_cast %67 : vector<1x16x24x32xf32> to vector<8x2x24x32xf32>
    %69 = vector.extract_strided_slice %68 {offsets = [0, 0, 0, 0], sizes = [8, 1, 24, 32], strides = [1, 1, 1, 1]} : vector<8x2x24x32xf32> to vector<8x1x24x32xf32>
    %70 = vector.shape_cast %69 : vector<8x1x24x32xf32> to vector<8x24x32xf32>
    %71 = vector.extract_strided_slice %68 {offsets = [0, 1, 0, 0], sizes = [8, 1, 24, 32], strides = [1, 1, 1, 1]} : vector<8x2x24x32xf32> to vector<8x1x24x32xf32>
    %72 = vector.shape_cast %71 : vector<8x1x24x32xf32> to vector<8x24x32xf32>
    %73 = arith.maximumf %70, %72 : vector<8x24x32xf32>
    %74 = vector.extract_strided_slice %73 {offsets = [0, 0, 0], sizes = [8, 1, 32], strides = [1, 1, 1]} : vector<8x24x32xf32> to vector<8x1x32xf32>
    %75 = vector.extract_strided_slice %73 {offsets = [0, 1, 0], sizes = [8, 1, 32], strides = [1, 1, 1]} : vector<8x24x32xf32> to vector<8x1x32xf32>
    %76 = arith.maximumf %74, %75 : vector<8x1x32xf32>
    %77 = vector.extract_strided_slice %73 {offsets = [0, 2, 0], sizes = [8, 1, 32], strides = [1, 1, 1]} : vector<8x24x32xf32> to vector<8x1x32xf32>
    %78 = vector.extract_strided_slice %73 {offsets = [0, 3, 0], sizes = [8, 1, 32], strides = [1, 1, 1]} : vector<8x24x32xf32> to vector<8x1x32xf32>
    %79 = arith.maximumf %77, %78 : vector<8x1x32xf32>
    %80 = vector.extract_strided_slice %73 {offsets = [0, 4, 0], sizes = [8, 1, 32], strides = [1, 1, 1]} : vector<8x24x32xf32> to vector<8x1x32xf32>
    %81 = vector.extract_strided_slice %73 {offsets = [0, 5, 0], sizes = [8, 1, 32], strides = [1, 1, 1]} : vector<8x24x32xf32> to vector<8x1x32xf32>
    %82 = arith.maximumf %80, %81 : vector<8x1x32xf32>
    %83 = vector.extract_strided_slice %73 {offsets = [0, 6, 0], sizes = [8, 1, 32], strides = [1, 1, 1]} : vector<8x24x32xf32> to vector<8x1x32xf32>
    %84 = vector.extract_strided_slice %73 {offsets = [0, 7, 0], sizes = [8, 1, 32], strides = [1, 1, 1]} : vector<8x24x32xf32> to vector<8x1x32xf32>
    %85 = arith.maximumf %83, %84 : vector<8x1x32xf32>
    %86 = vector.extract_strided_slice %73 {offsets = [0, 8, 0], sizes = [8, 1, 32], strides = [1, 1, 1]} : vector<8x24x32xf32> to vector<8x1x32xf32>
    %87 = vector.extract_strided_slice %73 {offsets = [0, 9, 0], sizes = [8, 1, 32], strides = [1, 1, 1]} : vector<8x24x32xf32> to vector<8x1x32xf32>
    %88 = arith.maximumf %86, %87 : vector<8x1x32xf32>
    %89 = vector.extract_strided_slice %73 {offsets = [0, 10, 0], sizes = [8, 1, 32], strides = [1, 1, 1]} : vector<8x24x32xf32> to vector<8x1x32xf32>
    %90 = vector.extract_strided_slice %73 {offsets = [0, 11, 0], sizes = [8, 1, 32], strides = [1, 1, 1]} : vector<8x24x32xf32> to vector<8x1x32xf32>
    %91 = arith.maximumf %89, %90 : vector<8x1x32xf32>
    %92 = vector.extract_strided_slice %73 {offsets = [0, 12, 0], sizes = [8, 1, 32], strides = [1, 1, 1]} : vector<8x24x32xf32> to vector<8x1x32xf32>
    %93 = vector.extract_strided_slice %73 {offsets = [0, 13, 0], sizes = [8, 1, 32], strides = [1, 1, 1]} : vector<8x24x32xf32> to vector<8x1x32xf32>
    %94 = arith.maximumf %92, %93 : vector<8x1x32xf32>
    %95 = vector.extract_strided_slice %73 {offsets = [0, 14, 0], sizes = [8, 1, 32], strides = [1, 1, 1]} : vector<8x24x32xf32> to vector<8x1x32xf32>
    %96 = vector.extract_strided_slice %73 {offsets = [0, 15, 0], sizes = [8, 1, 32], strides = [1, 1, 1]} : vector<8x24x32xf32> to vector<8x1x32xf32>
    %97 = arith.maximumf %95, %96 : vector<8x1x32xf32>
    %98 = tpu.concatenate %76, %79, %82, %85, %88, %91, %94, %97 in 1 : vector<8x1x32xf32>, vector<8x1x32xf32>, vector<8x1x32xf32>, vector<8x1x32xf32>, vector<8x1x32xf32>, vector<8x1x32xf32>, vector<8x1x32xf32>, vector<8x1x32xf32> -> vector<8x8x32xf32>
    %99 = vector.shape_cast %98 : vector<8x8x32xf32> to vector<1x8x8x32xf32>
    %c0_107 = arith.constant 0 : index
    %c1_108 = arith.constant 1 : index
    %c1_109 = arith.constant 1 : index
    %c0_110 = arith.constant 0 : index
    %100 = vector.load %arg16[%c0_107, %c1_108, %c1_109, %c0_110] : memref<1x10x17x32xf32, #tpu.memory_space<vmem>>, vector<1x8x8x32xf32>
    tpu.vector_store %arg16[%c0_107, %c1_108, %c1_109, %c0_110], %99 {strides = array<i32>} : memref<1x10x17x32xf32, #tpu.memory_space<vmem>>, vector<1x8x8x32xf32>,
    %c0_111 = arith.constant 0 : index
    %c0_112 = arith.constant 0 : index
    %c0_113 = arith.constant 0 : index
    %c0_114 = arith.constant 0 : index
    %101 = vector.load %arg16[%c0_111, %c0_112, %c0_113, %c0_114] : memref<1x10x17x32xf32, #tpu.memory_space<vmem>>, vector<1x9x16x32xf32>
    %c0_115 = arith.constant 0 : index
    %c0_116 = arith.constant 0 : index
    %c1_117 = arith.constant 1 : index
    %c0_118 = arith.constant 0 : index
    %102 = vector.load %arg16[%c0_115, %c0_116, %c1_117, %c0_118] : memref<1x10x17x32xf32, #tpu.memory_space<vmem>>, vector<1x9x16x32xf32>
    %c0_119 = arith.constant 0 : index
    %c1_120 = arith.constant 1 : index
    %c0_121 = arith.constant 0 : index
    %c0_122 = arith.constant 0 : index
    %103 = vector.load %arg16[%c0_119, %c1_120, %c0_121, %c0_122] : memref<1x10x17x32xf32, #tpu.memory_space<vmem>>, vector<1x9x16x32xf32>
    %c0_123 = arith.constant 0 : index
    %c1_124 = arith.constant 1 : index
    %c1_125 = arith.constant 1 : index
    %c0_126 = arith.constant 0 : index
    %104 = vector.load %arg16[%c0_123, %c1_124, %c1_125, %c0_126] : memref<1x10x17x32xf32, #tpu.memory_space<vmem>>, vector<1x9x16x32xf32>
    %105 = tpu.concatenate %101, %102, %103, %104 in 3 : vector<1x9x16x32xf32>, vector<1x9x16x32xf32>, vector<1x9x16x32xf32>, vector<1x9x16x32xf32> -> vector<1x9x16x128xf32>
    %106 = vector.shape_cast %105 : vector<1x9x16x128xf32> to vector<144x128xf32>
    %c0_127 = arith.constant 0 : index
    %c0_128 = arith.constant 0 : index
    %107 = vector.load %arg4[%c0_127, %c0_128] : memref<128x32xf32, #tpu.memory_space<vmem>>, vector<128x32xf32>
    %cst_129 = arith.constant dense<0.000000e+00> : vector<144x32xf32>
    %108 = tpu.matmul %106, %107, %cst_129 {dimension_numbers = #tpu.dot_dimension_numbers<[1], [0], [0], [1], [0, 0, 1, 1], [], []>} : vector<144x128xf32>, vector<128x32xf32>, vector<144x32xf32> -> vector<144x32xf32>
    %c0_130 = arith.constant 0 : index
    %c0_131 = arith.constant 0 : index
    %109 = vector.load %arg5[%c0_130, %c0_131] : memref<1x32xf32, #tpu.memory_space<vmem>>, vector<1x32xf32>
    %110 = vector.broadcast %109 : vector<1x32xf32> to vector<144x32xf32>
    %111 = arith.addf %108, %110 : vector<144x32xf32>
    %cst_132 = arith.constant 0.000000e+00 : f32
    %112 = vector.broadcast %cst_132 : f32 to vector<144x32xf32>
    %113 = arith.maximumf %111, %112 : vector<144x32xf32>
    %114 = vector.shape_cast %113 : vector<144x32xf32> to vector<1x9x16x32xf32>
    %115 = vector.extract_strided_slice %114 {offsets = [0, 0, 0, 0], sizes = [1, 8, 16, 32], strides = [1, 1, 1, 1]} : vector<1x9x16x32xf32> to vector<1x8x16x32xf32>
    %116 = vector.shape_cast %115 : vector<1x8x16x32xf32> to vector<4x2x16x32xf32>
    %117 = vector.extract_strided_slice %116 {offsets = [0, 0, 0, 0], sizes = [4, 1, 16, 32], strides = [1, 1, 1, 1]} : vector<4x2x16x32xf32> to vector<4x1x16x32xf32>
    %118 = vector.shape_cast %117 : vector<4x1x16x32xf32> to vector<4x16x32xf32>
    %119 = vector.extract_strided_slice %116 {offsets = [0, 1, 0, 0], sizes = [4, 1, 16, 32], strides = [1, 1, 1, 1]} : vector<4x2x16x32xf32> to vector<4x1x16x32xf32>
    %120 = vector.shape_cast %119 : vector<4x1x16x32xf32> to vector<4x16x32xf32>
    %121 = arith.maximumf %118, %120 : vector<4x16x32xf32>
    %122 = vector.extract_strided_slice %121 {offsets = [0, 0, 0], sizes = [4, 1, 32], strides = [1, 1, 1]} : vector<4x16x32xf32> to vector<4x1x32xf32>
    %123 = vector.extract_strided_slice %121 {offsets = [0, 1, 0], sizes = [4, 1, 32], strides = [1, 1, 1]} : vector<4x16x32xf32> to vector<4x1x32xf32>
    %124 = arith.maximumf %122, %123 : vector<4x1x32xf32>
    %125 = vector.extract_strided_slice %121 {offsets = [0, 2, 0], sizes = [4, 1, 32], strides = [1, 1, 1]} : vector<4x16x32xf32> to vector<4x1x32xf32>
    %126 = vector.extract_strided_slice %121 {offsets = [0, 3, 0], sizes = [4, 1, 32], strides = [1, 1, 1]} : vector<4x16x32xf32> to vector<4x1x32xf32>
    %127 = arith.maximumf %125, %126 : vector<4x1x32xf32>
    %128 = vector.extract_strided_slice %121 {offsets = [0, 4, 0], sizes = [4, 1, 32], strides = [1, 1, 1]} : vector<4x16x32xf32> to vector<4x1x32xf32>
    %129 = vector.extract_strided_slice %121 {offsets = [0, 5, 0], sizes = [4, 1, 32], strides = [1, 1, 1]} : vector<4x16x32xf32> to vector<4x1x32xf32>
    %130 = arith.maximumf %128, %129 : vector<4x1x32xf32>
    %131 = vector.extract_strided_slice %121 {offsets = [0, 6, 0], sizes = [4, 1, 32], strides = [1, 1, 1]} : vector<4x16x32xf32> to vector<4x1x32xf32>
    %132 = vector.extract_strided_slice %121 {offsets = [0, 7, 0], sizes = [4, 1, 32], strides = [1, 1, 1]} : vector<4x16x32xf32> to vector<4x1x32xf32>
    %133 = arith.maximumf %131, %132 : vector<4x1x32xf32>
    %134 = tpu.concatenate %124, %127, %130, %133 in 1 : vector<4x1x32xf32>, vector<4x1x32xf32>, vector<4x1x32xf32>, vector<4x1x32xf32> -> vector<4x4x32xf32>
    %135 = vector.shape_cast %134 : vector<4x4x32xf32> to vector<1x4x4x32xf32>
    %c0_133 = arith.constant 0 : index
    %c1_134 = arith.constant 1 : index
    %c1_135 = arith.constant 1 : index
    %c0_136 = arith.constant 0 : index
    %136 = vector.load %arg17[%c0_133, %c1_134, %c1_135, %c0_136] : memref<1x6x9x32xf32, #tpu.memory_space<vmem>>, vector<1x4x4x32xf32>
    tpu.vector_store %arg17[%c0_133, %c1_134, %c1_135, %c0_136], %135 {strides = array<i32>} : memref<1x6x9x32xf32, #tpu.memory_space<vmem>>, vector<1x4x4x32xf32>,
    %c0_137 = arith.constant 0 : index
    %c0_138 = arith.constant 0 : index
    %c0_139 = arith.constant 0 : index
    %c0_140 = arith.constant 0 : index
    %137 = vector.load %arg17[%c0_137, %c0_138, %c0_139, %c0_140] : memref<1x6x9x32xf32, #tpu.memory_space<vmem>>, vector<1x5x8x32xf32>
    %c0_141 = arith.constant 0 : index
    %c0_142 = arith.constant 0 : index
    %c1_143 = arith.constant 1 : index
    %c0_144 = arith.constant 0 : index
    %138 = vector.load %arg17[%c0_141, %c0_142, %c1_143, %c0_144] : memref<1x6x9x32xf32, #tpu.memory_space<vmem>>, vector<1x5x8x32xf32>
    %c0_145 = arith.constant 0 : index
    %c1_146 = arith.constant 1 : index
    %c0_147 = arith.constant 0 : index
    %c0_148 = arith.constant 0 : index
    %139 = vector.load %arg17[%c0_145, %c1_146, %c0_147, %c0_148] : memref<1x6x9x32xf32, #tpu.memory_space<vmem>>, vector<1x5x8x32xf32>
    %c0_149 = arith.constant 0 : index
    %c1_150 = arith.constant 1 : index
    %c1_151 = arith.constant 1 : index
    %c0_152 = arith.constant 0 : index
    %140 = vector.load %arg17[%c0_149, %c1_150, %c1_151, %c0_152] : memref<1x6x9x32xf32, #tpu.memory_space<vmem>>, vector<1x5x8x32xf32>
    %141 = tpu.concatenate %137, %138, %139, %140 in 3 : vector<1x5x8x32xf32>, vector<1x5x8x32xf32>, vector<1x5x8x32xf32>, vector<1x5x8x32xf32> -> vector<1x5x8x128xf32>
    %142 = vector.shape_cast %141 : vector<1x5x8x128xf32> to vector<40x128xf32>
    %c0_153 = arith.constant 0 : index
    %c0_154 = arith.constant 0 : index
    %143 = vector.load %arg6[%c0_153, %c0_154] : memref<128x64xf32, #tpu.memory_space<vmem>>, vector<128x64xf32>
    %cst_155 = arith.constant dense<0.000000e+00> : vector<40x64xf32>
    %144 = tpu.matmul %142, %143, %cst_155 {dimension_numbers = #tpu.dot_dimension_numbers<[1], [0], [0], [1], [0, 0, 1, 1], [], []>} : vector<40x128xf32>, vector<128x64xf32>, vector<40x64xf32> -> vector<40x64xf32>
    %c0_156 = arith.constant 0 : index
    %c0_157 = arith.constant 0 : index
    %145 = vector.load %arg7[%c0_156, %c0_157] : memref<1x64xf32, #tpu.memory_space<vmem>>, vector<1x64xf32>
    %146 = vector.broadcast %145 : vector<1x64xf32> to vector<40x64xf32>
    %147 = arith.addf %144, %146 : vector<40x64xf32>
    %cst_158 = arith.constant 0.000000e+00 : f32
    %148 = vector.broadcast %cst_158 : f32 to vector<40x64xf32>
    %149 = arith.maximumf %147, %148 : vector<40x64xf32>
    %150 = vector.shape_cast %149 : vector<40x64xf32> to vector<1x5x8x64xf32>
    %151 = vector.extract_strided_slice %150 {offsets = [0, 0, 0, 0], sizes = [1, 4, 8, 64], strides = [1, 1, 1, 1]} : vector<1x5x8x64xf32> to vector<1x4x8x64xf32>
    %152 = vector.shape_cast %151 : vector<1x4x8x64xf32> to vector<2x2x8x64xf32>
    %153 = vector.extract_strided_slice %152 {offsets = [0, 0, 0, 0], sizes = [2, 1, 8, 64], strides = [1, 1, 1, 1]} : vector<2x2x8x64xf32> to vector<2x1x8x64xf32>
    %154 = vector.shape_cast %153 : vector<2x1x8x64xf32> to vector<2x8x64xf32>
    %155 = vector.extract_strided_slice %152 {offsets = [0, 1, 0, 0], sizes = [2, 1, 8, 64], strides = [1, 1, 1, 1]} : vector<2x2x8x64xf32> to vector<2x1x8x64xf32>
    %156 = vector.shape_cast %155 : vector<2x1x8x64xf32> to vector<2x8x64xf32>
    %157 = arith.maximumf %154, %156 : vector<2x8x64xf32>
    %158 = vector.extract_strided_slice %157 {offsets = [0, 0, 0], sizes = [2, 1, 64], strides = [1, 1, 1]} : vector<2x8x64xf32> to vector<2x1x64xf32>
    %159 = vector.extract_strided_slice %157 {offsets = [0, 1, 0], sizes = [2, 1, 64], strides = [1, 1, 1]} : vector<2x8x64xf32> to vector<2x1x64xf32>
    %160 = arith.maximumf %158, %159 : vector<2x1x64xf32>
    %161 = vector.extract_strided_slice %157 {offsets = [0, 2, 0], sizes = [2, 1, 64], strides = [1, 1, 1]} : vector<2x8x64xf32> to vector<2x1x64xf32>
    %162 = vector.extract_strided_slice %157 {offsets = [0, 3, 0], sizes = [2, 1, 64], strides = [1, 1, 1]} : vector<2x8x64xf32> to vector<2x1x64xf32>
    %163 = arith.maximumf %161, %162 : vector<2x1x64xf32>
    %164 = tpu.concatenate %160, %163 in 1 : vector<2x1x64xf32>, vector<2x1x64xf32> -> vector<2x2x64xf32>
    %165 = vector.shape_cast %164 : vector<2x2x64xf32> to vector<1x2x2x64xf32>
    %c0_159 = arith.constant 0 : index
    %c1_160 = arith.constant 1 : index
    %c1_161 = arith.constant 1 : index
    %c0_162 = arith.constant 0 : index
    %166 = vector.load %arg18[%c0_159, %c1_160, %c1_161, %c0_162] : memref<1x4x9x64xf32, #tpu.memory_space<vmem>>, vector<1x2x2x64xf32>
    tpu.vector_store %arg18[%c0_159, %c1_160, %c1_161, %c0_162], %165 {strides = array<i32>} : memref<1x4x9x64xf32, #tpu.memory_space<vmem>>, vector<1x2x2x64xf32>,
    %c0_163 = arith.constant 0 : index
    %c0_164 = arith.constant 0 : index
    %c0_165 = arith.constant 0 : index
    %c0_166 = arith.constant 0 : index
    %167 = vector.load %arg18[%c0_163, %c0_164, %c0_165, %c0_166] : memref<1x4x9x64xf32, #tpu.memory_space<vmem>>, vector<1x3x8x64xf32>
    %c0_167 = arith.constant 0 : index
    %c0_168 = arith.constant 0 : index
    %c1_169 = arith.constant 1 : index
    %c0_170 = arith.constant 0 : index
    %168 = vector.load %arg18[%c0_167, %c0_168, %c1_169, %c0_170] : memref<1x4x9x64xf32, #tpu.memory_space<vmem>>, vector<1x3x8x64xf32>
    %c0_171 = arith.constant 0 : index
    %c1_172 = arith.constant 1 : index
    %c0_173 = arith.constant 0 : index
    %c0_174 = arith.constant 0 : index
    %169 = vector.load %arg18[%c0_171, %c1_172, %c0_173, %c0_174] : memref<1x4x9x64xf32, #tpu.memory_space<vmem>>, vector<1x3x8x64xf32>
    %c0_175 = arith.constant 0 : index
    %c1_176 = arith.constant 1 : index
    %c1_177 = arith.constant 1 : index
    %c0_178 = arith.constant 0 : index
    %170 = vector.load %arg18[%c0_175, %c1_176, %c1_177, %c0_178] : memref<1x4x9x64xf32, #tpu.memory_space<vmem>>, vector<1x3x8x64xf32>
    %171 = tpu.concatenate %167, %168, %169, %170 in 3 : vector<1x3x8x64xf32>, vector<1x3x8x64xf32>, vector<1x3x8x64xf32>, vector<1x3x8x64xf32> -> vector<1x3x8x256xf32>
    %172 = vector.shape_cast %171 : vector<1x3x8x256xf32> to vector<24x256xf32>
    %c0_179 = arith.constant 0 : index
    %c0_180 = arith.constant 0 : index
    %173 = vector.load %arg8[%c0_179, %c0_180] : memref<256x64xf32, #tpu.memory_space<vmem>>, vector<256x64xf32>
    %cst_181 = arith.constant dense<0.000000e+00> : vector<24x64xf32>
    %174 = tpu.matmul %172, %173, %cst_181 {dimension_numbers = #tpu.dot_dimension_numbers<[1], [0], [0], [1], [0, 0, 1, 1], [], []>} : vector<24x256xf32>, vector<256x64xf32>, vector<24x64xf32> -> vector<24x64xf32>
    %c0_182 = arith.constant 0 : index
    %c0_183 = arith.constant 0 : index
    %175 = vector.load %arg9[%c0_182, %c0_183] : memref<1x64xf32, #tpu.memory_space<vmem>>, vector<1x64xf32>
    %176 = vector.broadcast %175 : vector<1x64xf32> to vector<24x64xf32>
    %177 = arith.addf %174, %176 : vector<24x64xf32>
    %cst_184 = arith.constant 0.000000e+00 : f32
    %178 = vector.broadcast %cst_184 : f32 to vector<24x64xf32>
    %179 = arith.maximumf %177, %178 : vector<24x64xf32>
    %180 = vector.shape_cast %179 : vector<24x64xf32> to vector<1x3x8x64xf32>
    %181 = vector.extract_strided_slice %180 {offsets = [0, 0, 0, 0], sizes = [1, 2, 8, 64], strides = [1, 1, 1, 1]} : vector<1x3x8x64xf32> to vector<1x2x8x64xf32>
    %182 = vector.extract_strided_slice %181 {offsets = [0, 0, 0, 0], sizes = [1, 1, 8, 64], strides = [1, 1, 1, 1]} : vector<1x2x8x64xf32> to vector<1x1x8x64xf32>
    %183 = vector.shape_cast %182 : vector<1x1x8x64xf32> to vector<1x8x64xf32>
    %184 = vector.extract_strided_slice %181 {offsets = [0, 1, 0, 0], sizes = [1, 1, 8, 64], strides = [1, 1, 1, 1]} : vector<1x2x8x64xf32> to vector<1x1x8x64xf32>
    %185 = vector.shape_cast %184 : vector<1x1x8x64xf32> to vector<1x8x64xf32>
    %186 = arith.maximumf %183, %185 : vector<1x8x64xf32>
    %187 = vector.extract_strided_slice %186 {offsets = [0, 0, 0], sizes = [1, 1, 64], strides = [1, 1, 1]} : vector<1x8x64xf32> to vector<1x1x64xf32>
    %188 = vector.extract_strided_slice %186 {offsets = [0, 1, 0], sizes = [1, 1, 64], strides = [1, 1, 1]} : vector<1x8x64xf32> to vector<1x1x64xf32>
    %189 = arith.maximumf %187, %188 : vector<1x1x64xf32>
    %190 = vector.shape_cast %189 : vector<1x1x64xf32> to vector<1x1x1x64xf32>
    %191 = vector.shape_cast %190 : vector<1x1x1x64xf32> to vector<1x64xf32>
    %c0_185 = arith.constant 0 : index
    %c0_186 = arith.constant 0 : index
    %192 = vector.load %arg10[%c0_185, %c0_186] : memref<64x50xf32, #tpu.memory_space<vmem>>, vector<64x50xf32>
    %cst_187 = arith.constant dense<0.000000e+00> : vector<1x50xf32>
    %193 = tpu.matmul %191, %192, %cst_187 {dimension_numbers = #tpu.dot_dimension_numbers<[1], [0], [0], [1], [0, 0, 1, 1], [], []>} : vector<1x64xf32>, vector<64x50xf32>, vector<1x50xf32> -> vector<1x50xf32>
    %c0_188 = arith.constant 0 : index
    %c0_189 = arith.constant 0 : index
    %194 = vector.load %arg11[%c0_188, %c0_189] : memref<1x50xf32, #tpu.memory_space<vmem>>, vector<1x50xf32>
    %195 = arith.addf %193, %194 : vector<1x50xf32>
    %cst_190 = arith.constant 0.000000e+00 : f32
    %196 = vector.broadcast %cst_190 : f32 to vector<1x50xf32>
    %197 = arith.maximumf %195, %196 : vector<1x50xf32>
    %c0_191 = arith.constant 0 : index
    %c0_192 = arith.constant 0 : index
    %198 = vector.load %arg12[%c0_191, %c0_192] : memref<50x8xf32, #tpu.memory_space<vmem>>, vector<50x8xf32>
    %cst_193 = arith.constant dense<0.000000e+00> : vector<1x8xf32>
    %199 = tpu.matmul %197, %198, %cst_193 {dimension_numbers = #tpu.dot_dimension_numbers<[1], [0], [0], [1], [0, 0, 1, 1], [], []>} : vector<1x50xf32>, vector<50x8xf32>, vector<1x8xf32> -> vector<1x8xf32>
    %c0_194 = arith.constant 0 : index
    %c0_195 = arith.constant 0 : index
    %200 = vector.load %arg13[%c0_194, %c0_195] : memref<1x8xf32, #tpu.memory_space<vmem>>, vector<1x8xf32>
    %201 = arith.addf %199, %200 : vector<1x8xf32>
    %202 = vector.shape_cast %201 : vector<1x8xf32> to vector<1x1x8xf32>
    %c0_196 = arith.constant 0 : index
    %c0_197 = arith.constant 0 : index
    %c0_198 = arith.constant 0 : index
    %203 = vector.load %arg14[%c0_196, %c0_197, %c0_198] : memref<1x1x8xf32, #tpu.memory_space<vmem>>, vector<1x1x8xf32>
    tpu.vector_store %arg14[%c0_196, %c0_197, %c0_198], %202 {strides = array<i32>} : memref<1x1x8xf32, #tpu.memory_space<vmem>>, vector<1x1x8xf32>,
    return
  }
  func.func @transform_0(%arg0: i32) -> (i32, i32, i32, i32) {
    %c0_i32 = arith.constant 0 : i32
    %c0_i32_0 = arith.constant 0 : i32
    %c0_i32_1 = arith.constant 0 : i32
    %c0_i32_2 = arith.constant 0 : i32
    return %arg0, %c0_i32, %c0_i32_0, %c0_i32_1 : i32, i32, i32, i32
  }
  func.func @transform_1(%arg0: i32) -> (i32, i32) {
    %c0_i32 = arith.constant 0 : i32
    %c0_i32_0 = arith.constant 0 : i32
    %c0_i32_1 = arith.constant 0 : i32
    return %c0_i32, %c0_i32_0 : i32, i32
  }
  func.func @transform_2(%arg0: i32) -> (i32, i32) {
    %c0_i32 = arith.constant 0 : i32
    %c0_i32_0 = arith.constant 0 : i32
    %c0_i32_1 = arith.constant 0 : i32
    return %c0_i32, %c0_i32_0 : i32, i32
  }
  func.func @transform_3(%arg0: i32) -> (i32, i32) {
    %c0_i32 = arith.constant 0 : i32
    %c0_i32_0 = arith.constant 0 : i32
    %c0_i32_1 = arith.constant 0 : i32
    return %c0_i32, %c0_i32_0 : i32, i32
  }
  func.func @transform_4(%arg0: i32) -> (i32, i32) {
    %c0_i32 = arith.constant 0 : i32
    %c0_i32_0 = arith.constant 0 : i32
    %c0_i32_1 = arith.constant 0 : i32
    return %c0_i32, %c0_i32_0 : i32, i32
  }
  func.func @transform_5(%arg0: i32) -> (i32, i32) {
    %c0_i32 = arith.constant 0 : i32
    %c0_i32_0 = arith.constant 0 : i32
    %c0_i32_1 = arith.constant 0 : i32
    return %c0_i32, %c0_i32_0 : i32, i32
  }
  func.func @transform_6(%arg0: i32) -> (i32, i32) {
    %c0_i32 = arith.constant 0 : i32
    %c0_i32_0 = arith.constant 0 : i32
    %c0_i32_1 = arith.constant 0 : i32
    return %c0_i32, %c0_i32_0 : i32, i32
  }
  func.func @transform_7(%arg0: i32) -> (i32, i32) {
    %c0_i32 = arith.constant 0 : i32
    %c0_i32_0 = arith.constant 0 : i32
    %c0_i32_1 = arith.constant 0 : i32
    return %c0_i32, %c0_i32_0 : i32, i32
  }
  func.func @transform_8(%arg0: i32) -> (i32, i32) {
    %c0_i32 = arith.constant 0 : i32
    %c0_i32_0 = arith.constant 0 : i32
    %c0_i32_1 = arith.constant 0 : i32
    return %c0_i32, %c0_i32_0 : i32, i32
  }
  func.func @transform_9(%arg0: i32) -> (i32, i32) {
    %c0_i32 = arith.constant 0 : i32
    %c0_i32_0 = arith.constant 0 : i32
    %c0_i32_1 = arith.constant 0 : i32
    return %c0_i32, %c0_i32_0 : i32, i32
  }
  func.func @transform_10(%arg0: i32) -> (i32, i32) {
    %c0_i32 = arith.constant 0 : i32
    %c0_i32_0 = arith.constant 0 : i32
    %c0_i32_1 = arith.constant 0 : i32
    return %c0_i32, %c0_i32_0 : i32, i32
  }
  func.func @transform_11(%arg0: i32) -> (i32, i32) {
    %c0_i32 = arith.constant 0 : i32
    %c0_i32_0 = arith.constant 0 : i32
    %c0_i32_1 = arith.constant 0 : i32
    return %c0_i32, %c0_i32_0 : i32, i32
  }
  func.func @transform_12(%arg0: i32) -> (i32, i32) {
    %c0_i32 = arith.constant 0 : i32
    %c0_i32_0 = arith.constant 0 : i32
    %c0_i32_1 = arith.constant 0 : i32
    return %c0_i32, %c0_i32_0 : i32, i32
  }
  func.func @transform_13(%arg0: i32) -> (i32, i32, i32) {
    %c0_i32 = arith.constant 0 : i32
    %c0_i32_0 = arith.constant 0 : i32
    %c0_i32_1 = arith.constant 0 : i32
    return %arg0, %c0_i32, %c0_i32_0 : i32, i32, i32
  }
}

</mosaic_0001>

<bundles_post_ra>
// kernel: cnn42_forward.1
= control target key start
LH: loop header
LB: loop body
LE: loop exit
PB: predicated region body
PF: predicated region fallthrough
CT: control target
= control target key end

     0   :  { %s4637_s0 = inlined_call_operand.vmem [shape: f32[2,16,16,1], index: 0, kind: input, shape index: {}]   ;;  %s4638_s1 = inlined_call_operand.vmem [shape: f32[4,32], index: 1, kind: input, shape index: {}]   ;;  %s4639_s2 = inlined_call_operand.vmem [shape: f32[1,32], index: 2, kind: input, shape index: {}]   ;;  %s4640_s3 = inlined_call_operand.vmem [shape: f32[128,32], index: 3, kind: input, shape index: {}]   ;;  %s4641_s4 = inlined_call_operand.vmem [shape: f32[1,32], index: 4, kind: input, shape index: {}]   ;;  %s4642_s5 = inlined_call_operand.vmem [shape: f32[128,64], index: 5, kind: input, shape index: {}]   ;;  %s4643_s6 = inlined_call_operand.vmem [shape: f32[1,64], index: 6, kind: input, shape index: {}]   ;;  %s4644_s7 = inlined_call_operand.vmem [shape: f32[256,64], index: 7, kind: input, shape index: {}]   ;;  %s4645_s8 = inlined_call_operand.vmem [shape: f32[1,64], index: 8, kind: input, shape index: {}]   ;;  %s4646_s9 = inlined_call_operand.vmem [shape: f32[64,50], index: 9, kind: input, shape index: {}]   ;;  %s4647_s10 = inlined_call_operand.vmem [shape: f32[1,50], index: 10, kind: input, shape index: {}]   ;;  %s4648_s11 = inlined_call_operand.vmem [shape: f32[50,8], index: 11, kind: input, shape index: {}]   ;;  %s4649_s12 = inlined_call_operand.vmem [shape: f32[1,8], index: 12, kind: input, shape index: {}]   ;;  %s4650_s13 = inlined_call_operand.hbm [shape: f32[2,1,8], index: 13, kind: output, shape index: {}]  }
   0x1   :  { %4657 = sst [smem:[#allocation9_spill]] %s4637_s0 }
   0x2   :  { %4658 = sst [smem:[#allocation10_spill]] %s4638_s1 }
   0x3   :  { %4659 = sst [smem:[#allocation11_spill]] %s4639_s2 }
   0x4   :  { %4660 = sst [smem:[#allocation12_spill]] %s4640_s3 }
   0x5   :  { %18 = vsyncpa [#allocation7], 0 }
   0x6   :  { %20 = vsyncpa [#allocation7 + $0x1], 0  ;;  %s3261_s25 = smov 0   ;;  %s3263_s26 = smov 0  }
   0x7   :  { %s3265_s27 = smov 0   ;;  %s3267_s28 = smov 0  }
   0x8 LB: > { %s3282_s29 = sadd.s32 4294967295, %s3184_s28   ;;  %s2903_s30 = sadd.s32 4294967294, %s3184_s28   ;;  %s3184_s28 = sphi %s3267_s28, %s4673_s28   ;;  %s3180_s27 = sphi %s3265_s27, %s4672_s27   ;;  %s3176_s26 = sphi %s3263_s26, %s4671_s26   ;;  %s3172_s25 = sphi %s3261_s25, %s4670_s25  }
   0x9   : > { %s3286_s14 = sadd.s32 1, %s3184_s28   ;;  %s311_s15 = sadd.s32 1, %s3180_s27 }
   0xa   : > { %s308_s16 = ssub.s32 %s3184_s28, %s3286_s14  ;;  %p321_p0 = scmp.ne.s32.totalorder %s3180_s27, %s3176_s26 }
   0xb   : > { %p309_p1 = scmp.eq.s32.totalorder %s308_s16, 0  ;;  %p322_p2 = scmp.eq.s32.totalorder %s3282_s29, 1 }
   0xc   : > { %p327_p3 = scmp.ne.s32.totalorder %s3176_s26, %s3172_s25  ;;  %p328_p4 = scmp.eq.s32.totalorder %s2903_s30, 1 }
   0xd   : > { %s3297_s17 = scalar_select %p309_p1, %s3180_s27, %s311_s15  }
   0xe   : > { %p3299_p5 = por %p322_p2, %p321_p0  ;;  %p3303_p6 = por %p328_p4, %p327_p3 }
   0xf   : > { %p2906_p7 = scmp.ge.s32.totalorder %s3184_s28, 1  ;;  %p390_p8 = scmp.lt.s32.totalorder %s3184_s28, 3 }
  0x11   : > { %p391_p9 = pnand %p2906_p7, %p390_p8 }
  0x12   : > { %p433_p10 = scmp.lt.s32.totalorder (!%p391_p9), %s3282_s29, 1  ;;  %s4663_s0 = sld [smem:[#allocation9_spill]] (!%p391_p9) }
  0x13   : > { %394 = sbr.rel (%p391_p9) target bundleno = 1587 (0x633), region = 72  ;;  %s4664_s1 = sld [smem:[#allocation10_spill]] (!%p391_p9) }
  0x14   : > { %s4665_s2 = sld [smem:[#allocation11_spill]] (!%p391_p9)  ;;  %s4653_s15 = smov (!%p391_p9), 64  }
  0x15   : > { %s4655_s22 = smov (!%p391_p9), 32   ;;  %s4651_s23 = smov (!%p391_p9), 96  }
  0x16   : > { %s4666_s3 = sld [smem:[#allocation12_spill]] (!%p391_p9)  ;;  %s4668_s30 = smov (!%p391_p9), 32  }
  0x17   : > { %s4669_s16 = smov (!%p391_p9), 64  }
  0x18   : > { %vm438_vm0 = vcmask 7168   ;;  %v3186_v0 = vmov 0   ;;  %v3187_v1 = vmov 0.0   ;;  %s434_s20 = scalar_select %p433_p10, %s3282_s29, 1  ;;  %vm442_vm1 = vcmask 0  }
  0x19   : > { %2992 = vset.pattern.permute.xlu2 %v3186_v0  ;;  %2991 = vset.pattern.permute.xlu0 %v3186_v0  ;;  %440 = vst.msk [vmem:[#allocation2 + $0x8] sm:$0xff] %vm438_vm0, %v3187_v1  ;;  %v3426_v63 = vld [vmem:[%s4664_s1 + $0x1] ss:$0 sm:$0xff]  ;;  %vm485_vm2 = vcmask 261120   ;;  %vm488_vm3 = vcmask 253952   ;;  %vm1889_vm4 = vcmask 1040384  }
  0x1a   : > { %439 = vst.msk [vmem:[#allocation2] sm:$0xff] %vm438_vm0, %v3187_v1  ;;  %2993 = vset.pattern.permute.xlu1 %v3186_v0  ;;  %s2914_s21 = sshll.u32 %s434_s20, 8  ;;  %v3431_v0 = vld [vmem:[%s4664_s1] ss:$0 sm:$0xff]  ;;  %vm1898_vm5 = vcmask 1041408   ;;  %vm1907_vm6 = vcmask 1042432  }
  0x1b   : > { %441 = vst.msk [vmem:[#allocation2 + $0x10] sm:$0xff] %vm438_vm0, %v3187_v1  ;;  %s3320_s24 = scalar_lea.vmem %s4663_s0, %s2914_s21  ;;  %vm1916_vm7 = vcmask 1043456   ;;  %vm1925_vm8 = vcmask 1044480   ;;  %vm1934_vm9 = vcmask 1045504   ;;  %vm1943_vm10 = vcmask 1046528   ;;  %s431_s0 = sand.u32 1, %s3176_s26  }
  0x1c   : > { %450 = vst.msk [vmem:[#allocation2 + $0x20] sm:$0x1] %vm442_vm1, %v3187_v1  ;;  %v548_v4 = vld [vmem:[%s3320_s24] sm:$0xff]  ;;  %v550_v8 = vld [vmem:[%s3320_s24 + $0x10] sm:$0xff]  ;;  %v549_v9 = vld [vmem:[%s3320_s24 + $0x8] sm:$0xff]  ;;  %vm532_vm11 = vcmask 523264  }
  0x1d   : > { %581 = vst.msk [vmem:[#allocation2 + $0x21] sm:$0xff] %vm438_vm0, %v548_v4  ;;  %v551_v10 = vld [vmem:[%s3320_s24 + $0x18] sm:$0xff]  ;;  %v552_v11 = vld [vmem:[%s3320_s24 + $0x20] sm:$0xff]  ;;  %v553_v16 = vld [vmem:[%s3320_s24 + $0x28] sm:$0xff]  ;;  %vm534_vm12 = vcmask 516096   ;;  %vm543_vm13 = vcmask 521216  }
  0x1e   : > { %449 = vst.msk [vmem:[#allocation2] sm:$0x1] %vm442_vm1, %v3187_v1  ;;  %v554_v17 = vld [vmem:[%s3320_s24 + $0x30] sm:$0xff]  ;;  %v555_v20 = vld [vmem:[%s3320_s24 + $0x38] sm:$0xff]  ;;  %v556_v25 = vld [vmem:[%s3320_s24 + $0x40] sm:$0xff]  ;;  %vm2285_vm14 = vcmask 785408  }
  0x1f   : > { %451 = vst.msk [vmem:[#allocation2 + $0x40] sm:$0x1] %vm442_vm1, %v3187_v1  ;;  %v558_v28 = vld [vmem:[%s3320_s24 + $0x50] sm:$0xff]  ;;  %v560_v29 = vld [vmem:[%s3320_s24 + $0x60] sm:$0xff]  ;;  %v557_v37 = vld [vmem:[%s3320_s24 + $0x48] sm:$0xff]  ;;  %vm525_vm15 = vcmask 257024  }
  0x20   : > { %v614_v2 = vld [vmem:[#allocation2 + $0x8] sm:$0xff]  ;;  %452 = vst.msk [vmem:[#allocation2 + $0x60] sm:$0x1] %vm442_vm1, %v3187_v1  ;;  %v564_v31 = vld [vmem:[%s3320_s24 + $0x80] sm:$0xff]  ;;  %v562_v34 = vld [vmem:[%s3320_s24 + $0x70] sm:$0xff] }
  0x21   : > { %749 = vperm.xlu0 %2991, %v614_v2   ;;  %v645_v3 = vld [vmem:[#allocation2 + $0x1] sm:$0xff]  ;;  %453 = vst.msk [vmem:[#allocation2 + $0x80] sm:$0x1] %vm442_vm1, %v3187_v1  ;;  %v559_v48 = vld [vmem:[%s3320_s24 + $0x58] sm:$0xff]  ;;  %v566_v53 = vld [vmem:[%s3320_s24 + $0x90] sm:$0xff] }
  0x22   : > { %938 = vperm.xlu2 %2992, %v645_v3   ;;  %454 = vst.msk [vmem:[#allocation2 + $0xa0] sm:$0x1] %vm442_vm1, %v3187_v1  ;;  %v646_v12 = vld [vmem:[#allocation2 + $0x9] sm:$0xff]  ;;  %v563_v58 = vld [vmem:[%s3320_s24 + $0x78] sm:$0xff] }
  0x23   : > { %455 = vst.msk [vmem:[#allocation2 + $0xc0] sm:$0x1] %vm442_vm1, %v3187_v1  ;;  %v561_v45 = vld [vmem:[%s3320_s24 + $0x68] sm:$0xff] }
  0x24   : > { %v615_v5 = vld [vmem:[#allocation2 + $0x20] sm:$0xff]  ;;  %456 = vst.msk [vmem:[#allocation2 + $0xe0] sm:$0x1] %vm442_vm1, %v3187_v1  ;;  %v565_v2 = vld [vmem:[%s3320_s24 + $0x88] sm:$0xff] }
  0x25   : > { %754 = vperm.xlu1 %2993, %v615_v5   ;;  %457 = vst.msk [vmem:[#allocation2 + $0x100] sm:$0x1] %vm442_vm1, %v3187_v1  ;;  %v613_v6 = vld [vmem:[#allocation2] sm:$0xff] }
  0x26   : > { %458 = vst.msk [vmem:[#allocation2 + $0x120] sm:$0x1] %vm442_vm1, %v3187_v1  ;;  %v647_v7 = vld [vmem:[#allocation2 + $0x21] sm:$0xff] }
  0x27   : > { %459 = vst.msk [vmem:[#allocation2 + $0x140] sm:$0x1] %vm442_vm1, %v3187_v1 }
  0x28   : > { %460 = vst.msk [vmem:[#allocation2 + $0x160] sm:$0x1] %vm442_vm1, %v3187_v1 }
  0x29   : > { %744 = vperm.xlu0 %2991, %v613_v6   ;;  %461 = vst.msk [vmem:[#allocation2 + $0x180] sm:$0x1] %vm442_vm1, %v3187_v1  ;;  %v3443_v6 = vld [vmem:[%s4664_s1 + $0x2] ss:$0 sm:$0xff] }
  0x2a   : > { %462 = vst.msk [vmem:[#allocation2 + $0x1a0] sm:$0x1] %vm442_vm1, %v3187_v1 }
  0x2b   : > { %463 = vst.msk [vmem:[#allocation2 + $0x1c0] sm:$0x1] %vm442_vm1, %v3187_v1 }
  0x2c   : > { %464 = vst.msk [vmem:[#allocation2 + $0x1e0] sm:$0x1] %vm442_vm1, %v3187_v1 }
  0x2d   : > { %465 = vst.msk [vmem:[#allocation2 + $0x200] sm:$0x1] %vm442_vm1, %v3187_v1  ;;  %vm2806_vm1 = vcmask 408576  }
  0x2e   : > { %583 = vst.msk [vmem:[#allocation2 + $0x41] sm:$0xff] %vm438_vm0, %v550_v8 }
  0x2f   : > { %582 = vst.msk [vmem:[#allocation2 + $0x29] sm:$0xff] %vm438_vm0, %v549_v9 }
  0x30   : > { %584 = vst.msk [vmem:[#allocation2 + $0x49] sm:$0xff] %vm438_vm0, %v551_v10 }
  0x31   : > { %948 = vperm.xlu0 %2991, %v647_v7   ;;  %585 = vst.msk [vmem:[#allocation2 + $0x61] sm:$0xff] %vm438_vm0, %v552_v11  ;;  %v3457_v11 = vld [vmem:[%s4664_s1 + $0x3] ss:$0 sm:$0xff] }
  0x32   : > { %586 = vst.msk [vmem:[#allocation2 + $0x69] sm:$0xff] %vm438_vm0, %v553_v16 }
  0x33   : > { %587 = vst.msk [vmem:[#allocation2 + $0x81] sm:$0xff] %vm438_vm0, %v554_v17 }
  0x34   : > { %588 = vst.msk [vmem:[#allocation2 + $0x89] sm:$0xff] %vm438_vm0, %v555_v20 }
  0x35   : > { %v617_v13 = vld [vmem:[#allocation2 + $0x40] sm:$0xff]  ;;  %589 = vst.msk [vmem:[#allocation2 + $0xa1] sm:$0xff] %vm438_vm0, %v556_v25 }
  0x36   : > { %764 = vperm.xlu2 %2992, %v617_v13   ;;  %v616_v14 = vld [vmem:[#allocation2 + $0x28] sm:$0xff]  ;;  %591 = vst.msk [vmem:[#allocation2 + $0xc1] sm:$0xff] %vm438_vm0, %v558_v28 }
  0x37   : > { %759 = vperm.xlu1 %2993, %v616_v14   ;;  %v711_v15 = vld [vmem:[#allocation2 + $0x41] sm:$0xff]  ;;  %v648_v18 = vld [vmem:[#allocation2 + $0x29] sm:$0xff]  ;;  %593 = vst.msk [vmem:[#allocation2 + $0xe1] sm:$0xff] %vm438_vm0, %v560_v29 }
  0x38   : > { %v680_v19 = vld [vmem:[#allocation2 + $0x48] sm:$0xff]  ;;  %v619_v22 = vld [vmem:[#allocation2 + $0x60] sm:$0xff]  ;;  %597 = vst.msk [vmem:[#allocation2 + $0x121] sm:$0xff] %vm438_vm0, %v564_v31 }
  0x39   : > { %943 = vperm.xlu0 %2991, %v646_v12   ;;  %v712_v23 = vld [vmem:[#allocation2 + $0x49] sm:$0xff]  ;;  %v651_v24 = vld [vmem:[#allocation2 + $0x61] sm:$0xff]  ;;  %595 = vst.msk [vmem:[#allocation2 + $0x101] sm:$0xff] %vm438_vm0, %v562_v34 }
  0x3a   : > { %v683_v21 = vld [vmem:[#allocation2 + $0x80] sm:$0xff]  ;;  %v620_v27 = vld [vmem:[#allocation2 + $0x68] sm:$0xff]  ;;  %590 = vst.msk [vmem:[#allocation2 + $0xa9] sm:$0xff] %vm438_vm0, %v557_v37 }
  0x3b   : > { %v715_v26 = vld [vmem:[#allocation2 + $0x81] sm:$0xff]  ;;  %v652_v30 = vld [vmem:[#allocation2 + $0x69] sm:$0xff]  ;;  %594 = vst.msk [vmem:[#allocation2 + $0xe9] sm:$0xff] %vm438_vm0, %v561_v45 }
  0x3c   : > { %v623_v32 = vld [vmem:[#allocation2 + $0xa0] sm:$0xff]  ;;  %v684_v33 = vld [vmem:[#allocation2 + $0x88] sm:$0xff]  ;;  %592 = vst.msk [vmem:[#allocation2 + $0xc9] sm:$0xff] %vm438_vm0, %v559_v48 }
  0x3d   : > { %v625_v35 = vld [vmem:[#allocation2 + $0xc0] sm:$0xff]  ;;  %v716_v36 = vld [vmem:[#allocation2 + $0x89] sm:$0xff]  ;;  %599 = vst.msk [vmem:[#allocation2 + $0x141] sm:$0xff] %vm438_vm0, %v566_v53 }
  0x3e   : > { %1174 = vperm.xlu2 %2992, %v617_v13   ;;  %v3384_v38 = vld [vmem:[#allocation2 + $0xe1] sm:$0xff]  ;;  %596 = vst.msk [vmem:[#allocation2 + $0x109] sm:$0xff] %vm438_vm0, %v563_v58 }
  0x3f   : > { %1164 = vperm.xlu1 %2993, %v615_v5   ;;  %v3386_v39 = vld [vmem:[#allocation2 + $0xa1] sm:$0xff]  ;;  %598 = vst.msk [vmem:[#allocation2 + $0x129] sm:$0xff] %vm438_vm0, %v565_v2 }
  0x40   : > { %v3390_v41 = vld [vmem:[#allocation2 + $0x101] sm:$0xff]  ;;  %486 = vst.msk [vmem:[#allocation3] sm:$0xff] %vm485_vm2, %v3187_v1 }
  0x41   : > { %1400 = vperm.xlu0 %2991, %v711_v15   ;;  %v3392_v42 = vld [vmem:[#allocation2 + $0xc1] sm:$0xff]  ;;  %v3434_v3 = vld [vmem:[#allocation2 + $0xa9] sm:$0xff]  ;;  %487 = vst.msk [vmem:[#allocation3 + $0x8] sm:$0xff] %vm485_vm2, %v3187_v1 }
  0x42   : > { %v627_v43 = vld [vmem:[#allocation2 + $0xe0] sm:$0xff]  ;;  %v3412_v57 = vld [vmem:[#allocation2 + $0xa8] sm:$0xff]  ;;  %491 = vst.msk [vmem:[#allocation3 + $0xd8] sm:$0xff] %vm485_vm2, %v3187_v1 }
  0x43   : > { %v3402_v47 = vld [vmem:[#allocation2 + $0x120] sm:$0xff]  ;;  %v3421_v62 = vld [vmem:[#allocation2 + $0xc9] sm:$0xff]  ;;  %492 = vst.msk [vmem:[#allocation3 + $0xe0] sm:$0xff] %vm485_vm2, %v3187_v1 }
  0x44   : > { %v629_v49 = vld [vmem:[#allocation2 + $0x100] sm:$0xff]  ;;  %505 = vst.msk [vmem:[#allocation3 + $0x21] sm:$0xff] %vm485_vm2, %v3187_v1  ;;  %v3472_v20 = vld [vmem:[#allocation2 + $0xc8] sm:$0xff] }
  0x45   : > { %v3407_v52 = vld [vmem:[#allocation2 + $0x121] sm:$0xff]  ;;  %506 = vst.msk [vmem:[#allocation3 + $0x39] sm:$0xff] %vm485_vm2, %v3187_v1 }
  0x46   : > { %1390 = vperm.xlu2 %2992, %v647_v7   ;;  %507 = vst.msk [vmem:[#allocation3 + $0x51] sm:$0xff] %vm485_vm2, %v3187_v1 }
  0x47   : > { %953 = vperm.xlu1 %2993, %v648_v18   ;;  %508 = vst.msk [vmem:[#allocation3 + $0x69] sm:$0xff] %vm485_vm2, %v3187_v1 }
  0x48   : > { %509 = vst.msk [vmem:[#allocation3 + $0x81] sm:$0xff] %vm485_vm2, %v3187_v1 }
  0x49   : > { %1395 = vperm.xlu0 %2991, %v648_v18   ;;  %v3467_v18 = vld [vmem:[#allocation2 + $0xe8] sm:$0xff]  ;;  %510 = vst.msk [vmem:[#allocation3 + $0x99] sm:$0xff] %vm485_vm2, %v3187_v1 }
  0x4a   : > { %511 = vst.msk [vmem:[#allocation3 + $0xb1] sm:$0xff] %vm485_vm2, %v3187_v1 }
  0x4b   : > { %512 = vst.msk [vmem:[#allocation3 + $0xc9] sm:$0xff] %vm485_vm2, %v3187_v1 }
  0x4c   : > { %514 = vst.msk [vmem:[#allocation4] sm:$0xff] %vm485_vm2, %v3187_v1 }
  0x4d   : > { %517 = vst.msk [vmem:[#allocation4 + $0x50] sm:$0xff] %vm485_vm2, %v3187_v1 }
  0x4e   : > { %1179 = vperm.xlu2 %2992, %v680_v19   ;;  %489 = vst.msk [vmem:[#allocation3 + $0x10] sm:$0x1] %vm488_vm3, %v3187_v1 }
  0x4f   : > { %1169 = vperm.xlu1 %2993, %v616_v14   ;;  %504 = vst.msk [vmem:[#allocation3 + $0x9] sm:$0xff] %vm485_vm2, %v3187_v1 }
  0x50   : > { %493 = vst.msk [vmem:[#allocation3 + $0xe8] sm:$0x1] %vm488_vm3, %v3187_v1 }
  0x51   : > { %958 = vperm.xlu0 %2991, %v711_v15   ;;  %v3462_v15 = vld [vmem:[#allocation2 + $0x140] sm:$0xff]  ;;  %494 = vst.msk [vmem:[#allocation3] sm:$0x1] %vm488_vm3, %v3187_v1 }
  0x52   : > { %495 = vst.msk [vmem:[#allocation3 + $0x18] sm:$0x1] %vm488_vm3, %v3187_v1 }
  0x53   : > { %496 = vst.msk [vmem:[#allocation3 + $0x30] sm:$0x1] %vm488_vm3, %v3187_v1 }
  0x54   : > { %497 = vst.msk [vmem:[#allocation3 + $0x48] sm:$0x1] %vm488_vm3, %v3187_v1 }
  0x55   : > { %498 = vst.msk [vmem:[#allocation3 + $0x60] sm:$0x1] %vm488_vm3, %v3187_v1 }
  0x56   : > { %774 = vperm.xlu2 %2992, %v619_v22   ;;  %499 = vst.msk [vmem:[#allocation3 + $0x78] sm:$0x1] %vm488_vm3, %v3187_v1 }
  0x57   : > { %1405 = vperm.xlu1 %2993, %v712_v23   ;;  %500 = vst.msk [vmem:[#allocation3 + $0x90] sm:$0x1] %vm488_vm3, %v3187_v1 }
  0x58   : > { %501 = vst.msk [vmem:[#allocation3 + $0xa8] sm:$0x1] %vm488_vm3, %v3187_v1 }
  0x59   : > { %1194 = vperm.xlu0 %2991, %v683_v21   ;;  %502 = vst.msk [vmem:[#allocation3 + $0xc0] sm:$0x1] %vm488_vm3, %v3187_v1 }
  0x5a   : > { %503 = vst.msk [vmem:[#allocation3 + $0xd8] sm:$0x1] %vm488_vm3, %v3187_v1 }
  0x5b   : > { %515 = vst.msk [vmem:[#allocation4 + $0x8] sm:$0x1] %vm488_vm3, %v3187_v1 }
  0x5c   : > { %518 = vst.msk [vmem:[#allocation4 + $0x58] sm:$0x1] %vm488_vm3, %v3187_v1 }
  0x5d   : > { %519 = vst.msk [vmem:[#allocation4] sm:$0x1] %vm488_vm3, %v3187_v1 }
  0x5e   : > { %1184 = vperm.xlu2 %2992, %v619_v22   ;;  %520 = vst.msk [vmem:[#allocation4 + $0x10] sm:$0x1] %vm488_vm3, %v3187_v1 }
  0x5f   : > { %968 = vperm.xlu1 %2993, %v651_v24   ;;  %521 = vst.msk [vmem:[#allocation4 + $0x20] sm:$0x1] %vm488_vm3, %v3187_v1 }
  0x60   : > { %522 = vst.msk [vmem:[#allocation4 + $0x30] sm:$0x1] %vm488_vm3, %v3187_v1 }
  0x61   : > { %963 = vperm.xlu0 %2991, %v712_v23   ;;  %523 = vst.msk [vmem:[#allocation4 + $0x40] sm:$0x1] %vm488_vm3, %v3187_v1 }
  0x62   : > { %524 = vst.msk [vmem:[#allocation4 + $0x50] sm:$0x1] %vm488_vm3, %v3187_v1 }
  0x63   : > { %513 = vst.msk [vmem:[#allocation3 + $0xe1] sm:$0xff] %vm485_vm2, %v3187_v1 }
  0x64   : > { %533 = vst.msk [vmem:[#allocation5] sm:$0xff] %vm532_vm11, %v3187_v1 }
  0x65   : > { %537 = vst.msk [vmem:[#allocation5 + $0x30] sm:$0xff] %vm532_vm11, %v3187_v1 }
  0x66   : > { %779 = vperm.xlu2 %2992, %v620_v27   ;;  %535 = vst.msk [vmem:[#allocation5 + $0x8] sm:$0x1] %vm534_vm12, %v3187_v1 }
  0x67   : > { %769 = vperm.xlu1 %2993, %v680_v19   ;;  %544 = vst.msk [vmem:[#allocation5 + $0x3] sm:$0x3f] %vm543_vm13, %v3187_v1 }
  0x68   : > { %538 = vst.msk [vmem:[#allocation5 + $0x38] sm:$0x1] %vm534_vm12, %v3187_v1 }
  0x69   : > { %1420 = vperm.xlu0 %2991, %v715_v26   ;;  %539 = vst.msk [vmem:[#allocation5] sm:$0x1] %vm534_vm12, %v3187_v1 }
  0x6a   : > { %540 = vst.msk [vmem:[#allocation5 + $0x10] sm:$0x1] %vm534_vm12, %v3187_v1 }
  0x6b   : > { %541 = vst.msk [vmem:[#allocation5 + $0x20] sm:$0x1] %vm534_vm12, %v3187_v1 }
  0x6c   : > { %542 = vst.msk [vmem:[#allocation5 + $0x30] sm:$0x1] %vm534_vm12, %v3187_v1 }
  0x6d   : > { %545 = vst.msk [vmem:[#allocation5 + $0x13] sm:$0x3f] %vm543_vm13, %v3187_v1 }
  0x6e   : > { %1410 = vperm.xlu2 %2992, %v651_v24   ;;  %546 = vst.msk [vmem:[#allocation5 + $0x23] sm:$0x3f] %vm543_vm13, %v3187_v1 }
  0x6f   : > { %973 = vperm.xlu1 %2993, %v652_v30   ;;  %547 = vst.msk [vmem:[#allocation5 + $0x33] sm:$0x3f] %vm543_vm13, %v3187_v1 }
  0x70   : > { %526 = vst.msk [vmem:[#allocation4 + $0x5] sm:$0xf] %vm525_vm15, %v3187_v1 }
  0x71   : > { %1415 = vperm.xlu0 %2991, %v652_v30   ;;  %v3497_v30 = vld [vmem:[#allocation2 + $0x108] sm:$0xff]  ;;  %527 = vst.msk [vmem:[#allocation4 + $0x15] sm:$0xf] %vm525_vm15, %v3187_v1 }
  0x72   : > { %528 = vst.msk [vmem:[#allocation4 + $0x25] sm:$0xf] %vm525_vm15, %v3187_v1 }
  0x73   : > { %529 = vst.msk [vmem:[#allocation4 + $0x35] sm:$0xf] %vm525_vm15, %v3187_v1 }
  0x74   : > { %530 = vst.msk [vmem:[#allocation4 + $0x45] sm:$0xf] %vm525_vm15, %v3187_v1 }
  0x75   : > { %531 = vst.msk [vmem:[#allocation4 + $0x55] sm:$0xf] %vm525_vm15, %v3187_v1 }
  0x76   : > { %1199 = vperm.xlu2 %2992, %v684_v33  }
  0x77   : > { %1189 = vperm.xlu1 %2993, %v620_v27   ;;  %v3493_v27 = vld [vmem:[%s4665_s2] ss:$0 sm:$0xff] }
  0x79   : > { %794 = vperm.xlu0 %2991, %v623_v32  }
  0x7c   : > { %v939_v40 = vpop.permute.xlu2 %938 }
  0x7d   : > { %v1097_v5 = vmul.f32 %v3426_v63, %v939_v40 }
  0x7e   : > { %784 = vperm.xlu2 %2992, %v683_v21  }
  0x7f   : > { %1425 = vperm.xlu1 %2993, %v716_v36  }
  0x81   : > { %804 = vperm.xlu0 %2991, %v625_v35  }
  0x86   : > { %988 = vperm.xlu2 %2992, %v3386_v39  }
  0x87   : > { %978 = vperm.xlu1 %2993, %v715_v26  }
  0x89   : > { %1008 = vperm.xlu0 %2991, %v3384_v38  }
  0x8e   : > { %998 = vperm.xlu2 %2992, %v3392_v42  }
  0x8f   : > { %814 = vperm.xlu1 %2993, %v627_v43  }
  0x90   : > { %v3400_v46 = vpop.permute.xlu2 %764 }
  0x91   : > { %1018 = vperm.xlu0 %2991, %v3390_v41  }
  0x93   : > { %v3395_v44 = vpop.permute.xlu0 %749 }
  0x94   : > { %v904_v37 = vmul.f32 %v3431_v0, %v3395_v44 }
  0x96   : > { %834 = vperm.xlu2 %2992, %v3402_v47  }
  0x97   : > { %824 = vperm.xlu1 %2993, %v629_v49   ;;  %v755_v54 = vpop.permute.xlu1 %754 }
  0x98   : > { %v1175_v51 = vpop.permute.xlu2 %1174  ;;  %v905_v7 = vmul.f32 %v3431_v0, %v755_v54 }
  0x99   : > { %1214 = vperm.xlu0 %2991, %v625_v35   ;;  %v1325_v16 = vmul.f32 %v3443_v6, %v1175_v51  ;;  %v3521_v51 = vld [vmem:[#allocation2 + $0x129] sm:$0xff] }
  0x9b   : > { %v745_v50 = vpop.permute.xlu0 %744 }
  0x9c   : > { %v903_v8 = vmul.f32 %v3431_v0, %v745_v50 }
  0x9e   : > { %1204 = vperm.xlu2 %2992, %v623_v32   ;;  %v1129_v17 = vadd.f32 %v1097_v5, %v903_v8  ;;  %v3504_v32 = vld [vmem:[#allocation2 + $0xe9] sm:$0xff] }
  0x9f   : > { %1028 = vperm.xlu1 %2993, %v3407_v52  }
  0xa0   : > { %v1391_v56 = vpop.permute.xlu2 %1390 }
  0xa1   : > { %983 = vperm.xlu0 %2991, %v716_v36   ;;  %v1549_v23 = vmul.f32 %v3457_v11, %v1391_v56 }
  0xa3   : > { %v949_v55 = vpop.permute.xlu0 %948 }
  0xa4   : > { %v1099_v4 = vmul.f32 %v3426_v63, %v949_v55 }
  0xa6   : > { %799 = vperm.xlu2 %2992, %v3412_v57   ;;  %v1131_v12 = vadd.f32 %v1099_v4, %v905_v7  ;;  %v3550_v7 = vld [vmem:[#allocation2 + $0x109] sm:$0xff] }
  0xa7   : > { %789 = vperm.xlu1 %2993, %v684_v33  }
  0xa8   : > { %v3417_v60 = vpop.permute.xlu2 %1179  ;;  %v1357_v22 = vadd.f32 %v1325_v16, %v1131_v12  ;;  %v3556_v12 = vld [vmem:[#allocation2 + $0x128] sm:$0xff] }
  0xa9   : > { %1234 = vperm.xlu0 %2991, %v629_v49   ;;  %v3419_v61 = vpop.permute.xlu1 %759 }
  0xaa   : > { %v906_v53 = vmul.f32 %v3431_v0, %v3419_v61 }
  0xab   : > { %v944_v59 = vpop.permute.xlu0 %943 }
  0xac   : > { %v1098_v34 = vmul.f32 %v3426_v63, %v944_v59  ;;  %v1326_v59 = vmul.f32 %v3443_v6, %v3417_v60  ;;  %v567_v60 = vld [vmem:[%s3320_s24 + $0x98] sm:$0xff] }
  0xad   : > { %600 = vst.msk [vmem:[#allocation2 + $0x149] sm:$0xff] %vm438_vm0, %v567_v60 }
  0xae   : > { %1224 = vperm.xlu2 %2992, %v627_v43   ;;  %v1130_v48 = vadd.f32 %v1098_v34, %v904_v37  ;;  %v907_v34 = vmul.f32 %v3431_v0, %v3400_v46 }
  0xaf   : > { %993 = vperm.xlu1 %2993, %v3434_v3  }
  0xb0   : > { %v3450_v10 = vpop.permute.xlu2 %774 }
  0xb1   : > { %1003 = vperm.xlu0 %2991, %v3421_v62   ;;  %v1165_v13 = vpop.permute.xlu1 %1164 }
  0xb2   : > { %v1323_v14 = vmul.f32 %v3443_v6, %v1165_v13 }
  0xb3   : > { %v1401_v9 = vpop.permute.xlu0 %1400 }
  0xb4   : > { %v1551_v19 = vmul.f32 %v3457_v11, %v1401_v9  ;;  %v1355_v21 = vadd.f32 %v1323_v14, %v1129_v17 }
  0xb6   : > { %819 = vperm.xlu2 %2992, %v3467_v18   ;;  %v1583_v24 = vadd.f32 %v1551_v19, %v1357_v22  ;;  %v1581_v28 = vadd.f32 %v1549_v23, %v1355_v21 }
  0xb7   : > { %809 = vperm.xlu1 %2993, %v3472_v20  }
  0xb8   : > { %v3486_v26 = vpop.permute.xlu2 %1184  ;;  %v1619_v31 = vadd.f32 %v3493_v27, %v1583_v24  ;;  %v1617_v33 = vadd.f32 %v3493_v27, %v1581_v28 }
  0xb9   : > { %1254 = vperm.xlu0 %2991, %v3462_v15   ;;  %v954_v29 = vpop.permute.xlu1 %953 }
  0xba   : > { %v1651_v35 = vmax.f32 %v1619_v31, 0.0  ;;  %v1649_v43 = vmax.f32 %v1617_v33, 0.0  ;;  %v1100_v49 = vmul.f32 %v3426_v63, %v954_v29 }
  0xbb   : > { %v1396_v25 = vpop.permute.xlu0 %1395 }
  0xbc   : > { %v1550_v55 = vmul.f32 %v3457_v11, %v1396_v25  ;;  %v1132_v44 = vadd.f32 %v1100_v49, %v906_v53 }
  0xbe   : > { %1244 = vperm.xlu2 %2992, %v3402_v47   ;;  %v1681_v47 = vmax.f32 %v1649_v43, %v1651_v35  ;;  %v1358_v4 = vadd.f32 %v1326_v59, %v1132_v44  ;;  %v909_v35 = vmul.f32 %v3431_v0, %v3450_v10  ;;  %v568_v44 = vld [vmem:[%s3320_s24 + $0xa0] sm:$0xff] }
  0xbf   : > { %1013 = vperm.xlu1 %2993, %v3504_v32   ;;  %601 = vst.msk [vmem:[#allocation2 + $0x161] sm:$0xff] %vm438_vm0, %v568_v44 }
  0xc0   : > { %v3517_v40 = vpop.permute.xlu2 %779  ;;  %v1705_v56 = vrot.slane %v1681_v47, 1 }
  0xc1   : > { %829 = vperm.xlu0 %2991, %v3497_v30   ;;  %v1170_v45 = vpop.permute.xlu1 %1169 }
  0xc2   : > { %v1324_v50 = vmul.f32 %v3443_v6, %v1170_v45  ;;  %v1721_v5 = vmax.f32 %v1681_v47, %v1705_v56  ;;  %v1327_v47 = vmul.f32 %v3443_v6, %v3486_v26 }
  0xc3   : > { %v3513_v36 = vpop.permute.xlu0 %958 }
  0xc4   : > { %v1356_v54 = vadd.f32 %v1324_v50, %v1130_v48  ;;  %v1769_v14 = vrot.slane %v1721_v5, 1  ;;  %v1785_v22 = vrot.slane %v1721_v5, 2  ;;  %v1101_v28 = vmul.f32 %v3426_v63, %v3513_v36 }
  0xc5   : > { %v1801_v36 = vrot.slane %v1721_v5, 3 }
  0xc6   : > { %1440 = vperm.xlu2 %2992, %v3392_v42   ;;  %v1582_v2 = vadd.f32 %v1550_v55, %v1356_v54  ;;  %v1890_v24 = vsel %vm1889_vm4, %v1721_v5, %v1769_v14  ;;  %v1133_v10 = vadd.f32 %v1101_v28, %v907_v34  ;;  %v3649_v34 = vld [vmem:[#allocation2 + $0x148] sm:$0xff] }
  0xc7   : > { %1430 = vperm.xlu1 %2993, %v3386_v39   ;;  %v1899_v31 = vsel %vm1898_vm5, %v1890_v24, %v1785_v22 }
  0xc8   : > { %v3541_v61 = vpop.permute.xlu2 %1410  ;;  %v1618_v8 = vadd.f32 %v3493_v27, %v1582_v2  ;;  %v1908_v46 = vsel %vm1907_vm6, %v1899_v31, %v1801_v36  ;;  %v1359_v59 = vadd.f32 %v1327_v47, %v1133_v10 }
  0xc9   : > { %1033 = vperm.xlu0 %2991, %v3521_v51   ;;  %v1406_v42 = vpop.permute.xlu1 %1405  ;;  %v1553_v26 = vmul.f32 %v3457_v11, %v3541_v61 }
  0xca   : > { %v1552_v39 = vmul.f32 %v3457_v11, %v1406_v42 }
  0xcb   : > { %v3535_v58 = vpop.permute.xlu0 %1194  ;;  %v1585_v5 = vadd.f32 %v1553_v26, %v1359_v59 }
  0xcc   : > { %v1584_v9 = vadd.f32 %v1552_v39, %v1358_v4 }
  0xce   : > { %1023 = vperm.xlu2 %2992, %v3550_v7   ;;  %v1620_v13 = vadd.f32 %v3493_v27, %v1584_v9 }
  0xcf   : > { %839 = vperm.xlu1 %2993, %v3556_v12  }
  0xd0   : > { %v1652_v17 = vmax.f32 %v1620_v13, 0.0  ;;  %v3571_v19 = vpop.permute.xlu2 %1199  ;;  %v570_v13 = vld [vmem:[%s3320_s24 + $0xb0] sm:$0xff] }
  0xd1   : > { %1450 = vperm.xlu0 %2991, %v3384_v38   ;;  %v1650_v38 = vmax.f32 %v1618_v8, 0.0  ;;  %v969_v21 = vpop.permute.xlu1 %968  ;;  %v3627_v8 = vld [vmem:[#allocation2 + $0x141] sm:$0xff]  ;;  %603 = vst.msk [vmem:[#allocation2 + $0x181] sm:$0xff] %vm438_vm0, %v570_v13 }
  0xd2   : > { %v1103_v29 = vmul.f32 %v3426_v63, %v969_v21 }
  0xd3   : > { %v3567_v16 = vpop.permute.xlu0 %963  ;;  %v1682_v23 = vmax.f32 %v1650_v38, %v1652_v17 }
  0xd4   : > { %v1135_v45 = vadd.f32 %v1103_v29, %v909_v35  ;;  %v572_v29 = vld [vmem:[%s3320_s24 + $0xc0] sm:$0xff] }
  0xd5   : > { %v1737_v25 = vrot.slane %v1682_v23, 1  ;;  %605 = vst.msk [vmem:[#allocation2 + $0x1a1] sm:$0xff] %vm438_vm0, %v572_v29 }
  0xd6   : > { %1219 = vperm.xlu2 %2992, %v3472_v20  }
  0xd7   : > { %v1753_v33 = vmax.f32 %v1682_v23, %v1737_v25  ;;  %1209 = vperm.xlu1 %2993, %v3412_v57   ;;  %v1329_v57 = vmul.f32 %v3443_v6, %v3535_v58 }
  0xd8   : > { %v3601_v43 = vpop.permute.xlu2 %784 }
  0xd9   : > { %1239 = vperm.xlu0 %2991, %v3497_v30   ;;  %v1825_v20 = vrot.slane %v1753_v33, 4  ;;  %v1841_v37 = vrot.slane %v1753_v33, 5  ;;  %v770_v48 = vpop.permute.xlu1 %769  ;;  %v1857_v49 = vrot.slane %v1753_v33, 6  ;;  %v1873_v53 = vrot.slane %v1753_v33, 7 }
  0xda   : > { %v1361_v2 = vadd.f32 %v1329_v57, %v1135_v45  ;;  %v908_v14 = vmul.f32 %v3431_v0, %v770_v48  ;;  %v911_v59 = vmul.f32 %v3431_v0, %v3601_v43 }
  0xdb   : > { %v1421_v30 = vpop.permute.xlu0 %1420  ;;  %v1917_v50 = vsel %vm1916_vm7, %v1908_v46, %v1825_v20  ;;  %v1330_v20 = vmul.f32 %v3443_v6, %v3571_v19 }
  0xdc   : > { %v1926_v54 = vsel %vm1925_vm8, %v1917_v50, %v1841_v37  ;;  %v1555_v55 = vmul.f32 %v3457_v11, %v1421_v30 }
  0xdd   : > { %v1935_v56 = vsel %vm1934_vm9, %v1926_v54, %v1857_v49 }
  0xde   : > { %v1944_v58 = vsel %vm1943_vm10, %v1935_v56, %v1873_v53  ;;  %1229 = vperm.xlu2 %2992, %v3467_v18   ;;  %v1587_v42 = vadd.f32 %v1555_v55, %v1361_v2  ;;  %v1102_v18 = vmul.f32 %v3426_v63, %v3567_v16 }
  0xdf   : > { %1953 = vst.msk [vmem:[#allocation3 + $0x19] sm:$0xff] %vm485_vm2, %v1944_v58  ;;  %1460 = vperm.xlu1 %2993, %v3390_v41  }
  0xe0   : > { %v989_v39 = vpop.permute.xlu2 %988  ;;  %v1623_v9 = vadd.f32 %v3493_v27, %v1587_v42  ;;  %v1134_v23 = vadd.f32 %v1102_v18, %v908_v14 }
  0xe1   : > { %1249 = vperm.xlu0 %2991, %v3556_v12   ;;  %v974_v60 = vpop.permute.xlu1 %973  ;;  %v1621_v12 = vadd.f32 %v3493_v27, %v1585_v5  ;;  %v1107_v38 = vmul.f32 %v3426_v63, %v989_v39  ;;  %v569_v39 = vld [vmem:[%s3320_s24 + $0xa8] sm:$0xff] }
  0xe2   : > { %v1655_v41 = vmax.f32 %v1623_v9, 0.0  ;;  %v1104_v16 = vmul.f32 %v3426_v63, %v974_v60  ;;  %v635_v9 = vld [vmem:[#allocation2 + $0x160] sm:$0xff]  ;;  %602 = vst.msk [vmem:[#allocation2 + $0x169] sm:$0xff] %vm438_vm0, %v569_v39 }
  0xe3   : > { %v1416_v4 = vpop.permute.xlu0 %1415  ;;  %v1653_v21 = vmax.f32 %v1621_v12, 0.0  ;;  %v574_v12 = vld [vmem:[%s3320_s24 + $0xd0] sm:$0xff] }
  0xe4   : > { %v1554_v33 = vmul.f32 %v3457_v11, %v1416_v4  ;;  %v3674_v4 = vld [vmem:[#allocation2 + $0x180] sm:$0xff]  ;;  %607 = vst.msk [vmem:[#allocation2 + $0x1c1] sm:$0xff] %vm438_vm0, %v574_v12 }
  0xe5   : > { %v1683_v28 = vmax.f32 %v1653_v21, %v1655_v41 }
  0xe6   : > { %1480 = vperm.xlu2 %2992, %v3627_v8  }
  0xe7   : > { %1470 = vperm.xlu1 %2993, %v3407_v52   ;;  %v910_v52 = vmul.f32 %v3431_v0, %v3517_v40  ;;  %v1706_v36 = vrot.slane %v1683_v28, 1 }
  0xe8   : > { %v999_v17 = vpop.permute.xlu2 %998 }
  0xe9   : > { %1445 = vperm.xlu0 %2991, %v3421_v62   ;;  %v1190_v22 = vpop.permute.xlu1 %1189  ;;  %v1136_v35 = vadd.f32 %v1104_v16, %v910_v52  ;;  %v1109_v40 = vmul.f32 %v3426_v63, %v999_v17  ;;  %v1722_v49 = vmax.f32 %v1683_v28, %v1706_v36  ;;  %v728_v52 = vld [vmem:[#allocation2 + $0x149] sm:$0xff]  ;;  %v571_v36 = vld [vmem:[%s3320_s24 + $0xb8] sm:$0xff] }
  0xea   : > { %v1328_v24 = vmul.f32 %v3443_v6, %v1190_v22  ;;  %604 = vst.msk [vmem:[#allocation2 + $0x189] sm:$0xff] %vm438_vm0, %v571_v36  ;;  %v636_v39 = vld [vmem:[#allocation2 + $0x168] sm:$0xff] }
  0xeb   : > { %v795_v61 = vpop.permute.xlu0 %794  ;;  %v1362_v57 = vadd.f32 %v1330_v20, %v1136_v35  ;;  %v1770_v53 = vrot.slane %v1722_v49, 1  ;;  %v1786_v2 = vrot.slane %v1722_v49, 2  ;;  %v1802_v41 = vrot.slane %v1722_v49, 3  ;;  %v3738_v12 = vld [vmem:[#allocation2 + $0x1c0] sm:$0xff] }
  0xec   : > { %v913_v62 = vmul.f32 %v3431_v0, %v795_v61  ;;  %v1360_v31 = vadd.f32 %v1328_v24, %v1134_v23  ;;  %v3693_v24 = vld [vmem:[#allocation2 + $0x1a1] sm:$0xff] }
  0xee   : > { %v3643_v25 = vadd.f32 %v1107_v38, %v913_v62  ;;  %1435 = vperm.xlu2 %2992, %v3434_v3   ;;  %v1586_v46 = vadd.f32 %v1554_v33, %v1360_v31  ;;  %v3664_v3 = vld [vmem:[#allocation2 + $0x161] sm:$0xff] }
  0xef   : > { %1259 = vperm.xlu1 %2993, %v3649_v34  }
  0xf0   : > { %v3658_v37 = vpop.permute.xlu2 %834  ;;  %v1622_v50 = vadd.f32 %v3493_v27, %v1586_v46 }
  0xf1   : > { %844 = vperm.xlu0 %2991, %v3462_v15   ;;  %v1426_v45 = vpop.permute.xlu1 %1425 }
  0xf2   : > { %v1556_v15 = vmul.f32 %v3457_v11, %v1426_v45  ;;  %v1654_v55 = vmax.f32 %v1622_v50, 0.0  ;;  %v573_v50 = vld [vmem:[%s3320_s24 + $0xc8] sm:$0xff] }
  0xf3   : > { %v805_v30 = vpop.permute.xlu0 %804  ;;  %606 = vst.msk [vmem:[#allocation2 + $0x1a9] sm:$0xff] %vm438_vm0, %v573_v50 }
  0xf4   : > { %v915_v10 = vmul.f32 %v3431_v0, %v805_v30  ;;  %v1588_v47 = vadd.f32 %v1556_v15, %v1362_v57 }
  0xf6   : > { %v3662_v48 = vadd.f32 %v1109_v40, %v915_v10  ;;  %1465 = vperm.xlu2 %2992, %v3550_v7   ;;  %v1624_v19 = vadd.f32 %v3493_v27, %v1588_v47  ;;  %v1891_v7 = vsel %vm1889_vm4, %v1722_v49, %v1770_v53 }
  0xf7   : > { %1455 = vperm.xlu1 %2993, %v3504_v32   ;;  %v1900_v43 = vsel %vm1898_vm5, %v1891_v7, %v1786_v2 }
  0xf8   : > { %v1656_v44 = vmax.f32 %v1624_v19, 0.0  ;;  %v1205_v56 = vpop.permute.xlu2 %1204  ;;  %v1909_v21 = vsel %vm1907_vm6, %v1900_v43, %v1802_v41  ;;  %v639_v19 = vld [vmem:[#allocation2 + $0x1a0] sm:$0xff] }
  0xf9   : > { %1048 = vperm.xlu0 %2991, %v3664_v3   ;;  %v979_v58 = vpop.permute.xlu1 %978  ;;  %v1331_v32 = vmul.f32 %v3443_v6, %v1205_v56 }
  0xfa   : > { %v1684_v26 = vmax.f32 %v1654_v55, %v1656_v44  ;;  %v1105_v42 = vmul.f32 %v3426_v63, %v979_v58  ;;  %v668_v44 = vld [vmem:[#allocation2 + $0x169] sm:$0xff] }
  0xfb   : > { %v1009_v54 = vpop.permute.xlu0 %1008 }
  0xfc   : > { %v1738_v5 = vrot.slane %v1684_v26, 1  ;;  %v1137_v60 = vadd.f32 %v1105_v42, %v911_v59  ;;  %v1111_v62 = vmul.f32 %v3426_v63, %v1009_v54 }
  0xfe   : > { %v1754_v13 = vmax.f32 %v1684_v26, %v1738_v5  ;;  %1038 = vperm.xlu2 %2992, %v3627_v8   ;;  %v3685_v18 = vadd.f32 %v1331_v32, %v1137_v60  ;;  %v575_v5 = vld [vmem:[%s3320_s24 + $0xd8] sm:$0xff] }
  0xff   : > { %854 = vperm.xlu1 %2993, %v635_v9   ;;  %608 = vst.msk [vmem:[#allocation2 + $0x1c9] sm:$0xff] %vm438_vm0, %v575_v5 }
 0x100   : > { %v1826_v14 = vrot.slane %v1754_v13, 4  ;;  %v1842_v38 = vrot.slane %v1754_v13, 5  ;;  %v3687_v17 = vpop.permute.xlu2 %799  ;;  %v1858_v23 = vrot.slane %v1754_v13, 6  ;;  %v1874_v28 = vrot.slane %v1754_v13, 7 }
 0x101   : > { %864 = vperm.xlu0 %2991, %v3674_v4   ;;  %v815_v22 = vpop.permute.xlu1 %814 }
 0x102   : > { %v1918_v8 = vsel %vm1916_vm7, %v1909_v21, %v1826_v14  ;;  %v917_v16 = vmul.f32 %v3431_v0, %v815_v22  ;;  %v576_v21 = vld [vmem:[%s3320_s24 + $0xe0] sm:$0xff] }
 0x103   : > { %v1019_v61 = vpop.permute.xlu0 %1018  ;;  %v1927_v29 = vsel %vm1925_vm8, %v1918_v8, %v1842_v38  ;;  %v670_v38 = vld [vmem:[#allocation2 + $0x189] sm:$0xff]  ;;  %609 = vst.msk [vmem:[#allocation2 + $0x1e1] sm:$0xff] %vm438_vm0, %v576_v21 }
 0x104   : > { %v1936_v31 = vsel %vm1934_vm9, %v1927_v29, %v1858_v23  ;;  %v1143_v33 = vadd.f32 %v1111_v62, %v917_v16  ;;  %v1113_v40 = vmul.f32 %v3426_v63, %v1019_v61  ;;  %v640_v62 = vld [vmem:[#allocation2 + $0x1a8] sm:$0xff] }
 0x105   : > { %v1945_v35 = vsel %vm1943_vm10, %v1936_v31, %v1874_v28  ;;  %v735_v16 = vld [vmem:[#allocation2 + $0x1c1] sm:$0xff] }
 0x106   : > { %1954 = vst.msk [vmem:[#allocation3 + $0x31] sm:$0xff] %vm485_vm2, %v1945_v35  ;;  %1485 = vperm.xlu2 %2992, %v728_v52   ;;  %v3772_v50 = vld [vmem:[#allocation2 + $0x1c8] sm:$0xff] }
 0x107   : > { %1475 = vperm.xlu1 %2993, %v3521_v51   ;;  %v669_v51 = vld [vmem:[#allocation2 + $0x181] sm:$0xff] }
 0x108   : > { %v1225_v20 = vpop.permute.xlu2 %1224 }
 0x109   : > { %1068 = vperm.xlu0 %2991, %v3693_v24   ;;  %v1335_v10 = vmul.f32 %v3443_v6, %v1225_v20  ;;  %v825_v45 = vpop.permute.xlu1 %824  ;;  %v577_v20 = vld [vmem:[%s3320_s24 + $0xe8] sm:$0xff] }
 0x10a   : > { %v919_v57 = vmul.f32 %v3431_v0, %v825_v45  ;;  %610 = vst.msk [vmem:[#allocation2 + $0x1e9] sm:$0xff] %vm438_vm0, %v577_v20 }
 0x10b   : > { %v1215_v30 = vpop.permute.xlu0 %1214  ;;  %v3711_v49 = vadd.f32 %v1335_v10, %v3662_v48 }
 0x10c   : > { %v1333_v46 = vmul.f32 %v3443_v6, %v1215_v30  ;;  %v1145_v47 = vadd.f32 %v1113_v40, %v919_v57  ;;  %v578_v40 = vld [vmem:[%s3320_s24 + $0xf0] sm:$0xff] }
 0x10d   : > { %611 = vst.msk [vmem:[#allocation2 + $0x201] sm:$0xff] %vm438_vm0, %v578_v40 }
 0x10e   : > { %v3708_v15 = vadd.f32 %v1333_v46, %v3643_v25  ;;  %1058 = vperm.xlu2 %2992, %v669_v51   ;;  %v921_v25 = vmul.f32 %v3431_v0, %v3658_v37  ;;  %v638_v37 = vld [vmem:[#allocation2 + $0x188] sm:$0xff] }
 0x10f   : > { %874 = vperm.xlu1 %2993, %v639_v19  }
 0x110   : > { %v3718_v54 = vpop.permute.xlu2 %819 }
 0x111   : > { %849 = vperm.xlu0 %2991, %v3649_v34   ;;  %v1029_v55 = vpop.permute.xlu1 %1028 }
 0x112   : > { %v1115_v48 = vmul.f32 %v3426_v63, %v1029_v55 }
 0x113   : > { %v3716_v53 = vpop.permute.xlu0 %983 }
 0x114   : > { %v1147_v56 = vadd.f32 %v1115_v48, %v921_v25  ;;  %v1106_v25 = vmul.f32 %v3426_v63, %v3716_v53  ;;  %v579_v48 = vld [vmem:[%s3320_s24 + $0xf8] sm:$0xff]  ;;  %v707_v5 = vld [vmem:[#allocation2 + $0x200] sm:$0xff] }
 0x115   : > { %612 = vst.msk [vmem:[#allocation2 + $0x209] sm:$0xff] %vm438_vm0, %v579_v48  ;;  %vm2627_vm0 = vcmask 517120  }
 0x116   : > { %1274 = vperm.xlu2 %2992, %v3674_v4  }
 0x117   : > { %1264 = vperm.xlu1 %2993, %v635_v9   ;;  %v672_v9 = vld [vmem:[#allocation2 + $0x1a9] sm:$0xff] }
 0x118   : > { %v1245_v58 = vpop.permute.xlu2 %1244 }
 0x119   : > { %1053 = vperm.xlu0 %2991, %v668_v44   ;;  %v1339_v2 = vmul.f32 %v3443_v6, %v1245_v58  ;;  %v3726_v26 = vpop.permute.xlu1 %789 }
 0x11b   : > { %v1235_v34 = vpop.permute.xlu0 %1234  ;;  %v3730_v7 = vadd.f32 %v1339_v2, %v1145_v47 }
 0x11c   : > { %v1337_v59 = vmul.f32 %v3443_v6, %v1235_v34 }
 0x11e   : > { %v3728_v42 = vadd.f32 %v1337_v59, %v1143_v33  ;;  %1043 = vperm.xlu2 %2992, %v728_v52  }
 0x11f   : > { %859 = vperm.xlu1 %2993, %v636_v39  }
 0x120   : > { %v1441_v32 = vpop.permute.xlu2 %1440 }
 0x121   : > { %869 = vperm.xlu0 %2991, %v638_v37   ;;  %v3736_v60 = vpop.permute.xlu1 %993  ;;  %v1559_v28 = vmul.f32 %v3457_v11, %v1441_v32 }
 0x122   : > { %v1108_v53 = vmul.f32 %v3426_v63, %v3736_v60 }
 0x123   : > { %v3734_v4 = vpop.permute.xlu0 %1003  ;;  %v1591_v52 = vadd.f32 %v1559_v28, %v3708_v15 }
 0x125   : > { %v1627_v36 = vadd.f32 %v3493_v27, %v1591_v52 }
 0x126   : > { %1294 = vperm.xlu2 %2992, %v3738_v12  }
 0x127   : > { %1284 = vperm.xlu1 %2993, %v639_v19   ;;  %v1659_v10 = vmax.f32 %v1627_v36, 0.0 }
 0x128   : > { %v3741_v13 = vpop.permute.xlu2 %1023 }
 0x129   : > { %1073 = vperm.xlu0 %2991, %v672_v9   ;;  %v3744_v61 = vpop.permute.xlu1 %809 }
 0x12b   : > { %v1255_v43 = vpop.permute.xlu0 %1254 }
 0x12c   : > { %v1341_v41 = vmul.f32 %v3443_v6, %v1255_v43  ;;  %v643_v43 = vld [vmem:[#allocation2 + $0x1e0] sm:$0xff] }
 0x12e   : > { %v3746_v14 = vadd.f32 %v1341_v41, %v1147_v56  ;;  %1063 = vperm.xlu2 %2992, %v670_v38  }
 0x12f   : > { %879 = vperm.xlu1 %2993, %v640_v62  }
 0x130   : > { %v1220_v23 = vpop.permute.xlu2 %1219 }
 0x131   : > { %1269 = vperm.xlu0 %2991, %v636_v39   ;;  %v3752_v8 = vpop.permute.xlu1 %1013  ;;  %v1334_v32 = vmul.f32 %v3443_v6, %v1220_v23 }
 0x133   : > { %v3750_v22 = vpop.permute.xlu0 %829 }
 0x136   : > { %1500 = vperm.xlu2 %2992, %v669_v51   ;;  %v736_v51 = vld [vmem:[#allocation2 + $0x1c9] sm:$0xff] }
 0x137   : > { %1490 = vperm.xlu1 %2993, %v3664_v3  }
 0x138   : > { %v3759_v31 = vpop.permute.xlu2 %1229 }
 0x139   : > { %1520 = vperm.xlu0 %2991, %v735_v16   ;;  %v1431_v33 = vpop.permute.xlu1 %1430 }
 0x13a   : > { %v1557_v35 = vmul.f32 %v3457_v11, %v1431_v33 }
 0x13b   : > { %v3756_v29 = vpop.permute.xlu0 %1033 }
 0x13c   : > { %v1589_v30 = vadd.f32 %v1557_v35, %v3685_v18 }
 0x13e   : > { %1510 = vperm.xlu2 %2992, %v3693_v24   ;;  %v1625_v3 = vadd.f32 %v3493_v27, %v1589_v30 }
 0x13f   : > { %1279 = vperm.xlu1 %2993, %v638_v37  }
 0x140   : > { %v1657_v45 = vmax.f32 %v1625_v3, 0.0  ;;  %v1481_v57 = vpop.permute.xlu2 %1480 }
 0x141   : > { %1495 = vperm.xlu0 %2991, %v668_v44   ;;  %v3770_v15 = vpop.permute.xlu1 %839  ;;  %v912_v44 = vmul.f32 %v3431_v0, %v3726_v26  ;;  %v914_v26 = vmul.f32 %v3431_v0, %v3687_v17  ;;  %v1567_v41 = vmul.f32 %v3457_v11, %v1481_v57  ;;  %v3810_v57 = vld [vmem:[#allocation2 + $0x1e1] sm:$0xff] }
 0x142   : > { %v1685_v18 = vmax.f32 %v1657_v45, %v1659_v10 }
 0x143   : > { %v1451_v46 = vpop.permute.xlu0 %1450  ;;  %v1138_v2 = vadd.f32 %v1106_v25, %v912_v44  ;;  %v1599_v52 = vadd.f32 %v1567_v41, %v3746_v14  ;;  %v918_v25 = vmul.f32 %v3431_v0, %v3718_v54  ;;  %v1110_v41 = vmul.f32 %v3426_v63, %v3734_v4 }
 0x144   : > { %v1561_v55 = vmul.f32 %v3457_v11, %v1451_v46  ;;  %v1707_v21 = vrot.slane %v1685_v18, 1 }
 0x145   : > { %v1635_v45 = vadd.f32 %v3493_v27, %v1599_v52 }
 0x146   : > { %1299 = vperm.xlu2 %2992, %v3772_v50   ;;  %v1593_v59 = vadd.f32 %v1561_v55, %v3711_v49  ;;  %v1723_v20 = vmax.f32 %v1685_v18, %v1707_v21  ;;  %v1336_v21 = vmul.f32 %v3443_v6, %v3759_v31 }
 0x147   : > { %1289 = vperm.xlu1 %2993, %v640_v62   ;;  %v1140_v62 = vadd.f32 %v1108_v53, %v914_v26 }
 0x148   : > { %v1436_v47 = vpop.permute.xlu2 %1435  ;;  %v1771_v18 = vrot.slane %v1723_v20, 1  ;;  %v1787_v44 = vrot.slane %v1723_v20, 2 }
 0x149   : > { %1525 = vperm.xlu0 %2991, %v736_v51   ;;  %v1210_v19 = vpop.permute.xlu1 %1209  ;;  %v1558_v60 = vmul.f32 %v3457_v11, %v1436_v47  ;;  %v1366_v28 = vadd.f32 %v1334_v32, %v1140_v62  ;;  %v1112_v47 = vmul.f32 %v3426_v63, %v3752_v8  ;;  %v739_v32 = vld [vmem:[#allocation2 + $0x201] sm:$0xff] }
 0x14a   : > { %v1332_v56 = vmul.f32 %v3443_v6, %v1210_v19 }
 0x14b   : > { %v3775_v24 = vpop.permute.xlu0 %1239  ;;  %v1144_v54 = vadd.f32 %v1112_v47, %v918_v25  ;;  %v676_v47 = vld [vmem:[#allocation2 + $0x1e9] sm:$0xff] }
 0x14e   : > { %1515 = vperm.xlu2 %2992, %v672_v9   ;;  %v1364_v9 = vadd.f32 %v1332_v56, %v1138_v2  ;;  %v1667_v56 = vmax.f32 %v1635_v45, 0.0 }
 0x14f   : > { %1505 = vperm.xlu1 %2993, %v670_v38   ;;  %v1629_v38 = vadd.f32 %v3493_v27, %v1593_v59 }
 0x150   : > { %v3787_v58 = vpop.permute.xlu2 %1465  ;;  %v1590_v17 = vadd.f32 %v1558_v60, %v1364_v9  ;;  %v916_v60 = vmul.f32 %v3431_v0, %v3744_v61 }
 0x151   : > { %1078 = vperm.xlu0 %2991, %v735_v16   ;;  %v1461_v37 = vpop.permute.xlu1 %1460  ;;  %v1661_v33 = vmax.f32 %v1629_v38, 0.0  ;;  %v1564_v4 = vmul.f32 %v3457_v11, %v3787_v58 }
 0x152   : > { %v1563_v39 = vmul.f32 %v3457_v11, %v1461_v37  ;;  %v1626_v10 = vadd.f32 %v3493_v27, %v1590_v17  ;;  %v1142_v61 = vadd.f32 %v1110_v41, %v916_v60  ;;  %v3926_v41 = vld [vmem:[%s4664_s1 + $0x2] ss:$0 sm:$0xff] }
 0x153   : > { %v3785_v34 = vpop.permute.xlu0 %1249 }
 0x154   : > { %v1595_v49 = vadd.f32 %v1563_v39, %v3728_v42  ;;  %v1658_v48 = vmax.f32 %v1626_v10, 0.0 }
 0x156   : > { %894 = vperm.xlu2 %2992, %v643_v43   ;;  %v1631_v16 = vadd.f32 %v3493_v27, %v1595_v49 }
 0x157   : > { %884 = vperm.xlu1 %2993, %v3738_v12  }
 0x158   : > { %v1663_v35 = vmax.f32 %v1631_v16, 0.0  ;;  %v1039_v36 = vpop.permute.xlu2 %1038  ;;  %v1803_v16 = vrot.slane %v1723_v20, 3 }
 0x159   : > { %1314 = vperm.xlu0 %2991, %v707_v5   ;;  %v1471_v30 = vpop.permute.xlu1 %1470  ;;  %v1117_v8 = vmul.f32 %v3426_v63, %v1039_v36  ;;  %v1892_v5 = vsel %vm1889_vm4, %v1723_v20, %v1771_v18  ;;  %v922_v18 = vmul.f32 %v3431_v0, %v3770_v15  ;;  %v3904_v15 = vld [vmem:[#allocation3 + $0x20] sm:$0xff] }
 0x15a   : > { %v3804_v40 = vmax.f32 %v1661_v33, %v1663_v35  ;;  %v1565_v3 = vmul.f32 %v3457_v11, %v1471_v30  ;;  %v1901_v49 = vsel %vm1898_vm5, %v1892_v5, %v1787_v44 }
 0x15b   : > { %v1446_v23 = vpop.permute.xlu0 %1445  ;;  %v1910_v31 = vsel %vm1907_vm6, %v1901_v49, %v1803_v16  ;;  %v3935_v49 = vld [vmem:[%s4664_s1 + $0x3] ss:$0 sm:$0xff] }
 0x15c   : > { %v1560_v42 = vmul.f32 %v3457_v11, %v1446_v23  ;;  %v1597_v12 = vadd.f32 %v1565_v3, %v3730_v7  ;;  %v1979_v16 = vld [vmem:[#allocation3 + $0x1] sm:$0xff] }
 0x15e   : > { %v1592_v46 = vadd.f32 %v1560_v42, %v1366_v28  ;;  %1304 = vperm.xlu2 %2992, %v643_v43   ;;  %v1633_v19 = vadd.f32 %v3493_v27, %v1597_v12  ;;  %v1708_v28 = vrot.slane %v3804_v40, 1 }
 0x15f   : > { %1088 = vperm.xlu1 %2993, %v3810_v57  }
 0x160   : > { %v1628_v14 = vadd.f32 %v3493_v27, %v1592_v46  ;;  %v1665_v59 = vmax.f32 %v1633_v19, 0.0  ;;  %v3821_v2 = vpop.permute.xlu2 %1485  ;;  %v3871_v46 = vmax.f32 %v3804_v40, %v1708_v28 }
 0x161   : > { %1083 = vperm.xlu0 %2991, %v736_v51   ;;  %v1338_v51 = vmul.f32 %v3443_v6, %v3775_v24  ;;  %v3824_v53 = vpop.permute.xlu1 %1259  ;;  %v3832_v24 = vld [vmem:[#allocation2 + $0x1e8] sm:$0xff] }
 0x162   : > { %v1660_v55 = vmax.f32 %v1628_v14, 0.0  ;;  %v3828_v26 = vmax.f32 %v1665_v59, %v1667_v56  ;;  %v1772_v19 = vrot.slane %v3871_v46, 1  ;;  %v1788_v56 = vrot.slane %v3871_v46, 2 }
 0x163   : > { %v845_v7 = vpop.permute.xlu0 %844  ;;  %v1370_v38 = vadd.f32 %v1338_v51, %v1144_v54 }
 0x164   : > { %v1686_v37 = vmax.f32 %v1658_v48, %v1660_v55  ;;  %v923_v39 = vmul.f32 %v3431_v0, %v845_v7  ;;  %v1342_v48 = vmul.f32 %v3443_v6, %v3824_v53  ;;  %v3902_v0 = vld [vmem:[#allocation3 + $0x18] sm:$0xff]  ;;  %v3910_v6 = vld [vmem:[%s4664_s1] ss:$0 sm:$0xff]  ;;  %v1893_v53 = vsel %vm1889_vm4, %v3871_v46, %v1772_v19 }
 0x165   : > { %v1596_v33 = vadd.f32 %v1564_v4, %v1370_v38  ;;  %v1902_v38 = vsel %vm1898_vm5, %v1893_v53, %v1788_v56  ;;  %v1980_v4 = vld [vmem:[#allocation3 + $0x9] sm:$0xff] }
 0x166   : > { %v1739_v9 = vrot.slane %v1686_v37, 1  ;;  %v3834_v43 = vadd.f32 %v1117_v8, %v923_v39  ;;  %899 = vperm.xlu2 %2992, %v3832_v24   ;;  %v920_v8 = vmul.f32 %v3910_v6, %v3750_v22  ;;  %v2999_v39 = vpack.i.bf16 %v3904_v15, %v3902_v0 }
 0x167   : > { %889 = vperm.xlu1 %2993, %v3772_v50   ;;  %v1368_v50 = vadd.f32 %v1336_v21, %v1142_v61  ;;  %v1632_v45 = vadd.f32 %v3493_v27, %v1596_v33  ;;  %v1340_v22 = vmul.f32 %v3926_v41, %v3785_v34  ;;  %v1804_v21 = vrot.slane %v3871_v46, 3 }
 0x168   : > { %v1755_v62 = vmax.f32 %v1686_v37, %v1739_v9  ;;  %v3859_v58 = vpop.permute.xlu2 %1058  ;;  %v708_v37 = vld [vmem:[#allocation2 + $0x208] sm:$0xff]  ;;  %v1709_v34 = vrot.slane %v3828_v26, 1 }
 0x169   : > { %1540 = vperm.xlu0 %2991, %v739_v32   ;;  %v1456_v42 = vpop.permute.xlu1 %1455  ;;  %v1664_v25 = vmax.f32 %v1632_v45, 0.0  ;;  %v1911_v33 = vsel %vm1907_vm6, %v1902_v38, %v1804_v21  ;;  %v3960_v45 = vld [vmem:[%s4665_s2] ss:$0 sm:$0xff] }
 0x16a   : > { %v1827_v17 = vrot.slane %v1755_v62, 4  ;;  %v1843_v23 = vrot.slane %v1755_v62, 5  ;;  %v1859_v35 = vrot.slane %v1755_v62, 6  ;;  %v1875_v30 = vrot.slane %v1755_v62, 7 }
 0x16b   : > { %v1049_v52 = vpop.permute.xlu0 %1048  ;;  %v1562_v3 = vmul.f32 %v3457_v11, %v1456_v42  ;;  %v1116_v11 = vmul.f32 %v3426_v63, %v3756_v29 }
 0x16c   : > { %v1919_v36 = vsel %vm1916_vm7, %v1910_v31, %v1827_v17  ;;  %v3946_v31 = vld [vmem:[#allocation3 + $0x30] sm:$0xff] }
 0x16d   : > { %v1928_v20 = vsel %vm1925_vm8, %v1919_v36, %v1843_v23  ;;  %v1594_v14 = vadd.f32 %v1562_v3, %v1368_v50  ;;  %v1148_v44 = vadd.f32 %v1116_v11, %v922_v18  ;;  %v2994_v50 = vpack.i.bf16 %v1980_v4, %v1979_v16  ;;  %v740_v11 = vld [vmem:[#allocation2 + $0x209] sm:$0xff] }
 0x16e   : > { %v1937_v10 = vsel %vm1934_vm9, %v1928_v20, %v1859_v35  ;;  %1530 = vperm.xlu2 %2992, %v3810_v57   ;;  %v1725_v20 = vmax.f32 %v3828_v26, %v1709_v34 }
 0x16f   : > { %v1946_v12 = vsel %vm1943_vm10, %v1937_v10, %v1875_v30  ;;  %v1630_v40 = vadd.f32 %v3493_v27, %v1594_v14  ;;  %1093 = vperm.xlu1 %2993, %v676_v47   ;;  %v3899_v27 = vld [vmem:[%s4664_s1 + $0x1] ss:$0 sm:$0xff]  ;;  %v1374_v54 = vadd.f32 %v1342_v48, %v1148_v44  ;;  %s432_s1 = scalar_lea.vmem [#allocation6], %s431_s0 }
 0x170   : > { %1955 = vst.msk [vmem:[#allocation3 + $0x49] sm:$0xff] %vm485_vm2, %v1946_v12  ;;  %v3894_v29 = vpop.permute.xlu2 %1274  ;;  %v1119_v57 = vmul.f32 %v3899_v27, %v1049_v52  ;;  %v1114_v9 = vmul.f32 %v3899_v27, %v3741_v13  ;;  %v1568_v13 = vmul.f32 %v3935_v49, %v3821_v2  ;;  %v3948_v2 = vld [vmem:[#allocation3 + $0x38] sm:$0xff]  ;;  %v1773_v18 = vrot.slane %v1725_v20, 1 }
 0x171   : > { %1535 = vperm.xlu0 %2991, %v676_v47   ;;  %v1662_v63 = vmax.f32 %v1630_v40, 0.0  ;;  %v855_v7 = vpop.permute.xlu1 %854  ;;  %v3014_v10 = vpack.i.bf16 %v3948_v2, %v3946_v31  ;;  %v1789_v56 = vrot.slane %v1725_v20, 2 }
 0x172   : > { %v925_v59 = vmul.f32 %v3910_v6, %v855_v7  ;;  %v1146_v60 = vadd.f32 %v1114_v9, %v920_v8  ;;  %v1600_v17 = vadd.f32 %v1568_v13, %v1374_v54  ;;  %v1982_v7 = vld [vmem:[#allocation3 + $0x21] sm:$0xff]  ;;  %v1805_v54 = vrot.slane %v1725_v20, 3 }
 0x173   : > { %v3890_v55 = vpop.permute.xlu0 %864  ;;  %v1688_v51 = vmax.f32 %v1662_v63, %v1664_v25 }
 0x174   : > { %v3919_v32 = vadd.f32 %v1119_v57, %v925_v59  ;;  %v1372_v35 = vadd.f32 %v1340_v22, %v1146_v60  ;;  %v1636_v12 = vadd.f32 %v3960_v45, %v1600_v17  ;;  %v1981_v57 = vld [vmem:[#allocation3 + $0x19] sm:$0xff]  ;;  %v1894_v59 = vsel %vm1889_vm4, %v1725_v20, %v1773_v18  ;;  %v1983_v60 = vld [vmem:[#allocation3 + $0x31] sm:$0xff] }
 0x175   : > { %v1740_v5 = vrot.slane %v1688_v51, 1  ;;  %v3009_v53 = vpack.i.bf16 %v1982_v7, %v1981_v57  ;;  %v2018_v17 = vld [vmem:[#allocation3 + $0x39] sm:$0xff] }
 0x176   : > { %1319 = vperm.xlu2 %2992, %v708_v37   ;;  %v1668_v25 = vmax.f32 %v1636_v12, 0.0  ;;  %v1903_v37 = vsel %vm1898_vm5, %v1894_v59, %v1789_v56 }
 0x177   : > { %v1756_v62 = vmax.f32 %v1688_v51, %v1740_v5  ;;  %1309 = vperm.xlu1 %2993, %v3832_v24   ;;  %v2002_v7 = vld [vmem:[#allocation3 + $0x50] sm:$0xff] }
 0x178   : > { %v3944_v61 = vpop.permute.xlu2 %1043 }
 0x179   : > { %3000 = vrot.lane.b32.xlu0 %v2999_v39, %s4653_s15  ;;  %v1828_v23 = vrot.slane %v1756_v62, 4  ;;  %v1844_v52 = vrot.slane %v1756_v62, 5  ;;  %v1476_v36 = vpop.permute.xlu1 %1475  ;;  %v1860_v42 = vrot.slane %v1756_v62, 6  ;;  %v1876_v3 = vrot.slane %v1756_v62, 7 }
 0x17a   : > { %v1566_v30 = vmul.f32 %v3935_v49, %v1476_v36  ;;  %v1912_v62 = vsel %vm1907_vm6, %v1903_v37, %v1805_v54  ;;  %v3019_v36 = vpack.i.bf16 %v2018_v17, %v1983_v60 }
 0x17b   : > { %v3942_v28 = vpop.permute.xlu0 %1068  ;;  %v1920_v24 = vsel %vm1916_vm7, %v1911_v33, %v1828_v23 }
 0x17c   : > { %v1929_v46 = vsel %vm1925_vm8, %v1920_v24, %v1844_v52  ;;  %v1598_v47 = vadd.f32 %v1566_v30, %v1372_v35  ;;  %v1123_v59 = vmul.f32 %v3899_v27, %v3942_v28 }
 0x17d   : > { %v1938_v14 = vsel %vm1934_vm9, %v1929_v46, %v1860_v42  ;;  %v1988_v42 = vld [vmem:[#allocation3 + $0x69] sm:$0xff] }
 0x17e   : > { %v1947_v40 = vsel %vm1943_vm10, %v1938_v14, %v1876_v3  ;;  %2995 = vrot.lane.b32.xlu2 %v2994_v50, %s4655_s22  ;;  %v1634_v26 = vadd.f32 %v3960_v45, %v1598_v47  ;;  %v3039_v20 = vpack.i.bf16 %v1988_v42, %v2018_v17  ;;  %v3996_v3 = vld [vmem:[#allocation3 + $0x49] sm:$0xff] }
 0x17f   : > { %1956 = vst.msk [vmem:[#allocation3 + $0x61] sm:$0xff] %vm485_vm2, %v1947_v40  ;;  %1545 = vperm.xlu1 %2993, %v740_v11   ;;  %v2020_v11 = vld [vmem:[#allocation3 + $0x51] sm:$0xff]  ;;  %v2024_v40 = vld [vmem:[#allocation3 + $0x81] sm:$0xff] }
 0x180   : > { %v1666_v48 = vmax.f32 %v1634_v26, 0.0  ;;  %v3971_v63 = vpop.permute.xlu2 %1294 }
 0x181   : > { %3015 = vrot.lane.b32.xlu0 %v3014_v10, %s4653_s15  ;;  %v875_v44 = vpop.permute.xlu1 %874  ;;  %v3998_v10 = vld [vmem:[#allocation3 + $0x48] sm:$0xff] }
 0x182   : > { %v1690_v51 = vmax.f32 %v1666_v48, %v1668_v25  ;;  %v3054_v48 = vpack.i.bf16 %v2024_v40, %v2020_v11 }
 0x183   : > { %v3969_v19 = vpop.permute.xlu0 %849 }
 0x184   : > { %v1741_v8 = vrot.slane %v1690_v51, 1 }
 0x186   : > { %v1757_v39 = vmax.f32 %v1690_v51, %v1741_v8  ;;  %3010 = vrot.lane.b32.xlu2 %v3009_v53, %s4655_s22  ;;  %v3977_v5 = vld [vmem:[#allocation3 + $0x61] sm:$0xff]  ;;  %v927_v8 = vmul.f32 %v3910_v6, %v3890_v55  ;;  %v1349_v55 = vmul.f32 %v3926_v41, %v3971_v63 }
 0x187   : > { %3005 = vrot.lane.b32.xlu1 %v3009_v53, %s4651_s23  ;;  %v3024_v4 = vpack.i.bf16 %v3977_v5, %v1983_v60  ;;  %v1992_v53 = vld [vmem:[#allocation3 + $0x99] sm:$0xff] }
 0x188   : > { %v1829_v22 = vrot.slane %v1757_v39, 4  ;;  %v1845_v38 = vrot.slane %v1757_v39, 5  ;;  %v3981_v13 = vpop.permute.xlu2 %1063  ;;  %v1861_v34 = vrot.slane %v1757_v39, 6  ;;  %v1877_v23 = vrot.slane %v1757_v39, 7 }
 0x189   : > { %v1265_v21 = vpop.permute.xlu1 %1264  ;;  %v929_v39 = vmul.f32 %v3910_v6, %v875_v44 }
 0x18a   : > { %v1921_v16 = vsel %vm1916_vm7, %v1912_v62, %v1829_v22  ;;  %v1121_v22 = vmul.f32 %v3899_v27, %v3859_v58  ;;  %v1345_v62 = vmul.f32 %v3926_v41, %v3894_v29 }
 0x18b   : > { %v3979_v9 = vpop.permute.xlu0 %1053  ;;  %v1930_v52 = vsel %vm1925_vm8, %v1921_v16, %v1845_v38  ;;  %v1155_v60 = vadd.f32 %v1123_v59, %v929_v39 }
 0x18c   : > { %v1939_v33 = vsel %vm1934_vm9, %v1930_v52, %v1861_v34  ;;  %v1153_v16 = vadd.f32 %v1121_v22, %v927_v8  ;;  %v1377_v44 = vadd.f32 %v1345_v62, %v3919_v32  ;;  %v924_v22 = vmul.f32 %v3910_v6, %v3969_v19 }
 0x18d   : > { %v1948_v35 = vsel %vm1943_vm10, %v1939_v33, %v1877_v23  ;;  %v1381_v52 = vadd.f32 %v1349_v55, %v1155_v60  ;;  %v1118_v60 = vmul.f32 %v3899_v27, %v3944_v61 }
 0x18e   : > { %1957 = vst.msk [vmem:[#allocation3 + $0x79] sm:$0xff] %vm485_vm2, %v1948_v35  ;;  %3025 = vrot.lane.b32.xlu2 %v3024_v4, %s4655_s22  ;;  %v1343_v4 = vmul.f32 %v3926_v41, %v1265_v21 }
 0x18f   : > { %3020 = vrot.lane.b32.xlu1 %v3019_v36, %s4651_s23  ;;  %v1150_v19 = vadd.f32 %v1118_v60, %v924_v22  ;;  %v2316_v60 = vld [vmem:[%s4666_s3 + $0x60] sm:$0xff] }
 0x190   : > { %v1501_v50 = vpop.permute.xlu2 %1500  ;;  %v1375_v36 = vadd.f32 %v1343_v4, %v3834_v43 }
 0x191   : > { %v3994_v30 = vpop.permute.xlu1 %859  ;;  %v1571_v28 = vmul.f32 %v3935_v49, %v1501_v50 }
 0x193   : > { %v3992_v24 = vpop.permute.xlu0 %869  ;;  %v1603_v23 = vadd.f32 %v1571_v28, %v1377_v44 }
 0x195   : > { %v2023_v46 = vld [vmem:[#allocation3 + $0x79] sm:$0xff]  ;;  %v1639_v21 = vadd.f32 %v3960_v45, %v1603_v23 }
 0x196   : > { %v4000_v12 = vld [vmem:[#allocation3 + $0x78] sm:$0xff]  ;;  %3040 = vrot.lane.b32.xlu2 %v3039_v20, %s4655_s22  ;;  %v3034_v14 = vpack.i.bf16 %v2023_v46, %v3996_v3  ;;  %v2006_v57 = vld [vmem:[#allocation3 + $0x80] sm:$0xff]  ;;  %v3069_v34 = vpack.i.bf16 %v1992_v53, %v2023_v46  ;;  %v928_v53 = vmul.f32 %v3910_v6, %v3992_v24 }
 0x197   : > { %v3029_v47 = vpack.i.bf16 %v4000_v12, %v3998_v10  ;;  %v3044_v56 = vpack.i.bf16 %v2006_v57, %v2002_v7  ;;  %v1671_v40 = vmax.f32 %v1639_v21, 0.0 }
 0x198   : > { %v1511_v18 = vpop.permute.xlu2 %1510  ;;  %3035 = vrot.lane.b32.xlu1 %v3034_v14, %s4651_s23 }
 0x199   : > { %3030 = vrot.lane.b32.xlu0 %v3029_v47, %s4653_s15  ;;  %v1285_v25 = vpop.permute.xlu1 %1284  ;;  %v1573_v33 = vmul.f32 %v3935_v49, %v1511_v18 }
 0x19a   : > { %v1347_v38 = vmul.f32 %v3926_v41, %v1285_v25 }
 0x19b   : > { %v1074_v26 = vpop.permute.xlu0 %1073 }
 0x19c   : > { %v1379_v58 = vadd.f32 %v1347_v38, %v1153_v16  ;;  %v1124_v25 = vmul.f32 %v3899_v27, %v1074_v26  ;;  %v1122_v26 = vmul.f32 %v3899_v27, %v3981_v13 }
 0x19e   : > { %3055 = vrot.lane.b32.xlu2 %v3054_v48, %s4651_s23  ;;  %v1605_v50 = vadd.f32 %v1573_v33, %v1379_v58  ;;  %v1154_v24 = vadd.f32 %v1122_v26, %v928_v53  ;;  %s4667_s23 = smov 96  }
 0x1a0   : > { %v1300_v54 = vpop.permute.xlu2 %1299  ;;  %v1641_v47 = vadd.f32 %v3960_v45, %v1605_v50 }
 0x1a1   : > { %3045 = vrot.lane.b32.xlu0 %v3044_v56, %s4653_s15  ;;  %v880_v37 = vpop.permute.xlu1 %879  ;;  %v1350_v38 = vmul.f32 %v3926_v41, %v1300_v54  ;;  %v1120_v54 = vmul.f32 %v3899_v27, %v3979_v9 }
 0x1a2   : > { %v1673_v7 = vmax.f32 %v1641_v47, 0.0  ;;  %v930_v56 = vmul.f32 %v3910_v6, %v880_v37 }
 0x1a3   : > { %v1270_v51 = vpop.permute.xlu0 %1269 }
 0x1a4   : > { %v1156_v59 = vadd.f32 %v1124_v25, %v930_v56  ;;  %v1344_v55 = vmul.f32 %v3926_v41, %v1270_v51 }
 0x1a6   : > { %3070 = vrot.lane.b32.xlu2 %v3069_v34, %s4655_s22  ;;  %v1382_v34 = vadd.f32 %v1350_v38, %v1156_v59 }
 0x1a8   : > { %v1516_v32 = vpop.permute.xlu2 %1515 }
 0x1a9   : > { %v1491_v35 = vpop.permute.xlu1 %1490  ;;  %v1574_v13 = vmul.f32 %v3935_v49, %v1516_v32 }
 0x1aa   : > { %v1569_v42 = vmul.f32 %v3935_v49, %v1491_v35 }
 0x1ab   : > { %v1521_v17 = vpop.permute.xlu0 %1520 }
 0x1ac   : > { %v1575_v29 = vmul.f32 %v3935_v49, %v1521_v17  ;;  %v1601_v20 = vadd.f32 %v1569_v42, %v1375_v36 }
 0x1ae   : > { %v1607_v63 = vadd.f32 %v1575_v29, %v1381_v52  ;;  %v1637_v14 = vadd.f32 %v3960_v45, %v1601_v20  ;;  %v926_v52 = vmul.f32 %v3910_v6, %v3994_v30  ;;  %v1376_v29 = vadd.f32 %v1344_v55, %v1150_v19  ;;  %v2319_v30 = vld [vmem:[%s4666_s3 + $0x78] sm:$0xff] }
 0x1af   : > { %2324 = vmatpush.msra.mxu0 %v2319_v30  ;;  %2915 = vmatpush.msra.mxu2 %v2319_v30  ;;  %v2315_v19 = vld [vmem:[%s4666_s3 + $0x58] sm:$0xff] }
 0x1b0   : > { %v1643_v46 = vadd.f32 %v3960_v45, %v1607_v63  ;;  %v1669_v18 = vmax.f32 %v1637_v14, 0.0  ;;  %v4038_v39 = vpop.permute.xlu2 %894  ;;  %v1152_v42 = vadd.f32 %v1120_v54, %v926_v52  ;;  %2916 = vmatpush.msra.mxu3 %v2319_v30 }
 0x1b1   : > { %v1280_v43 = vpop.permute.xlu1 %1279 }
 0x1b2   : > { %v1675_v48 = vmax.f32 %v1643_v46, 0.0  ;;  %v1691_v57 = vmax.f32 %v1669_v18, %v1671_v40  ;;  %v1346_v51 = vmul.f32 %v3926_v41, %v1280_v43  ;;  %v2318_v46 = vld [vmem:[%s4666_s3 + $0x70] sm:$0xff] }
 0x1b3   : > { %v1496_v11 = vpop.permute.xlu0 %1495  ;;  %2325 = vmatpush.msra.mxu0 %v2318_v46  ;;  %2917 = vmatpush.msra.mxu2 %v2318_v46 }
 0x1b4   : > { %v1693_v8 = vmax.f32 %v1673_v7, %v1675_v48  ;;  %v1570_v61 = vmul.f32 %v3935_v49, %v1496_v11  ;;  %v1710_v35 = vrot.slane %v1691_v57, 1  ;;  %v1378_v14 = vadd.f32 %v1346_v51, %v1152_v42  ;;  %v2317_v7 = vld [vmem:[%s4666_s3 + $0x68] sm:$0xff]  ;;  %2918 = vmatpush.msra.mxu3 %v2318_v46 }
 0x1b5   : > { %2326 = vmatpush.msra.mxu0 %v2317_v7  ;;  %2919 = vmatpush.msra.mxu2 %v2317_v7 }
 0x1b6   : > { %v1711_v37 = vrot.slane %v1693_v8, 1  ;;  %v1602_v50 = vadd.f32 %v1570_v61, %v1376_v29  ;;  %v4070_v40 = vmax.f32 %v1691_v57, %v1710_v35  ;;  %2920 = vmatpush.msra.mxu3 %v2317_v7 }
 0x1b7   : > { %2327 = vmatpush.msra.mxu0 %v2316_v60  ;;  %2921 = vmatpush.msra.mxu2 %v2316_v60 }
 0x1b8   : > { %v1727_v17 = vmax.f32 %v1693_v8, %v1711_v37  ;;  %v4060_v9 = vpop.permute.xlu2 %1304  ;;  %v1638_v25 = vadd.f32 %v3960_v45, %v1602_v50  ;;  %v1774_v57 = vrot.slane %v4070_v40, 1  ;;  %2922 = vmatpush.msra.mxu3 %v2316_v60  ;;  %v1806_v42 = vrot.slane %v4070_v40, 3 }
 0x1b9   : > { %v1290_v28 = vpop.permute.xlu1 %1289  ;;  %2328 = vmatpush.msra.mxu0 %v2315_v19  ;;  %2923 = vmatpush.msra.mxu2 %v2315_v19 }
 0x1ba   : > { %v1348_v4 = vmul.f32 %v3926_v41, %v1290_v28  ;;  %v1775_v32 = vrot.slane %v1727_v17, 1  ;;  %v1791_v18 = vrot.slane %v1727_v17, 2  ;;  %v1670_v38 = vmax.f32 %v1638_v25, 0.0  ;;  %2924 = vmatpush.msra.mxu3 %v2315_v19 }
 0x1bb   : > { %v1526_v62 = vpop.permute.xlu0 %1525  ;;  %v1807_v37 = vrot.slane %v1727_v17, 3  ;;  %v1895_v54 = vsel %vm1889_vm4, %v4070_v40, %v1774_v57  ;;  %v933_v57 = vmul.f32 %v3910_v6, %v4038_v39  ;;  %v2308_v39 = vld [vmem:[%s4666_s3 + $0x20] sm:$0xff] }
 0x1bc   : > { %v1576_v16 = vmul.f32 %v3935_v49, %v1526_v62  ;;  %v1380_v58 = vadd.f32 %v1348_v4, %v1154_v24  ;;  %v1896_v56 = vsel %vm1889_vm4, %v1727_v17, %v1775_v32 }
 0x1bd   : > { %v1905_v22 = vsel %vm1898_vm5, %v1896_v56, %v1791_v18 }
 0x1be   : > { %v1608_v44 = vadd.f32 %v1576_v16, %v1382_v34  ;;  %v1606_v33 = vadd.f32 %v1574_v13, %v1380_v58  ;;  %v1790_v34 = vrot.slane %v4070_v40, 2  ;;  %v1914_v13 = vsel %vm1907_vm6, %v1905_v22, %v1807_v37  ;;  %v2310_v40 = vld [vmem:[%s4666_s3 + $0x30] sm:$0xff] }
 0x1c0   : > { %v1644_v23 = vadd.f32 %v3960_v45, %v1608_v44  ;;  %v1642_v63 = vadd.f32 %v3960_v45, %v1606_v33  ;;  %v4088_v16 = vpop.permute.xlu2 %899  ;;  %v2314_v44 = vld [vmem:[%s4666_s3 + $0x50] sm:$0xff]  ;;  %v1904_v51 = vsel %vm1898_vm5, %v1895_v54, %v1790_v34 }
 0x1c1   : > { %v1506_v20 = vpop.permute.xlu1 %1505  ;;  %2329 = vmatpush.msra.mxu0 %v2314_v44  ;;  %2925 = vmatpush.msra.mxu2 %v2314_v44  ;;  %v1913_v30 = vsel %vm1907_vm6, %v1904_v51, %v1806_v42 }
 0x1c2   : > { %v1676_v21 = vmax.f32 %v1644_v23, 0.0  ;;  %v1674_v47 = vmax.f32 %v1642_v63, 0.0  ;;  %v1572_v11 = vmul.f32 %v3935_v49, %v1506_v20  ;;  %v2313_v23 = vld [vmem:[%s4666_s3 + $0x48] sm:$0xff]  ;;  %2926 = vmatpush.msra.mxu3 %v2314_v44  ;;  %v2312_v20 = vld [vmem:[%s4666_s3 + $0x40] sm:$0xff] }
 0x1c3   : > { %v4058_v36 = vpop.permute.xlu0 %1078  ;;  %2330 = vmatpush.msra.mxu0 %v2313_v23  ;;  %2927 = vmatpush.msra.mxu2 %v2313_v23 }
 0x1c4   : > { %v1604_v43 = vadd.f32 %v1572_v11, %v1378_v14  ;;  %v1694_v48 = vmax.f32 %v1674_v47, %v1676_v21  ;;  %2928 = vmatpush.msra.mxu3 %v2313_v23  ;;  %v2311_v11 = vld [vmem:[%s4666_s3 + $0x38] sm:$0xff]  ;;  %v1125_v56 = vmul.f32 %v3899_v27, %v4058_v36 }
 0x1c5   : > { %2331 = vmatpush.msra.mxu0 %v2312_v20  ;;  %2929 = vmatpush.msra.mxu2 %v2312_v20 }
 0x1c6   : > { %v1640_v59 = vadd.f32 %v3960_v45, %v1604_v43  ;;  %v1743_v8 = vrot.slane %v1694_v48, 1  ;;  %2930 = vmatpush.msra.mxu3 %v2312_v20 }
 0x1c7   : > { %2332 = vmatpush.msra.mxu0 %v2311_v11  ;;  %2931 = vmatpush.msra.mxu2 %v2311_v11 }
 0x1c8   : > { %v1672_v62 = vmax.f32 %v1640_v59, 0.0  ;;  %v1759_v26 = vmax.f32 %v1694_v48, %v1743_v8  ;;  %v1531_v48 = vpop.permute.xlu2 %1530  ;;  %2932 = vmatpush.msra.mxu3 %v2311_v11  ;;  %v2309_v8 = vld [vmem:[%s4666_s3 + $0x28] sm:$0xff] }
 0x1c9   : > { %v4085_v28 = vpop.permute.xlu1 %884  ;;  %2333 = vmatpush.msra.mxu0 %v2310_v40  ;;  %2933 = vmatpush.msra.mxu2 %v2310_v40  ;;  %v1577_v23 = vmul.f32 %v3935_v49, %v1531_v48  ;;  %v4180_v48 = vld [vmem:[#allocation3 + $0xb1] sm:$0xff] }
 0x1ca   : > { %v1692_v24 = vmax.f32 %v1670_v38, %v1672_v62  ;;  %v1831_v55 = vrot.slane %v1759_v26, 4  ;;  %v1847_v4 = vrot.slane %v1759_v26, 5  ;;  %v1863_v61 = vrot.slane %v1759_v26, 6  ;;  %2934 = vmatpush.msra.mxu3 %v2310_v40  ;;  %v4136_v62 = vld [vmem:[#allocation3 + $0x60] sm:$0xff] }
 0x1cb   : > { %v4079_v53 = vpop.permute.xlu0 %1314  ;;  %v1879_v52 = vrot.slane %v1759_v26, 7  ;;  %v931_v22 = vmul.f32 %v3910_v6, %v4085_v28  ;;  %2334 = vmatpush.msra.mxu0 %v2309_v8  ;;  %2935 = vmatpush.msra.mxu2 %v2309_v8 }
 0x1cc   : > { %v1742_v58 = vrot.slane %v1692_v24, 1  ;;  %v1923_v17 = vsel %vm1916_vm7, %v1914_v13, %v1831_v55  ;;  %2936 = vmatpush.msra.mxu3 %v2309_v8  ;;  %v1353_v34 = vmul.f32 %v3926_v41, %v4079_v53  ;;  %v2307_v55 = vld [vmem:[%s4666_s3 + $0x18] sm:$0xff]  ;;  %v2306_v53 = vld [vmem:[%s4666_s3 + $0x10] sm:$0xff] }
 0x1cd   : > { %v1932_v29 = vsel %vm1925_vm8, %v1923_v17, %v1847_v4  ;;  %v1157_v37 = vadd.f32 %v1125_v56, %v931_v22  ;;  %2335 = vmatpush.msra.mxu0 %v2308_v39  ;;  %2937 = vmatpush.msra.mxu2 %v2308_v39  ;;  %v1351_v4 = vmul.f32 %v3926_v41, %v4060_v9  ;;  %v2305_v9 = vld [vmem:[%s4666_s3 + $0x8] sm:$0xff] }
 0x1ce   : > { %v1758_v33 = vmax.f32 %v1692_v24, %v1742_v58  ;;  %v1941_v35 = vsel %vm1934_vm9, %v1932_v29, %v1863_v61  ;;  %2938 = vmatpush.msra.mxu3 %v2308_v39 }
 0x1cf   : > { %v1950_v63 = vsel %vm1943_vm10, %v1941_v35, %v1879_v52  ;;  %2336 = vmatpush.msra.mxu0 %v2307_v55  ;;  %2939 = vmatpush.msra.mxu2 %v2307_v55  ;;  %v1383_v44 = vadd.f32 %v1351_v4, %v1157_v37 }
 0x1d0   : > { %v1830_v21 = vrot.slane %v1758_v33, 4  ;;  %v1846_v32 = vrot.slane %v1758_v33, 5  ;;  %1959 = vst.msk [vmem:[#allocation3 + $0xa9] sm:$0xff] %vm485_vm2, %v1950_v63  ;;  %v1862_v14 = vrot.slane %v1758_v33, 6  ;;  %v1878_v18 = vrot.slane %v1758_v33, 7  ;;  %2940 = vmatpush.msra.mxu3 %v2307_v55  ;;  %v1320_v61 = vpop.permute.xlu2 %1319 }
 0x1d1   : > { %v1089_v46 = vpop.permute.xlu1 %1088  ;;  %2337 = vmatpush.msra.mxu0 %v2306_v53  ;;  %2941 = vmatpush.msra.mxu2 %v2306_v53  ;;  %v1609_v33 = vadd.f32 %v1577_v23, %v1383_v44 }
 0x1d2   : > { %v1922_v47 = vsel %vm1916_vm7, %v1913_v30, %v1830_v21  ;;  %v1127_v59 = vmul.f32 %v3899_v27, %v1089_v46  ;;  %2942 = vmatpush.msra.mxu3 %v2306_v53 }
 0x1d3   : > { %v4108_v50 = vpop.permute.xlu0 %1083  ;;  %v1931_v25 = vsel %vm1925_vm8, %v1922_v47, %v1846_v32  ;;  %2338 = vmatpush.msra.mxu0 %v2305_v9  ;;  %2943 = vmatpush.msra.mxu2 %v2305_v9  ;;  %v1645_v63 = vadd.f32 %v3960_v45, %v1609_v33 }
 0x1d4   : > { %v1940_v43 = vsel %vm1934_vm9, %v1931_v25, %v1862_v14  ;;  %v1159_v28 = vadd.f32 %v1127_v59, %v933_v57  ;;  %2944 = vmatpush.msra.mxu3 %v2305_v9  ;;  %v1126_v21 = vmul.f32 %v3899_v27, %v4108_v50  ;;  %v1354_v57 = vmul.f32 %v3926_v41, %v1320_v61 }
 0x1d5   : > { %v1949_v7 = vsel %vm1943_vm10, %v1940_v43, %v1878_v18  ;;  %v1677_v14 = vmax.f32 %v1645_v63, 0.0 }
 0x1d6   : > { %1958 = vst.msk [vmem:[#allocation3 + $0x91] sm:$0xff] %vm485_vm2, %v1949_v7  ;;  %v1385_v54 = vadd.f32 %v1353_v34, %v1159_v28  ;;  %v1961_v34 = vld [vmem:[#allocation3] sm:$0xff] }
 0x1d7   : > { %v1993_v38 = vld [vmem:[#allocation3 + $0xa9] sm:$0xff] }
 0x1d8   : > { %v4138_v36 = vld [vmem:[#allocation3 + $0xa8] sm:$0xff]  ;;  %2079 = vrot.lane.b32.xlu2 %v1993_v38, %s4655_s22  ;;  %v2010_v58 = vld [vmem:[#allocation3 + $0xb0] sm:$0xff]  ;;  %v3064_v32 = vpack.i.bf16 %v3977_v5, %v1993_v38  ;;  %v2996_v30 = vpop.permute.xlu2 %2995  ;;  %v934_v5 = vmul.f32 %v3910_v6, %v4088_v16 }
 0x1d9   : > { %v3059_v26 = vpack.i.bf16 %v4136_v62, %v4138_v36  ;;  %v890_v24 = vpop.permute.xlu1 %889 }
 0x1da   : > { %v932_v46 = vmul.f32 %v3910_v6, %v890_v24  ;;  %v2997_v6 = vunpack.i.l.bf16 %v2996_v30 }
 0x1db   : > { %v1541_v60 = vpop.permute.xlu0 %1540  ;;  %3060 = vrot.lane.b32.xlu0 %v3059_v26, %s4653_s15 }
 0x1dc   : > { %v1579_v19 = vmul.f32 %v3935_v49, %v1541_v60  ;;  %v1158_v40 = vadd.f32 %v1126_v21, %v932_v46  ;;  %v2249_v53 = vsel %vm485_vm2, %v1961_v34, %v2997_v6 }
 0x1dd   : > { %v1991_v13 = vld [vmem:[#allocation3 + $0x91] sm:$0xff] }
 0x1de   : > { %v3049_v17 = vpack.i.bf16 %v3996_v3, %v1991_v13  ;;  %v1611_v52 = vadd.f32 %v1579_v19, %v1385_v54  ;;  %v4163_v29 = vld [vmem:[#allocation3 + $0x90] sm:$0xff]  ;;  %v2304_v3 = vld [vmem:[%s4666_s3] sm:$0xff]  ;;  %v3079_v59 = vpack.i.bf16 %v4180_v48, %v1991_v13  ;;  %s2836_s3 = scalar_lea.sflag [#allocation7], %s431_s0 }
 0x1df   : > { %v3074_v51 = vpack.i.bf16 %v2010_v58, %v4163_v29  ;;  %2339 = vmatpush.msra.mxu0 %v2304_v3  ;;  %2945 = vmatpush.msra.mxu2 %v2304_v3 }
 0x1e0   : > { %3050 = vrot.lane.b32.xlu1 %v3049_v17, %s4655_s22  ;;  %2946 = vmatpush.msra.mxu3 %v2304_v3  ;;  %v1647_v42 = vadd.f32 %v3960_v45, %v1611_v52  ;;  %v4189_v60 = vpop.permute.xlu2 %3010  ;;  %v2998_v17 = vunpack.i.h.bf16 %v2996_v30  ;;  %v1962_v52 = vld [vmem:[#allocation3 + $0x8] sm:$0xff] }
 0x1e1   : > { %v1094_v35 = vpop.permute.xlu1 %1093 }
 0x1e2   : > { %v1679_v20 = vmax.f32 %v1647_v42, 0.0  ;;  %v1128_v18 = vmul.f32 %v3899_v27, %v1094_v35 }
 0x1e3   : > { %3075 = vrot.lane.b32.xlu0 %v3074_v51, %s4653_s15  ;;  %v1536_v11 = vpop.permute.xlu0 %1535 }
 0x1e4   : > { %v1695_v43 = vmax.f32 %v1677_v14, %v1679_v20  ;;  %v1578_v7 = vmul.f32 %v3935_v49, %v1536_v11  ;;  %v1160_v56 = vadd.f32 %v1128_v18, %v934_v5 }
 0x1e6   : > { %v1712_v8 = vrot.slane %v1695_v43, 1  ;;  %v1386_v38 = vadd.f32 %v1354_v57, %v1160_v56 }
 0x1e8   : > { %3065 = vrot.lane.b32.xlu1 %v3064_v32, %s4667_s23  ;;  %v1728_v39 = vmax.f32 %v1695_v43, %v1712_v8  ;;  %v2250_v32 = vsel %vm485_vm2, %v1962_v52, %v2998_v17 }
 0x1e9   : > { %v1310_v47 = vpop.permute.xlu1 %1309 }
 0x1ea   : > { %v1352_v25 = vmul.f32 %v3926_v41, %v1310_v47  ;;  %v1776_v55 = vrot.slane %v1728_v39, 1  ;;  %v1808_v33 = vrot.slane %v1728_v39, 3 }
 0x1eb   : > { %v3001_v28 = vpop.permute.xlu0 %3000 }
 0x1ec   : > { %v1384_v50 = vadd.f32 %v1352_v25, %v1158_v40  ;;  %v3002_v41 = vunpack.i.l.bf16 %v3001_v28  ;;  %v1897_v58 = vsel %vm1889_vm4, %v1728_v39, %v1776_v55  ;;  %v3003_v35 = vunpack.i.h.bf16 %v3001_v28 }
 0x1ee   : > { %v1610_v22 = vadd.f32 %v1578_v7, %v1384_v50  ;;  %v2267_v61 = vsel %vm532_vm11, %v2249_v53, %v3002_v41  ;;  %v2268_v18 = vsel %vm532_vm11, %v2250_v32, %v3003_v35  ;;  %v3012_v50 = vunpack.i.l.bf16 %v4189_v60 }
 0x1f0   : > { %3080 = vrot.lane.b32.xlu1 %v3079_v59, %s4667_s23  ;;  %v1646_v16 = vadd.f32 %v3960_v45, %v1610_v22 }
 0x1f1   : > { %v1546_v27 = vpop.permute.xlu1 %1545 }
 0x1f2   : > { %v1580_v26 = vmul.f32 %v3935_v49, %v1546_v27  ;;  %v1678_v4 = vmax.f32 %v1646_v16, 0.0  ;;  %v1792_v49 = vrot.slane %v1728_v39, 2  ;;  %v2251_v27 = vsel %vm485_vm2, %v3902_v0, %v3012_v50 }
 0x1f3   : > { %v3016_v47 = vpop.permute.xlu0 %3015 }
 0x1f4   : > { %v1612_v37 = vadd.f32 %v1580_v26, %v1386_v38  ;;  %v1906_v51 = vsel %vm1898_vm5, %v1897_v58, %v1792_v49  ;;  %v3017_v56 = vunpack.i.l.bf16 %v3016_v47  ;;  %v3018_v55 = vunpack.i.h.bf16 %v3016_v47 }
 0x1f5   : > { %v1915_v20 = vsel %vm1907_vm6, %v1906_v51, %v1808_v33 }
 0x1f6   : > { %v1648_v24 = vadd.f32 %v3960_v45, %v1612_v37  ;;  %v4197_v45 = vpop.permute.xlu2 %3025  ;;  %v2269_v39 = vsel %vm532_vm11, %v2251_v27, %v3017_v56  ;;  %v4257_v27 = vld [vmem:[#allocation3 + $0x98] sm:$0xff] }
 0x1f7   : > { %v3028_v59 = vunpack.i.h.bf16 %v4197_v45 }
 0x1f8   : > { %v1680_v19 = vmax.f32 %v1648_v24, 0.0  ;;  %v3013_v24 = vunpack.i.h.bf16 %v4189_v60 }
 0x1f9   : > { %v3006_v44 = vpop.permute.xlu1 %3005  ;;  %v2257_v16 = vsel %vm485_vm2, %v4136_v62, %v3028_v59 }
 0x1fa   : > { %v1696_v54 = vmax.f32 %v1678_v4, %v1680_v19  ;;  %v3007_v13 = vunpack.i.l.bf16 %v3006_v44  ;;  %v3008_v21 = vunpack.i.h.bf16 %v3006_v44  ;;  %v2252_v44 = vsel %vm485_vm2, %v3904_v15, %v3013_v24 }
 0x1fb   : > { %v2270_v60 = vsel %vm532_vm11, %v2252_v44, %v3018_v55  ;;  %v4284_v44 = vld [vmem:[%s4641_s4] ss:$0 sm:$0xff] }
 0x1fc   : > { %v1744_v9 = vrot.slane %v1696_v54, 1  ;;  %v2286_v23 = vsel %vm2285_vm14, %v2267_v61, %v3007_v13  ;;  %v2287_v43 = vsel %vm2285_vm14, %v2268_v18, %v3008_v21  ;;  %v3027_v13 = vunpack.i.l.bf16 %v4197_v45 }
 0x1fd   : > { %2340 = vmatmul.f32.vlgmr.msra.gmra.mxu0 %v2286_v23 }
 0x1fe   : > { %v1760_v3 = vmax.f32 %v1696_v54, %v1744_v9  ;;  %v3041_v7 = vpop.permute.xlu2 %3040  ;;  %v4231_v54 = vld [vmem:[#allocation3 + $0x68] sm:$0xff]  ;;  %v2253_v52 = vsel %vm485_vm2, %v3946_v31, %v3027_v13 }
 0x1ff   : > { %v3043_v62 = vunpack.i.h.bf16 %v3041_v7 }
 0x200   : > { %v1832_v42 = vrot.slane %v1760_v3, 4  ;;  %v1848_v63 = vrot.slane %v1760_v3, 5  ;;  %v1864_v46 = vrot.slane %v1760_v3, 6  ;;  %v1880_v11 = vrot.slane %v1760_v3, 7 }
 0x201   : > { %v3021_v30 = vpop.permute.xlu1 %3020  ;;  %v2258_v61 = vsel %vm485_vm2, %v4231_v54, %v3043_v62  ;;  %v3042_v3 = vunpack.i.l.bf16 %v3041_v7 }
 0x202   : > { %v1924_v14 = vsel %vm1916_vm7, %v1915_v20, %v1832_v42  ;;  %v3022_v8 = vunpack.i.l.bf16 %v3021_v30  ;;  %v3023_v41 = vunpack.i.h.bf16 %v3021_v30 }
 0x203   : > { %v1933_v40 = vsel %vm1925_vm8, %v1924_v14, %v1848_v63  ;;  %v2254_v42 = vsel %vm485_vm2, %v3948_v2, %v3042_v3 }
 0x204   : > { %v1942_v25 = vsel %vm1934_vm9, %v1933_v40, %v1864_v46  ;;  %v2288_v6 = vsel %vm2285_vm14, %v2269_v39, %v3022_v8  ;;  %v2289_v58 = vsel %vm2285_vm14, %v2270_v60, %v3023_v41 }
 0x205   : > { %v1951_v5 = vsel %vm1943_vm10, %v1942_v25, %v1880_v11  ;;  %2343 = vmatmul.f32.gmra.mxu0 %v2287_v43 }
 0x206   : > { %1960 = vst.msk [vmem:[#allocation3 + $0xc1] sm:$0xff] %vm485_vm2, %v1951_v5  ;;  %v3056_v4 = vpop.permute.xlu2 %3055 }
 0x207   : > { %v3058_v19 = vunpack.i.h.bf16 %v3056_v4  ;;  %v3057_v35 = vunpack.i.l.bf16 %v3056_v4 }
 0x20a   : > { %v3036_v22 = vpop.permute.xlu1 %3035 }
 0x20b   : > { %v3031_v57 = vpop.permute.xlu0 %3030  ;;  %v3038_v26 = vunpack.i.h.bf16 %v3036_v22  ;;  %v3037_v15 = vunpack.i.l.bf16 %v3036_v22 }
 0x20c   : > { %v3033_v38 = vunpack.i.h.bf16 %v3031_v57  ;;  %v3032_v17 = vunpack.i.l.bf16 %v3031_v57 }
 0x20d   : > { %2345 = vmatmul.f32.gmra.mxu0 %v2288_v6  ;;  %v4217_v37 = vld [vmem:[#allocation3 + $0xc1] sm:$0xff] }
 0x20e   : > { %v4219_v28 = vld [vmem:[#allocation3 + $0xc0] sm:$0xff]  ;;  %v2275_v34 = vsel %vm532_vm11, %v2257_v16, %v3033_v38  ;;  %2223 = vrot.lane.b32.xlu1 %v4217_v37, %s4667_s23  ;;  %v2271_v51 = vsel %vm532_vm11, %v2253_v52, %v3032_v17  ;;  %v3071_v18 = vpop.permute.xlu2 %3070 }
 0x20f   : > { %2151 = vrot.lane.b32.xlu0 %v4219_v28, %s4653_s15  ;;  %v2294_v0 = vsel %vm2285_vm14, %v2275_v34, %v3038_v26  ;;  %v2290_v45 = vsel %vm2285_vm14, %v2271_v51, %v3037_v15  ;;  %v3072_v59 = vunpack.i.l.bf16 %v3071_v18 }
 0x210   : > { %2360 = vmatmul.f32.vlgmr.msra.gmra.mxu2 %v2294_v0 }
 0x211   : > { %v2259_v22 = vsel %vm485_vm2, %v4000_v12, %v3072_v59  ;;  %v2562_v59 = vld [vmem:[%s4642_s5 + $0x48] sm:$0xff] }
 0x213   : > { %v3046_v53 = vpop.permute.xlu0 %3045 }
 0x214   : > { %v3048_v49 = vunpack.i.h.bf16 %v3046_v53  ;;  %v3047_v33 = vunpack.i.l.bf16 %v3046_v53 }
 0x215   : > { %2348 = vmatmul.f32.gmra.mxu0 %v2289_v58 }
 0x216   : > { %v2276_v9 = vsel %vm532_vm11, %v2258_v61, %v3048_v49  ;;  %v2272_v63 = vsel %vm532_vm11, %v2254_v42, %v3047_v33 }
 0x217   : > { %v2295_v23 = vsel %vm2285_vm14, %v2276_v9, %v3058_v19  ;;  %v2291_v21 = vsel %vm2285_vm14, %v2272_v63, %v3057_v35  ;;  %v2463_v63 = vld [vmem:[#allocation4 + $0x1] sm:$0xff] }
 0x218   : > { %2363 = vmatmul.f32.gmra.mxu2 %v2295_v23 }
 0x21d   : > { %2350 = vmatmul.f32.gmra.mxu0 %v2290_v45 }
 0x225   : > { %2353 = vmatmul.f32.gmra.mxu0 %v2291_v21 }
 0x232   : > { %v2080_v0 = vpop.permute.xlu2 %2079 }
 0x233   : > { %v2263_v55 = vsel %vm485_vm2, %v4138_v36, %v2080_v0 }
 0x24d   : > { %v3061_v20 = vpop.permute.xlu0 %3060 }
 0x24e   : > { %v3063_v46 = vunpack.i.h.bf16 %v3061_v20  ;;  %v3062_v14 = vunpack.i.l.bf16 %v3061_v20 }
 0x252   : > { %v3051_v32 = vpop.permute.xlu1 %3050 }
 0x253   : > { %v3053_v30 = vunpack.i.h.bf16 %v3051_v32  ;;  %v3052_v31 = vunpack.i.l.bf16 %v3051_v32 }
 0x255   : > { %v2255_v47 = vsel %vm485_vm2, %v3998_v10, %v3053_v30  ;;  %v2261_v11 = vsel %vm485_vm2, %v4163_v29, %v3052_v31  ;;  %v3076_v50 = vpop.permute.xlu0 %3075  ;;  %v3073_v10 = vunpack.i.h.bf16 %v3071_v18  ;;  %v2568_v31 = vld [vmem:[%s4642_s5 + $0x78] sm:$0xff]  ;;  %v2565_v18 = vld [vmem:[%s4642_s5 + $0x60] sm:$0xff] }
 0x256   : > { %v2273_v43 = vsel %vm532_vm11, %v2255_v47, %v3063_v46  ;;  %v2279_v5 = vsel %vm532_vm11, %v2261_v11, %v3062_v14  ;;  %v3078_v8 = vunpack.i.h.bf16 %v3076_v50  ;;  %v3077_v57 = vunpack.i.l.bf16 %v3076_v50  ;;  %v2567_v46 = vld [vmem:[%s4642_s5 + $0x70] sm:$0xff]  ;;  %2573 = vmatpush.msra.mxu1 %v2568_v31  ;;  %v2566_v11 = vld [vmem:[%s4642_s5 + $0x68] sm:$0xff] }
 0x257   : > { %v2262_v39 = vsel %vm485_vm2, %v4257_v27, %v3073_v10 }
 0x258   : > { %v2277_v6 = vsel %vm532_vm11, %v2259_v22, %v3077_v57  ;;  %v2280_v16 = vsel %vm532_vm11, %v2262_v39, %v3078_v8  ;;  %2574 = vmatpush.msra.mxu1 %v2567_v46 }
 0x25a   : > { %v3066_v40 = vpop.permute.xlu1 %3065  ;;  %2575 = vmatpush.msra.mxu1 %v2566_v11 }
 0x25b   : > { %v3068_v2 = vunpack.i.h.bf16 %v3066_v40  ;;  %v3067_v25 = vunpack.i.l.bf16 %v3066_v40 }
 0x25c   : > { %2576 = vmatpush.msra.mxu1 %v2565_v18 }
 0x25d   : > { %v2292_v7 = vsel %vm2285_vm14, %v2273_v43, %v3068_v2  ;;  %v2298_v56 = vsel %vm2285_vm14, %v2279_v5, %v3067_v25  ;;  %v2564_v43 = vld [vmem:[%s4642_s5 + $0x58] sm:$0xff] }
 0x25e   : > { %2355 = vmatmul.f32.gmra.mxu0 %v2292_v7  ;;  %2370 = vmatmul.f32.vlgmr.msra.gmra.mxu3 %v2298_v56  ;;  %v2563_v56 = vld [vmem:[%s4642_s5 + $0x50] sm:$0xff] }
 0x25f   : > { %2577 = vmatpush.msra.mxu1 %v2564_v43 }
 0x261   : > { %2578 = vmatpush.msra.mxu1 %v2563_v56 }
 0x262   : > { %v3081_v29 = vpop.permute.xlu1 %3080 }
 0x263   : > { %v3083_v38 = vunpack.i.h.bf16 %v3081_v29  ;;  %v3082_v26 = vunpack.i.l.bf16 %v3081_v29  ;;  %2579 = vmatpush.msra.mxu1 %v2562_v59  ;;  %v1990_v59 = vld [vmem:[#allocation3 + $0x81] sm:$0xff] }
 0x265   : > { %v2296_v34 = vsel %vm2285_vm14, %v2277_v6, %v3082_v26  ;;  %v2299_v24 = vsel %vm2285_vm14, %v2280_v16, %v3083_v38 }
 0x266   : > { %2365 = vmatmul.f32.gmra.mxu2 %v2296_v34  ;;  %2373 = vmatmul.f32.gmra.mxu3 %v2299_v24  ;;  %v2561_v24 = vld [vmem:[%s4642_s5 + $0x40] sm:$0xff] }
 0x267   : > { %2580 = vmatpush.msra.mxu1 %v2561_v24 }
 0x27a   : > { %v2341_v12 = vpop.f32.mrf.mxu0 }
 0x27b   : > { %v2342_v1 = vadd.f32 %v4284_v44, %v2341_v12 }
 0x27d   : > { %v2385_v13 = vmax.f32 %v2342_v1, 0.0 }
 0x280   : > { %v2224_v41 = vpop.permute.xlu1 %2223 }
 0x281   : > { %v2152_v62 = vpop.permute.xlu0 %2151 }
 0x282   : > { %v2281_v4 = vsel %vm532_vm11, %v2263_v55, %v2152_v62  ;;  %v2344_v19 = vpop.f32.mrf.mxu0  ;;  %v2560_v55 = vld [vmem:[%s4642_s5 + $0x38] sm:$0xff] }
 0x283   : > { %v2300_v53 = vsel %vm2285_vm14, %v2281_v4, %v2224_v41  ;;  %2581 = vmatpush.msra.mxu1 %v2560_v55  ;;  %v2559_v41 = vld [vmem:[%s4642_s5 + $0x30] sm:$0xff]  ;;  %v2558_v19 = vld [vmem:[%s4642_s5 + $0x28] sm:$0xff] }
 0x284   : > { %2375 = vmatmul.f32.gmra.mxu3 %v2300_v53 }
 0x285   : > { %2582 = vmatpush.msra.mxu1 %v2559_v41 }
 0x287   : > { %2583 = vmatpush.msra.mxu1 %v2558_v19 }
 0x28a   : > { %v2346_v49 = vpop.f32.mrf.mxu0 }
 0x28b   : > { %v2347_v60 = vadd.f32 %v4284_v44, %v2346_v49 }
 0x28d   : > { %v2386_v36 = vmax.f32 %v2347_v60, 0.0  ;;  %v2557_v60 = vld [vmem:[%s4642_s5 + $0x20] sm:$0xff] }
 0x28e   : > { %2584 = vmatpush.msra.mxu1 %v2557_v60 }
 0x28f   : > { %v2393_v58 = vmax.f32 %v2385_v13, %v2386_v36 }
 0x291   : > { %v2401_v61 = vrot.slane %v2393_v58, 1 }
 0x292   : > { %v2349_v17 = vpop.f32.mrf.mxu0 }
 0x293   : > { %v2361_v9 = vpop.f32.mrf.mxu2  ;;  %v2409_v23 = vmax.f32 %v2393_v58, %v2401_v61  ;;  %v2556_v58 = vld [vmem:[%s4642_s5 + $0x18] sm:$0xff] }
 0x294   : > { %v2362_v29 = vadd.f32 %v4284_v44, %v2361_v9  ;;  %2585 = vmatpush.msra.mxu1 %v2556_v58  ;;  %v2555_v9 = vld [vmem:[%s4642_s5 + $0x10] sm:$0xff] }
 0x295   : > { %v2417_v15 = vrot.slane %v2409_v23, 1  ;;  %v2425_v52 = vrot.slane %v2409_v23, 2  ;;  %v2433_v51 = vrot.slane %v2409_v23, 3 }
 0x296   : > { %v2389_v12 = vmax.f32 %v2362_v29, 0.0  ;;  %2586 = vmatpush.msra.mxu1 %v2555_v9  ;;  %v2472_v29 = vld [vmem:[#allocation4 + $0x50] sm:$0xff] }
 0x297   : > { %v2441_v3 = vsel %vm1889_vm4, %v2409_v23, %v2417_v15  ;;  %v2554_v15 = vld [vmem:[%s4642_s5 + $0x8] sm:$0xff] }
 0x298   : > { %v2445_v45 = vsel %vm1898_vm5, %v2441_v3, %v2425_v52  ;;  %2587 = vmatpush.msra.mxu1 %v2554_v15 }
 0x299   : > { %v2449_v33 = vsel %vm1907_vm6, %v2445_v45, %v2433_v51  ;;  %v2553_v51 = vld [vmem:[%s4642_s5] sm:$0xff] }
 0x29a   : > { %2454 = vst.msk [vmem:[#allocation4 + $0x11] sm:$0xf] %vm525_vm15, %v2449_v33  ;;  %v2351_v35 = vpop.f32.mrf.mxu0  ;;  %2588 = vmatpush.msra.mxu1 %v2553_v51 }
 0x29b   : > { %v2364_v42 = vpop.f32.mrf.mxu2  ;;  %v2352_v14 = vadd.f32 %v4284_v44, %v2351_v35 }
 0x29d   : > { %v2387_v2 = vmax.f32 %v2352_v14, 0.0 }
 0x2a1   : > { %v2473_v21 = vld [vmem:[#allocation4 + $0x11] sm:$0xff] }
 0x2a2   : > { %v4292_v32 = vld [vmem:[#allocation4 + $0x10] sm:$0xff]  ;;  %v2354_v20 = vpop.f32.mrf.mxu0  ;;  %2523 = vrot.lane.b32.xlu1 %v2473_v21, %s4667_s23  ;;  %v3084_v30 = vpack.i.bf16 %v2473_v21, %v2463_v63 }
 0x2a3   : > { %2503 = vrot.lane.b32.xlu0 %v4292_v32, %s4653_s15 }
 0x2a4   : > { %3085 = vrot.lane.b32.xlu2 %v3084_v30, %s4655_s22 }
 0x2db   : > { %v2356_v47 = vpop.f32.mrf.mxu0 }
 0x2dc   : > { %v2357_v40 = vadd.f32 %v4284_v44, %v2356_v47 }
 0x2de   : > { %v2388_v25 = vmax.f32 %v2357_v40, 0.0  ;;  %v2458_v40 = vld [vmem:[#allocation4] sm:$0xff] }
 0x2e0   : > { %v2394_v5 = vmax.f32 %v2387_v2, %v2388_v25 }
 0x2e1   : > { %v2371_v50 = vpop.f32.mrf.mxu3 }
 0x2e2   : > { %v2402_v7 = vrot.slane %v2394_v5, 1  ;;  %v2372_v33 = vadd.f32 %v4284_v44, %v2371_v50 }
 0x2e4   : > { %v2410_v10 = vmax.f32 %v2394_v5, %v2402_v7  ;;  %v2391_v63 = vmax.f32 %v2372_v33, 0.0 }
 0x2e6   : > { %v2418_v8 = vrot.slane %v2410_v10, 1  ;;  %v2426_v57 = vrot.slane %v2410_v10, 2  ;;  %v2434_v22 = vrot.slane %v2410_v10, 3 }
 0x2e8   : > { %v2442_v38 = vsel %vm1889_vm4, %v2410_v10, %v2418_v8 }
 0x2e9   : > { %v2446_v26 = vsel %vm1898_vm5, %v2442_v38, %v2426_v57  ;;  %v2366_v39 = vpop.f32.mrf.mxu2  ;;  %v2374_v6 = vpop.f32.mrf.mxu3  ;;  %v2026_v38 = vld [vmem:[#allocation3 + $0x99] sm:$0xff] }
 0x2ea   : > { %v2450_v16 = vsel %vm1907_vm6, %v2446_v26, %v2434_v22  ;;  %v2367_v34 = vadd.f32 %v4284_v44, %v2366_v39  ;;  %v2633_v22 = vld [vmem:[#allocation5 + $0x1] sm:$0xff]  ;;  %v2477_v39 = vld [vmem:[#allocation4 + $0x51] sm:$0xff] }
 0x2eb   : > { %2455 = vst.msk [vmem:[#allocation4 + $0x21] sm:$0xf] %vm525_vm15, %v2450_v16  ;;  %v3094_v26 = vpack.i.bf16 %v2633_v22, %v2472_v29 }
 0x2ec   : > { %v2390_v0 = vmax.f32 %v2367_v34, 0.0 }
 0x2ee   : > { %v2395_v62 = vmax.f32 %v2389_v12, %v2390_v0 }
 0x2f0   : > { %v2403_v4 = vrot.slane %v2395_v62, 1 }
 0x2f2   : > { %v2411_v53 = vmax.f32 %v2395_v62, %v2403_v4  ;;  %v2465_v1 = vld [vmem:[#allocation4 + $0x21] sm:$0xff] }
 0x2f3   : > { %v4339_v49 = vld [vmem:[#allocation4 + $0x20] sm:$0xff]  ;;  %2487 = vrot.lane.b32.xlu1 %v2465_v1, %s4668_s30  ;;  %2525 = vrot.lane.b32.xlu0 %v2465_v1, %s4667_s23 }
 0x2f4   : > { %v2419_v13 = vrot.slane %v2411_v53, 1  ;;  %v2427_v36 = vrot.slane %v2411_v53, 2  ;;  %2505 = vrot.lane.b32.xlu2 %v4339_v49, %s4669_s16  ;;  %v2435_v61 = vrot.slane %v2411_v53, 3 }
 0x2f6   : > { %v2443_v17 = vsel %vm1889_vm4, %v2411_v53, %v2419_v13 }
 0x2f7   : > { %v2447_v23 = vsel %vm1898_vm5, %v2443_v17, %v2427_v36  ;;  %v1972_v17 = vld [vmem:[#allocation3 + $0x80] sm:$0xff] }
 0x2f8   : > { %v2451_v52 = vsel %vm1907_vm6, %v2447_v23, %v2435_v61 }
 0x2f9   : > { %2456 = vst.msk [vmem:[#allocation4 + $0x31] sm:$0xf] %vm525_vm15, %v2451_v52 }
 0x2fe   : > { %v3086_v30 = vpop.permute.xlu2 %3085 }
 0x2ff   : > { %v3087_v14 = vunpack.i.l.bf16 %v3086_v30  ;;  %v3088_v6 = vunpack.i.h.bf16 %v3086_v30 }
 0x300   : > { %v2466_v3 = vld [vmem:[#allocation4 + $0x31] sm:$0xff] }
 0x301   : > { %v2470_v45 = vld [vmem:[#allocation4 + $0x30] sm:$0xff]  ;;  %2489 = vrot.lane.b32.xlu1 %v2466_v3, %s4668_s30  ;;  %2527 = vrot.lane.b32.xlu0 %v2466_v3, %s4667_s23  ;;  %v2538_v50 = vsel %vm485_vm2, %v2458_v40, %v3087_v14  ;;  %v2539_v34 = vsel %vm485_vm2, %v4292_v32, %v3088_v6 }
 0x302   : > { %2507 = vrot.lane.b32.xlu2 %v2470_v45, %s4669_s16 }
 0x307   : > { %v2376_v35 = vpop.f32.mrf.mxu3 }
 0x308   : > { %v2377_v42 = vadd.f32 %v4284_v44, %v2376_v35 }
 0x30a   : > { %v2392_v21 = vmax.f32 %v2377_v42, 0.0 }
 0x30c   : > { %v2396_v20 = vmax.f32 %v2391_v63, %v2392_v21 }
 0x30e   : > { %v2404_v31 = vrot.slane %v2396_v20, 1 }
 0x310   : > { %v2412_v46 = vmax.f32 %v2396_v20, %v2404_v31  ;;  %v3115_v20 = vld [vmem:[%s4643_s6] ss:$0 sm:$0xff] }
 0x312   : > { %v2420_v47 = vrot.slane %v2412_v46, 1  ;;  %v2428_v11 = vrot.slane %v2412_v46, 2  ;;  %v2436_v18 = vrot.slane %v2412_v46, 3 }
 0x314   : > { %v2444_v2 = vsel %vm1889_vm4, %v2412_v46, %v2420_v47  ;;  %v2524_v43 = vpop.permute.xlu1 %2523 }
 0x315   : > { %v2448_v25 = vsel %vm1898_vm5, %v2444_v2, %v2428_v11  ;;  %v2504_v5 = vpop.permute.xlu0 %2503 }
 0x316   : > { %v2452_v44 = vsel %vm1907_vm6, %v2448_v25, %v2436_v18  ;;  %v2543_v7 = vsel %vm532_vm11, %v2538_v50, %v2504_v5 }
 0x317   : > { %2457 = vst.msk [vmem:[#allocation4 + $0x41] sm:$0xf] %vm525_vm15, %v2452_v44  ;;  %v2548_v56 = vsel %vm2285_vm14, %v2543_v7, %v2524_v43 }
 0x318   : > { %2589 = vmatmul.f32.vlgmr.msra.gmra.mxu1 %v2548_v56 }
 0x31e   : > { %v2476_v10 = vld [vmem:[#allocation4 + $0x41] sm:$0xff] }
 0x31f   : > { %v2471_v8 = vld [vmem:[#allocation4 + $0x40] sm:$0xff]  ;;  %2529 = vrot.lane.b32.xlu0 %v2476_v10, %s4667_s23  ;;  %v3089_v57 = vpack.i.bf16 %v2476_v10, %v1990_v59 }
 0x320   : > { %2509 = vrot.lane.b32.xlu2 %v2471_v8, %s4669_s16  ;;  %v1996_v59 = vld [vmem:[#allocation3 + $0xc9] sm:$0xff] }
 0x321   : > { %3090 = vrot.lane.b32.xlu1 %v3089_v57, %s4668_s30 }
 0x327   : > { %2217 = vrot.lane.b32.xlu0 %v2026_v38, %s4667_s23  ;;  %v1986_v38 = vld [vmem:[#allocation3 + $0x51] sm:$0xff] }
 0x328   : > { %2145 = vrot.lane.b32.xlu2 %v4257_v27, %s4669_s16 }
 0x329   : > { %3095 = vrot.lane.b32.xlu1 %v3094_v26, %s4669_s16 }
 0x330   : > { %2531 = vrot.lane.b32.xlu2 %v2477_v39, %s4667_s23 }
 0x34e   : > { %v2506_v16 = vpop.permute.xlu2 %2505 }
 0x34f   : > { %v2544_v24 = vsel %vm532_vm11, %v2539_v34, %v2506_v16  ;;  %v2687_v16 = vld [vmem:[%s4644_s7 + $0x78] sm:$0xff]  ;;  %v2686_v34 = vld [vmem:[%s4644_s7 + $0x70] sm:$0xff] }
 0x350   : > { %2708 = vmatpush.msrb.mxu2 %v2687_v16 }
 0x352   : > { %2709 = vmatpush.msrb.mxu2 %v2686_v34 }
 0x35c   : > { %v2508_v62 = vpop.permute.xlu2 %2507 }
 0x365   : > { %v2526_v12 = vpop.permute.xlu0 %2525  ;;  %v2488_v55 = vpop.permute.xlu1 %2487 }
 0x366   : > { %v2549_v0 = vsel %vm2285_vm14, %v2544_v24, %v2526_v12  ;;  %v2540_v27 = vsel %vm485_vm2, %v4339_v49, %v2488_v55  ;;  %v2685_v24 = vld [vmem:[%s4644_s7 + $0x68] sm:$0xff]  ;;  %v2703_v12 = vld [vmem:[%s4644_s7 + $0xf8] sm:$0xff]  ;;  %v2684_v55 = vld [vmem:[%s4644_s7 + $0x60] sm:$0xff] }
 0x367   : > { %2592 = vmatmul.f32.gmra.mxu1 %v2549_v0  ;;  %v2545_v4 = vsel %vm532_vm11, %v2540_v27, %v2508_v62  ;;  %v2702_v0 = vld [vmem:[%s4644_s7 + $0xf0] sm:$0xff]  ;;  %v2701_v27 = vld [vmem:[%s4644_s7 + $0xe8] sm:$0xff]  ;;  %2710 = vmatpush.msrb.mxu2 %v2685_v24  ;;  %v2683_v62 = vld [vmem:[%s4644_s7 + $0x58] sm:$0xff] }
 0x368   : > { %2733 = vmatpush.msrb.mxu1 %v2703_v12 }
 0x369   : > { %2711 = vmatpush.msrb.mxu2 %v2684_v55 }
 0x36a   : > { %2734 = vmatpush.msrb.mxu1 %v2702_v0 }
 0x36b   : > { %2712 = vmatpush.msrb.mxu2 %v2683_v62 }
 0x36c   : > { %2735 = vmatpush.msrb.mxu1 %v2701_v27 }
 0x373   : > { %v2528_v41 = vpop.permute.xlu0 %2527  ;;  %v2490_v1 = vpop.permute.xlu1 %2489 }
 0x374   : > { %v2550_v19 = vsel %vm2285_vm14, %v2545_v4, %v2528_v41  ;;  %v2541_v32 = vsel %vm485_vm2, %v2470_v45, %v2490_v1  ;;  %v2700_v41 = vld [vmem:[%s4644_s7 + $0xe0] sm:$0xff]  ;;  %v4447_v4 = vld [vmem:[#allocation3 + $0xc8] sm:$0xff] }
 0x375   : > { %2595 = vmatmul.f32.gmra.mxu1 %v2550_v19  ;;  %v2682_v19 = vld [vmem:[%s4644_s7 + $0x50] sm:$0xff]  ;;  %v2681_v1 = vld [vmem:[%s4644_s7 + $0x48] sm:$0xff] }
 0x376   : > { %2736 = vmatpush.msrb.mxu1 %v2700_v41  ;;  %2713 = vmatpush.msrb.mxu2 %v2682_v19 }
 0x378   : > { %2714 = vmatpush.msrb.mxu2 %v2681_v1 }
 0x37a   : > { %v2510_v53 = vpop.permute.xlu2 %2509 }
 0x37b   : > { %v2546_v60 = vsel %vm532_vm11, %v2541_v32, %v2510_v53  ;;  %v2699_v53 = vld [vmem:[%s4644_s7 + $0xd8] sm:$0xff]  ;;  %v2698_v32 = vld [vmem:[%s4644_s7 + $0xd0] sm:$0xff] }
 0x37c   : > { %2737 = vmatpush.msrb.mxu1 %v2699_v53 }
 0x37e   : > { %2738 = vmatpush.msrb.mxu1 %v2698_v32  ;;  %v1968_v32 = vld [vmem:[#allocation3 + $0x50] sm:$0xff] }
 0x382   : > { %v2146_v61 = vpop.permute.xlu2 %2145 }
 0x38a   : > { %v2532_v33 = vpop.permute.xlu2 %2531 }
 0x391   : > { %v2530_v13 = vpop.permute.xlu0 %2529 }
 0x392   : > { %v2551_v36 = vsel %vm2285_vm14, %v2546_v60, %v2530_v13  ;;  %v2680_v60 = vld [vmem:[%s4644_s7 + $0x40] sm:$0xff]  ;;  %v2697_v13 = vld [vmem:[%s4644_s7 + $0xc8] sm:$0xff] }
 0x393   : > { %v3091_v58 = vpop.permute.xlu1 %3090  ;;  %2598 = vmatmul.f32.gmra.mxu1 %v2551_v36  ;;  %v2013_v36 = vld [vmem:[#allocation3 + $0xd8] sm:$0xff]  ;;  %2715 = vmatpush.msrb.mxu2 %v2680_v60 }
 0x394   : > { %v3092_v49 = vunpack.i.l.bf16 %v3091_v58  ;;  %v3093_v23 = vunpack.i.h.bf16 %v3091_v58  ;;  %v2031_v58 = vld [vmem:[#allocation3 + $0xd9] sm:$0xff]  ;;  %2739 = vmatpush.msrb.mxu1 %v2697_v13 }
 0x395   : > { %v2590_v21 = vpop.f32.mrf.mxu1 }
 0x396   : > { %v2260_v9 = vsel %vm485_vm2, %v1972_v17, %v3092_v49  ;;  %v2542_v35 = vsel %vm485_vm2, %v2471_v8, %v3093_v23  ;;  %v2591_v30 = vadd.f32 %v3115_v20, %v2590_v21  ;;  %v2696_v49 = vld [vmem:[%s4644_s7 + $0xc0] sm:$0xff]  ;;  %v2678_v17 = vld [vmem:[%s4644_s7 + $0x30] sm:$0xff]  ;;  %v2677_v23 = vld [vmem:[%s4644_s7 + $0x28] sm:$0xff] }
 0x397   : > { %v2278_v52 = vsel %vm532_vm11, %v2260_v9, %v2146_v61  ;;  %v2679_v61 = vld [vmem:[%s4644_s7 + $0x38] sm:$0xff]  ;;  %2740 = vmatpush.msrb.mxu1 %v2696_v49 }
 0x398   : > { %v2604_v14 = vmax.f32 %v2591_v30, 0.0  ;;  %v2695_v9 = vld [vmem:[%s4644_s7 + $0xb8] sm:$0xff]  ;;  %2716 = vmatpush.msrb.mxu2 %v2679_v61  ;;  %v2673_v30 = vld [vmem:[%s4644_s7 + $0x8] sm:$0xff] }
 0x399   : > { %v2218_v15 = vpop.permute.xlu0 %2217  ;;  %2741 = vmatpush.msrb.mxu1 %v2695_v9  ;;  %v2691_v21 = vld [vmem:[%s4644_s7 + $0x98] sm:$0xff]  ;;  %v2771_v9 = vld [vmem:[%s4646_s9 + $0x30] sm:$0xff] }
 0x39a   : > { %v2297_v51 = vsel %vm2285_vm14, %v2278_v52, %v2218_v15  ;;  %v2694_v15 = vld [vmem:[%s4644_s7 + $0xb0] sm:$0xff]  ;;  %2717 = vmatpush.msrb.mxu2 %v2678_v17  ;;  %v2676_v52 = vld [vmem:[%s4644_s7 + $0x20] sm:$0xff]  ;;  %v2772_v17 = vld [vmem:[%s4646_s9 + $0x38] sm:$0xff] }
 0x39b   : > { %v4398_v3 = vpop.permute.xlu1 %3095  ;;  %2368 = vmatmul.f32.gmra.mxu2 %v2297_v51  ;;  %v2693_v51 = vld [vmem:[%s4644_s7 + $0xa8] sm:$0xff]  ;;  %2742 = vmatpush.msrb.mxu1 %v2694_v15  ;;  %v2769_v15 = vld [vmem:[%s4646_s9 + $0x20] sm:$0xff] }
 0x39c   : > { %v3097_v45 = vunpack.i.l.bf16 %v4398_v3  ;;  %2718 = vmatpush.msrb.mxu2 %v2677_v23  ;;  %v2770_v23 = vld [vmem:[%s4646_s9 + $0x28] sm:$0xff] }
 0x39d   : > { %2743 = vmatpush.msrb.mxu1 %v2693_v51 }
 0x39e   : > { %v2547_v42 = vsel %vm532_vm11, %v2542_v35, %v3097_v45  ;;  %v2014_v45 = vld [vmem:[#allocation3 + $0xe0] sm:$0xff]  ;;  %v2675_v35 = vld [vmem:[%s4644_s7 + $0x18] sm:$0xff]  ;;  %2719 = vmatpush.msrb.mxu2 %v2676_v52 }
 0x39f   : > { %v2552_v63 = vsel %vm2285_vm14, %v2547_v42, %v2532_v33  ;;  %v2032_v33 = vld [vmem:[#allocation3 + $0xe1] sm:$0xff]  ;;  %v2768_v52 = vld [vmem:[%s4646_s9 + $0x18] sm:$0xff] }
 0x3a0   : > { %2601 = vmatmul.f32.gmra.mxu1 %v2552_v63  ;;  %v2692_v42 = vld [vmem:[%s4644_s7 + $0xa0] sm:$0xff]  ;;  %v2674_v63 = vld [vmem:[%s4644_s7 + $0x10] sm:$0xff]  ;;  %2720 = vmatpush.msrb.mxu2 %v2675_v35  ;;  %v2766_v35 = vld [vmem:[%s4646_s9 + $0x8] sm:$0xff] }
 0x3a1   : > { %2744 = vmatpush.msrb.mxu1 %v2692_v42  ;;  %v2765_v42 = vld [vmem:[%s4646_s9] sm:$0xff] }
 0x3a2   : > { %2721 = vmatpush.msrb.mxu2 %v2674_v63 }
 0x3a3   : > { %2745 = vmatpush.msrb.mxu1 %v2691_v21  ;;  %v3116_v21 = vld [vmem:[%s4645_s8] ss:$0 sm:$0xff] }
 0x3a4   : > { %2722 = vmatpush.msrb.mxu2 %v2673_v30 }
 0x3e4   : > { %v2593_v31 = vpop.f32.mrf.mxu1 }
 0x3e5   : > { %v2594_v46 = vadd.f32 %v3115_v20, %v2593_v31  ;;  %v2690_v31 = vld [vmem:[%s4644_s7 + $0x90] sm:$0xff] }
 0x3e6   : > { %2746 = vmatpush.msrb.mxu1 %v2690_v31 }
 0x3e7   : > { %v2605_v47 = vmax.f32 %v2594_v46, 0.0  ;;  %v2641_v46 = vld [vmem:[#allocation5 + $0x31] sm:$0xff] }
 0x3e9   : > { %v2608_v11 = vmax.f32 %v2604_v14, %v2605_v47  ;;  %v2630_v14 = vld [vmem:[#allocation5] sm:$0xff]  ;;  %v2672_v47 = vld [vmem:[%s4644_s7] sm:$0xff] }
 0x3ea   : > { %2723 = vmatpush.msrb.mxu2 %v2672_v47 }
 0x3eb   : > { %v2612_v40 = vrot.slane %v2608_v11, 1 }
 0x3ec   : > { %2785 = vmatpush.msra.mxu2 %v2772_v17 }
 0x3ed   : > { %v2616_v18 = vmax.f32 %v2608_v11, %v2612_v40  ;;  %v2022_v11 = vld [vmem:[#allocation3 + $0x69] sm:$0xff] }
 0x3ee   : > { %2786 = vmatpush.msra.mxu2 %v2771_v9 }
 0x3ef   : > { %v2620_v2 = vrot.slane %v2616_v18, 1 }
 0x3f0   : > { %2787 = vmatpush.msra.mxu2 %v2770_v23 }
 0x3f1   : > { %v2624_v25 = vsel %vm1889_vm4, %v2616_v18, %v2620_v2  ;;  %v2689_v18 = vld [vmem:[%s4644_s7 + $0x88] sm:$0xff]  ;;  %v2688_v2 = vld [vmem:[%s4644_s7 + $0x80] sm:$0xff] }
 0x3f2   : > { %2628 = vst.msk [vmem:[#allocation5 + $0x11] sm:$0x3] %vm2627_vm0, %v2624_v25  ;;  %v2596_v50 = vpop.f32.mrf.mxu1  ;;  %2747 = vmatpush.msrb.mxu1 %v2689_v18  ;;  %2788 = vmatpush.msra.mxu2 %v2769_v15  ;;  %v2803_v18 = vld [vmem:[%s4648_s11 + $0x28] sm:$0xff] }
 0x3f3   : > { %v2597_v44 = vadd.f32 %v3115_v20, %v2596_v50 }
 0x3f4   : > { %2748 = vmatpush.msrb.mxu1 %v2688_v2  ;;  %2789 = vmatpush.msra.mxu2 %v2768_v52 }
 0x3f5   : > { %v2606_v10 = vmax.f32 %v2597_v44, 0.0 }
 0x3f9   : > { %v2634_v43 = vld [vmem:[#allocation5 + $0x11] sm:$0xff] }
 0x3fa   : > { %v3099_v5 = vpack.i.bf16 %v2634_v43, %v2634_v43 }
 0x3fc   : > { %3100 = vrot.lane.b32.xlu0 %v3099_v5, %s4669_s16  ;;  %v2631_v5 = vld [vmem:[#allocation5 + $0x10] sm:$0xff] }
 0x404   : > { %2081 = vrot.lane.b32.xlu0 %v4180_v48, %s4668_s30 }
 0x40c   : > { %2083 = vrot.lane.b32.xlu0 %v4217_v37, %s4668_s30 }
 0x410   : > { %v2599_v7 = vpop.f32.mrf.mxu1 }
 0x411   : > { %v2600_v56 = vadd.f32 %v3115_v20, %v2599_v7  ;;  %v3098_v20 = vunpack.i.h.bf16 %v4398_v3  ;;  %v3104_v3 = vpack.i.bf16 %v2641_v46, %v4231_v54 }
 0x413   : > { %v2607_v8 = vmax.f32 %v2600_v56, 0.0  ;;  %v2666_v40 = vsel %vm532_vm11, %v2630_v14, %v3098_v20 }
 0x414   : > { %2085 = vrot.lane.b32.xlu0 %v1996_v59, %s4668_s30  ;;  %2724 = vmatmul.f32.vlgmr.msrb.gmra.mxu2 %v2666_v40  ;;  %v2804_v40 = vld [vmem:[%s4648_s11 + $0x30] sm:$0x3] }
 0x415   : > { %v2609_v57 = vmax.f32 %v2606_v10, %v2607_v8  ;;  %2910 = vmatpush.msk.msrb.mxu3 %vm1898_vm5, %v2804_v40 }
 0x417   : > { %v2613_v29 = vrot.slane %v2609_v57, 1  ;;  %2823 = vmatpush.msrb.mxu3 %v2803_v18 }
 0x419   : > { %v2617_v22 = vmax.f32 %v2609_v57, %v2613_v29 }
 0x41b   : > { %v2621_v26 = vrot.slane %v2617_v22, 1 }
 0x41c   : > { %2065 = vrot.lane.b32.xlu0 %v1986_v38, %s4668_s30  ;;  %s2846_s30 = sshll.u32 %s432_s1, 4  ;;  %s2847_s30 = int_to_ptr.vmem [resolvable:$true] %s2846_s30 }
 0x41d   : > { %v2625_v39 = vsel %vm1889_vm4, %v2617_v22, %v2621_v26  ;;  %v2602_v48 = vpop.f32.mrf.mxu1  ;;  %v1976_v22 = vld [vmem:[#allocation3 + $0xb0] sm:$0xff] }
 0x41e   : > { %2629 = vst.msk [vmem:[#allocation5 + $0x21] sm:$0x3] %vm2627_vm0, %v2625_v39  ;;  %v2369_v37 = vpop.f32.mrf.mxu2 }
 0x425   : > { %v2640_v6 = vld [vmem:[#allocation5 + $0x21] sm:$0xff] }
 0x426   : > { %2659 = vrot.lane.b32.xlu1 %v2640_v6, %s4669_s16  ;;  %2649 = vrot.lane.b32.xlu2 %v2640_v6, %s4669_s16  ;;  %v2632_v56 = vld [vmem:[#allocation5 + $0x20] sm:$0xff] }
 0x42e   : > { %2153 = vrot.lane.b32.xlu1 %v4447_v4, %s4669_s16  ;;  %2225 = vrot.lane.b32.xlu2 %v1996_v59, %s4667_s23 }
 0x436   : > { %2155 = vrot.lane.b32.xlu1 %v2013_v36, %s4669_s16  ;;  %2227 = vrot.lane.b32.xlu2 %v2031_v58, %s4667_s23 }
 0x43e   : > { %2157 = vrot.lane.b32.xlu1 %v2014_v45, %s4669_s16  ;;  %2229 = vrot.lane.b32.xlu2 %v2032_v33, %s4667_s23  ;;  %v2767_v33 = vld [vmem:[%s4646_s9 + $0x10] sm:$0xff] }
 0x43f   : > { %2790 = vmatpush.msra.mxu2 %v2767_v33 }
 0x441   : > { %2791 = vmatpush.msra.mxu2 %v2766_v35 }
 0x443   : > { %2792 = vmatpush.msra.mxu2 %v2765_v42 }
 0x446   : > { %3105 = vrot.lane.b32.xlu1 %v3104_v3, %s4669_s16  ;;  %2209 = vrot.lane.b32.xlu2 %v2022_v11, %s4667_s23  ;;  %s2844_s16 = scalar_lea.hbm %s4650_s13, %s3282_s29  ;;  %s3142_s23 = scalar_lea.hbm %s4650_s13, 2 }
 0x447   : > { %s2848_s2 = sshll.u32 %s2844_s16, 4  ;;  %s2849_s2 = int_to_ptr.hbm [resolvable:$true] %s2848_s2 }
 0x448   : > { %s3136_s15 = sshra.s32 %s2849_s2, 4  ;;  %s3137_s15 = int_to_ptr.hbm [resolvable:$true] %s3136_s15 }
 0x449   : > { %s3138_s22 = scalar_lea.hbm %s3137_s15, 1  ;;  %p3143_p0 = scmp.lt.s32.totalorder %s3137_s15, %s4650_s13 }
 0x44a   : > { %p3139_p11 = scmp.ne.s32.totalorder %s3137_s15, %s3138_s22  ;;  %p3144_p1 = scmp.lt.s32.totalorder %s3142_s23, %s3138_s22 }
 0x44c   : > { %p3140_p12 = pnand %p3139_p11, %p3299_p5  ;;  %p3145_p2 = por %p3144_p1, %p3143_p0 }
 0x44e   : > { %p3141_p13 = pneg %p3140_p12 }
 0x450   : > { %p3146_p3 = pnand %p3145_p2, %p3141_p13 }
 0x46e   : > { %v3101_v25 = vpop.permute.xlu0 %3100 }
 0x46f   : > { %v3103_v54 = vunpack.i.h.bf16 %v3101_v25  ;;  %v3102_v43 = vunpack.i.l.bf16 %v3101_v25  ;;  %v2802_v25 = vld [vmem:[%s4648_s11 + $0x20] sm:$0xff] }
 0x470   : > { %2824 = vmatpush.msrb.mxu3 %v2802_v25 }
 0x471   : > { %v2667_v50 = vsel %vm532_vm11, %v2631_v5, %v3102_v43  ;;  %v2669_v44 = vsel %vm532_vm11, %v2631_v5, %v3103_v54  ;;  %v2801_v43 = vld [vmem:[%s4648_s11 + $0x18] sm:$0xff] }
 0x472   : > { %2727 = vmatmul.f32.gmra.mxu2 %v2667_v50  ;;  %2749 = vmatmul.f32.vlgmr.msrb.gmra.mxu1 %v2669_v44  ;;  %v2800_v50 = vld [vmem:[%s4648_s11 + $0x10] sm:$0xff]  ;;  %v2799_v44 = vld [vmem:[%s4648_s11 + $0x8] sm:$0xff] }
 0x473   : > { %2825 = vmatpush.msrb.mxu3 %v2801_v43 }
 0x475   : > { %2826 = vmatpush.msrb.mxu3 %v2800_v50 }
 0x476   : > { %v2082_v8 = vpop.permute.xlu0 %2081 }
 0x477   : > { %v2264_v38 = vsel %vm485_vm2, %v1976_v22, %v2082_v8  ;;  %2827 = vmatpush.msrb.mxu3 %v2799_v44 }
 0x47e   : > { %v2084_v37 = vpop.permute.xlu0 %2083 }
 0x47f   : > { %v2265_v16 = vsel %vm485_vm2, %v4219_v28, %v2084_v37  ;;  %v2638_v28 = vld [vmem:[#allocation5 + $0x30] sm:$0xff] }
 0x480   : > { %v2650_v7 = vpop.permute.xlu2 %2649 }
 0x481   : > { %v2668_v59 = vsel %vm532_vm11, %v2632_v56, %v2650_v7  ;;  %v2798_v7 = vld [vmem:[%s4648_s11] sm:$0xff] }
 0x482   : > { %2730 = vmatmul.f32.gmra.mxu2 %v2668_v59  ;;  %2828 = vmatpush.msrb.mxu3 %v2798_v7 }
 0x486   : > { %v2086_v0 = vpop.permute.xlu0 %2085 }
 0x487   : > { %v2266_v27 = vsel %vm485_vm2, %v4447_v4, %v2086_v0 }
 0x488   : > { %v2226_v29 = vpop.permute.xlu2 %2225 }
 0x48e   : > { %v2066_v53 = vpop.permute.xlu0 %2065 }
 0x48f   : > { %v2256_v58 = vsel %vm485_vm2, %v1968_v32, %v2066_v53  ;;  %vm2833_vm2 = vcmask 57344  }
 0x490   : > { %v2228_v6 = vpop.permute.xlu2 %2227 }
 0x497   : > { %v2725_v51 = vpop.f32.mrf.mxu2 }
 0x498   : > { %v2660_v10 = vpop.permute.xlu1 %2659  ;;  %v2230_v55 = vpop.permute.xlu2 %2229  ;;  %v2726_v30 = vadd.f32 %v3116_v21, %v2725_v51 }
 0x499   : > { %v2670_v57 = vsel %vm532_vm11, %v2632_v56, %v2660_v10 }
 0x49a   : > { %2752 = vmatmul.f32.gmra.mxu1 %v2670_v57 }
 0x4a0   : > { %v2154_v26 = vpop.permute.xlu1 %2153  ;;  %v2210_v36 = vpop.permute.xlu2 %2209 }
 0x4a1   : > { %v2282_v39 = vsel %vm532_vm11, %v2264_v38, %v2154_v26 }
 0x4a2   : > { %v2301_v48 = vsel %vm2285_vm14, %v2282_v39, %v2226_v29  ;;  %v2773_v29 = vld [vmem:[%s4647_s10] sm:$0x1] }
 0x4a3   : > { %2378 = vmatmul.f32.gmra.mxu3 %v2301_v48  ;;  %v2805_v39 = vld [vmem:[%s4649_s12] sm:$0x1] }
 0x4a8   : > { %v2156_v34 = vpop.permute.xlu1 %2155 }
 0x4a9   : > { %v2283_v24 = vsel %vm532_vm11, %v2265_v16, %v2156_v34 }
 0x4aa   : > { %v2302_v12 = vsel %vm2285_vm14, %v2283_v24, %v2228_v6 }
 0x4ab   : > { %2380 = vmatmul.f32.gmra.mxu3 %v2302_v12 }
 0x4b0   : > { %v2158_v62 = vpop.permute.xlu1 %2157 }
 0x4b1   : > { %v2284_v41 = vsel %vm532_vm11, %v2266_v27, %v2158_v62 }
 0x4b2   : > { %v2303_v19 = vsel %vm2285_vm14, %v2284_v41, %v2230_v55 }
 0x4b3   : > { %2382 = vmatmul.f32.gmra.mxu3 %v2303_v19 }
 0x4b8   : > { %v3106_v1 = vpop.permute.xlu1 %3105 }
 0x4b9   : > { %v3108_v60 = vunpack.i.h.bf16 %v3106_v1  ;;  %v3107_v13 = vunpack.i.l.bf16 %v3106_v1 }
 0x4bb   : > { %v2671_v61 = vsel %vm532_vm11, %v2638_v28, %v3108_v60  ;;  %v2274_v49 = vsel %vm532_vm11, %v2256_v58, %v3107_v13 }
 0x4bc   : > { %2755 = vmatmul.f32.gmra.mxu1 %v2671_v61  ;;  %v2293_v4 = vsel %vm2285_vm14, %v2274_v49, %v2210_v36 }
 0x4bd   : > { %2358 = vmatmul.f32.gmra.mxu0 %v2293_v4 }
 0x4ef   : > { %v2750_v20 = vpop.f32.mrf.mxu1 }
 0x4f0   : > { %v2751_v31 = vadd.f32 %v2750_v20, %v2726_v30 }
 0x4f2   : > { %v2758_v11 = vmax.f32 %v2751_v31, 0.0 }
 0x4f5   : > { %v2728_v45 = vpop.f32.mrf.mxu2 }
 0x4f6   : > { %v2729_v46 = vadd.f32 %v3116_v21, %v2728_v45 }
 0x505   : > { %v2731_v63 = vpop.f32.mrf.mxu2 }
 0x517   : > { %v2753_v14 = vpop.f32.mrf.mxu1 }
 0x518   : > { %v2754_v47 = vadd.f32 %v2753_v14, %v2729_v46 }
 0x51a   : > { %v2759_v3 = vmax.f32 %v2754_v47, 0.0 }
 0x51c   : > { %v2760_v2 = vmax.f32 %v2758_v11, %v2759_v3 }
 0x51e   : > { %v2762_v54 = vrot.slane %v2760_v2, 1 }
 0x520   : > { %v2764_v5 = vmax.f32 %v2760_v2, %v2762_v54 }
 0x522   : > { %2909 = vmatmul.msk.f32.vlgmr.msra.gmra.mxu2 %vm532_vm11, %v2764_v5 }
 0x526   : > { %v2379_v56 = vpop.f32.mrf.mxu3 }
 0x52e   : > { %v2381_v59 = vpop.f32.mrf.mxu3 }
 0x536   : > { %v2383_v10 = vpop.f32.mrf.mxu3 }
 0x539   : > { %v2756_v8 = vpop.f32.mrf.mxu1 }
 0x53a   : > { %v2359_v57 = vpop.f32.mrf.mxu0 }
 0x5a5   : > { %v2794_v22 = vpop.f32.mrf.mxu2 }
 0x5a6   : > { %v2795_v38 = vadd.f32 %v2794_v22, %v2773_v29 }
 0x5a8   : > { %v2797_v26 = vmax.f32 %v2795_v38, 0.0 }
 0x5aa   : > { %2911 = vmatmul.msk.f32.vlgmr.msrb.gmra.mxu3 %vm2806_vm1, %v2797_v26 }
 0x62d   : > { %v2830_v48 = vpop.f32.mrf.mxu3 }
 0x62e   : > { %v2831_v37 = vadd.f32 %v2830_v48, %v2805_v39 }
 0x630   : > { %2834 = vst.msk [vmem:[%s432_s1] sm:$0x1] %vm2833_vm2, %v2831_v37 }
 0x631   : > { %3149 = shalt.err (!%p3146_p3)
}
 0x632   : > { %2947 = dma.vmem_to_hbm [thread:$0]  (%p3299_p5), %s2847_s30, 16, %s2849_s2, %s2836_s3  }
 0x633 PF: > { %p2953_p4 = scmp.ge.s32.totalorder %s3184_s28, 2  ;;  %s2860_s0 = sand.u32 1, %s3172_s25  }
 0x634   : > { %s2861_s21 = scalar_lea.sflag [#allocation7], %s2860_s0 }
 0x635   : > { %p2950_p7 = pnand %p2953_p4, %p3303_p6 }
 0x637   : > { %p2951_p8 = pneg %p2950_p7 }
 0x639   : > { %3167 = dma.done.wait (%p2951_p8), %s2861_s21, 16  }
 0x63a   : > { %3169 = vsyncadd (%p2951_p8), %s2861_s21, 4294967280  ;;  %p23_p9 = scmp.ge.s32.totalorder %s3286_s14, 4   ;;  %s4670_s25 = smov %s3176_s26 }
 0x63b   : > { %s4671_s26 = smov %s3180_s27  ;;  %s4672_s27 = smov %s3297_s17 }
 0x63c   : > { %s4673_s28 = smov %s3286_s14  ;;  %25 = sbr.rel (!%p23_p9) target bundleno = 8 (0x8), region = 115 }
 0x641   :  { %2866 = vsyncpa [#allocation7], 1 }
 0x642   :  { %2868 = vsyncpa [#allocation7 + $0x1], 1 }

</bundles_post_ra>
